<compile_context>
chip_gen: v7x
topology: tpu7x:2x2x1
jax: 0.10.0
libtpu: 0.0.40
codegen_flags: <defaults>
</compile_context>

<pallas_src>
import jax
import jax.numpy as jnp
from jax.experimental import pallas as pl
from jax.experimental.pallas import tpu as pltpu

BN_EPS = 1e-5
LANE = 128
LPAD = 8          # left zero-pad columns: residual / centre tap 8-aligned


def _round_up(x, m):
    return (x + m - 1) // m * m


def _vmem_capacity_bytes():
    try:
        info = pltpu.get_tpu_info()
    except Exception:
        return 64 * 1024 * 1024          # conservative (v7x per-TC VMEM)
    for name in ("vmem_capacity_bytes", "vmem_size_bytes", "vmem_bytes"):
        v = getattr(info, name, None)
        if v:
            try:
                return int(v)
            except Exception:
                pass
    return 64 * 1024 * 1024


def _estimate_vmem_bytes(sh, w, wh, wx, cp):
    """Rough per-step VMEM footprint: blocks + scratch + in-kernel values."""
    bf, f32 = 2, 4
    xbuf = 2 * (sh + 4) * wx * cp * bf                  # manual double buffer
    wts = 2 * 2 * 3 * 3 * cp * cp * bf                  # w1+w2, pipeline bufs
    outb = 2 * sh * w * cp * bf                         # output block x2
    p1 = (sh + 4) * wh * 3 * cp * bf                    # packed conv1 LHS
    a1 = (sh + 2) * wh * cp * f32                       # conv1 accumulator
    hbuf = (sh + 2) * wh * cp * (f32 + bf)              # h (f32) + h (bf16)
    p2 = (sh + 2) * w * 3 * cp * bf                     # packed conv2 LHS
    a2 = sh * w * cp * f32                              # conv2 accumulator
    misc = wh * cp * f32 + 4 * cp * f32
    return xbuf + wts + outb + p1 + a1 + hbuf + p2 + a2 + misc


def _pick_strip(h, b, w, wh, wx, cp, budget):
    divisors = [d for d in range(1, h + 1) if h % d == 0]
    fitting = [d for d in divisors
               if _estimate_vmem_bytes(d, w, wh, wx, cp) <= budget] or [1]
    # Largest strip that still gives >= 4 (and an even number of) grid steps
    # so the pipeline has work and v7x's two TensorCores stay balanced.
    for sh in sorted(fitting, reverse=True):
        steps = b * (h // sh)
        if steps >= 4 and steps % 2 == 0:
            return sh
    return max(fitting)


# ------------------------------ fused kernel -------------------------------

def _make_basic_block_kernel(w_out, sh, wh, cp):
    off = LPAD - 2                    # leftmost conv1 tap column in the slab
    k3 = 3 * cp

    def kernel(x_hbm, w1_ref, w2_ref, b1_ref, b2_ref, cmask_ref, out_ref,
               xbuf, sem):
        # x_hbm  : (B, H+4, Wx, Cp) bf16   padded input, stays in HBM
        # w*_ref : (3, 3*Cp, Cp)    bf16   BN-folded weights [ky, kx*Cp+ci, co]
        # b*_ref : (1, Cp)          f32    BN-folded biases
        # cmask  : (1, Wh, Cp)      f32    grid-invariant column validity mask
        # out_ref: (1, Sh, W, Cp)   bf16   one row-strip of the output
        # xbuf   : (2, Sh+4, Wx, Cp) bf16  manual double buffer
        b = pl.program_id(0)
        s = pl.program_id(1)
        n_strips = pl.num_programs(1)
        slot = s % 2
        other = 1 - slot

        def strip_copy(strip_idx, slot_idx):
            return pltpu.make_async_copy(
                x_hbm.at[b, pl.ds(strip_idx * sh, sh + 4)],
                xbuf.at[slot_idx], sem.at[slot_idx])

        # P4 double buffer: sync-fetch the first strip of each image, always
        # prefetch the next strip before computing the current one.
        @pl.when(s == 0)
        def _():
            strip_copy(0, 0).start()

        @pl.when(s + 1 < n_strips)
        def _():
            strip_copy(s + 1, other).start()

        strip_copy(s, slot).wait()

        xs = xbuf[slot]                                  # (Sh+4, Wx, Cp) bf16

        # ---- conv1: kx taps packed once along the contraction dim ----------
        p1 = jnp.concatenate(
            [xs[:, off:off + wh, :],
             xs[:, off + 1:off + 1 + wh, :],
             xs[:, off + 2:off + 2 + wh, :]], axis=-1)   # (Sh+4, Wh, 3Cp) bf16
        p1 = p1.reshape((sh + 4) * wh, k3)

        acc1 = jnp.zeros(((sh + 2) * wh, cp), jnp.float32)
        for ky in range(3):                              # Wh-aligned row slices
            acc1 = acc1 + jnp.dot(p1[ky * wh:ky * wh + (sh + 2) * wh],
                                  w1_ref[ky],
                                  preferred_element_type=jnp.float32)

        # bias + relu + column mask (columns outside the image are conv2's
        # zero padding, not conv1 outputs).
        h = jnp.maximum((acc1.reshape(sh + 2, wh, cp) + b1_ref[...])
                        * cmask_ref[...], 0.0)

        # Row zeroing only matters on the first / last strip of the image.
        keep_top = jnp.where(s == 0, 0.0, 1.0)
        keep_bot = jnp.where(s == n_strips - 1, 0.0, 1.0)
        h = jnp.concatenate(
            [h[0:1] * keep_top, h[1:sh + 1], h[sh + 1:sh + 2] * keep_bot],
            axis=0)
        hb = h.astype(jnp.bfloat16)                      # single cast for conv2

        # ---- conv2 + bn2 + residual + relu ---------------------------------
        p2 = jnp.concatenate(
            [hb[:, 0:w_out, :], hb[:, 1:1 + w_out, :], hb[:, 2:2 + w_out, :]],
            axis=-1)                                     # (Sh+2, W, 3Cp) bf16
        p2 = p2.reshape((sh + 2) * w_out, k3)

        acc2 = jnp.zeros((sh * w_out, cp), jnp.float32)
        for ky in range(3):
            acc2 = acc2 + jnp.dot(p2[ky * w_out:ky * w_out + sh * w_out],
                                  w2_ref[ky],
                                  preferred_element_type=jnp.float32)

        resid = xs[2:2 + sh, LPAD:LPAD + w_out, :].astype(jnp.float32)
        out = jnp.maximum(acc2.reshape(sh, w_out, cp) + b2_ref[...] + resid,
                          0.0)
        out_ref[...] = out.astype(out_ref.dtype).reshape(1, sh, w_out, cp)

    return kernel


# ------------------------------- wrappers -----------------------------------

def _fold_bn(w_hwio, gamma, beta, mean, var, eps=BN_EPS):
    """Fold eval-mode BatchNorm into conv weights (HWIO) + bias (f32)."""
    scale = gamma / jnp.sqrt(var + eps)                 # (Cout,)
    w_folded = w_hwio.astype(jnp.float32) * scale[None, None, None, :]
    bias = beta - mean * scale
    return w_folded, bias.astype(jnp.float32)


def basic_block_nhwc(x_nhwc, params, *, strip=None):
    """Fused BasicBlock on NHWC activations with lane-dense (128-padded)
    channels.  x_nhwc: (B, H, W, Cp) with zero channel padding.  Returns
    (B, H, W, Cp) bf16 in the same layout (chainable across blocks)."""
    B, H, W, Cp = x_nhwc.shape
    assert Cp % LANE == 0, Cp
    C = params["w1"].shape[2]

    Wh = _round_up(W + 2, 8)            # conv1 intermediate width (sublane)
    Wx = LPAD + Wh                      # padded slab width

    cap = _vmem_capacity_bytes()
    Sh = (_pick_strip(H, B, W, Wh, Wx, Cp, budget=int(cap * 0.45))
          if strip is None else strip)
    assert H % Sh == 0, (H, Sh)
    vmem_limit = min(int(cap * 0.75),
                     max(2 * _estimate_vmem_bytes(Sh, W, Wh, Wx, Cp),
                         16 * 1024 * 1024))

    w1, b1 = _fold_bn(params["w1"], params["bn1_gamma"], params["bn1_beta"],
                      params["bn1_mean"], params["bn1_var"])
    w2, b2 = _fold_bn(params["w2"], params["bn2_gamma"], params["bn2_beta"],
                      params["bn2_mean"], params["bn2_var"])

    def prep_w(w):   # (3,3,C,C) f32 -> (3, 3*Cp, Cp) bf16, kx stacked along K
        wp = jnp.zeros((3, 3, Cp, Cp), jnp.float32).at[:, :, :C, :C].set(w)
        return wp.reshape(3, 3 * Cp, Cp).astype(jnp.bfloat16)

    def prep_b(b):   # (C,) f32 -> (1, Cp) f32
        return jnp.zeros((1, Cp), jnp.float32).at[:, :C].set(b.reshape(1, -1))

    # Grid-invariant column mask for the conv1 intermediate: column j is image
    # column j-1; only 1..W are real conv1 outputs.
    col = jnp.arange(Wh)
    cmask = jnp.broadcast_to(
        ((col >= 1) & (col <= W)).astype(jnp.float32)[None, :, None],
        (1, Wh, Cp))

    # Single pad pass: 2 halo rows top/bottom, LPAD zero cols left, Wh-W right.
    xp = jnp.pad(x_nhwc.astype(jnp.bfloat16),
                 ((0, 0), (2, 2), (LPAD, Wx - W - LPAD), (0, 0)))

    kernel = _make_basic_block_kernel(W, Sh, Wh, Cp)

    return pl.pallas_call(
        kernel,
        out_shape=jax.ShapeDtypeStruct((B, H, W, Cp), jnp.bfloat16),
        grid_spec=pltpu.PrefetchScalarGridSpec(
            num_scalar_prefetch=0,
            grid=(B, H // Sh),
            in_specs=[
                pl.BlockSpec(memory_space=pl.ANY),                   # x in HBM
                pl.BlockSpec((3, 3 * Cp, Cp), lambda b, s: (0, 0, 0)),
                pl.BlockSpec((3, 3 * Cp, Cp), lambda b, s: (0, 0, 0)),
                pl.BlockSpec((1, Cp), lambda b, s: (0, 0)),
                pl.BlockSpec((1, Cp), lambda b, s: (0, 0)),
                pl.BlockSpec((1, Wh, Cp), lambda b, s: (0, 0, 0)),
            ],
            out_specs=pl.BlockSpec((1, Sh, W, Cp), lambda b, s: (b, s, 0, 0)),
            scratch_shapes=[
                pltpu.VMEM((2, Sh + 4, Wx, Cp), jnp.bfloat16),
                pltpu.SemaphoreType.DMA((2,)),
            ]),
        compiler_params=pltpu.CompilerParams(
            dimension_semantics=("parallel", "arbitrary"),
            vmem_limit_bytes=vmem_limit),
    )(xp, prep_w(w1), prep_w(w2), prep_b(b1), prep_b(b2), cmask)


def basic_block_forward(x_nchw, params, *, strip=None):
    """NCHW f32 test-harness wrapper around the NHWC lane-dense kernel."""
    B, C, H, W = x_nchw.shape
    Cp = _round_up(C, LANE)
    x_nhwc = jnp.pad(jnp.transpose(x_nchw, (0, 2, 3, 1)),
                     ((0, 0), (0, 0), (0, 0), (0, Cp - C)))
    out = basic_block_nhwc(x_nhwc, params, strip=strip)
    return jnp.transpose(out[..., :C].astype(jnp.float32), (0, 3, 1, 2))


# ------------------- pure-JAX f32 reference (verification) ------------------

def _reference(x_nchw, params):
    def conv(x, w_hwio):
        return jax.lax.conv_general_dilated(
            x, w_hwio, window_strides=(1, 1), padding="SAME",
            dimension_numbers=("NCHW", "HWIO", "NCHW"))

    def bn(x, g, b, m, v):
        return (x - m[None, :, None, None]) / jnp.sqrt(v + BN_EPS)[None, :, None, None] \
            * g[None, :, None, None] + b[None, :, None, None]

    out = conv(x_nchw, params["w1"])
    out = bn(out, params["bn1_gamma"], params["bn1_beta"],
             params["bn1_mean"], params["bn1_var"])
    out = jnp.maximum(out, 0.0)
    out = conv(out, params["w2"])
    out = bn(out, params["bn2_gamma"], params["bn2_beta"],
             params["bn2_mean"], params["bn2_var"])
    out = out + x_nchw
    return jnp.maximum(out, 0.0)


# ---------------------------------- main ------------------------------------

if __name__ == "__main__":
    B, C, H, W = 2, 4, 16, 16          # inplanes = planes = 4, stride = 1
    key = jax.random.PRNGKey(0)
    ks = jax.random.split(key, 10)

    x = jax.random.normal(ks[0], (B, C, H, W), jnp.float32)

    params = {
        # conv weights in HWIO (3, 3, Cin, Cout)
        "w1": 0.1 * jax.random.normal(ks[1], (3, 3, C, C), jnp.float32),
        "w2": 0.1 * jax.random.normal(ks[2], (3, 3, C, C), jnp.float32),
        "bn1_gamma": 1.0 + 0.1 * jax.random.normal(ks[3], (C,), jnp.float32),
        "bn1_beta": 0.1 * jax.random.normal(ks[4], (C,), jnp.float32),
        "bn1_mean": 0.1 * jax.random.normal(ks[5], (C,), jnp.float32),
        "bn1_var": jnp.abs(jax.random.normal(ks[6], (C,), jnp.float32)) + 0.5,
        "bn2_gamma": 1.0 + 0.1 * jax.random.normal(ks[7], (C,), jnp.float32),
        "bn2_beta": 0.1 * jax.random.normal(ks[8], (C,), jnp.float32),
        "bn2_mean": 0.1 * jax.random.normal(ks[9], (C,), jnp.float32),
        "bn2_var": jnp.abs(jax.random.normal(ks[0], (C,), jnp.float32)) + 0.5,
    }

    out = jax.block_until_ready(basic_block_forward(x, params))
    ref = jax.block_until_ready(_reference(x, params))

    assert out.shape == (B, C, H, W), out.shape
    # MXU operands and the kernel output are bf16 (accumulation stays f32),
    # an intentional precision trade vs the pure-f32 reference.
    assert jnp.allclose(out, ref, atol=5e-2, rtol=5e-2), \
        float(jnp.max(jnp.abs(out - ref)))

    print("KERNEL_OK")
</pallas_src>

<mosaic_0001>
module attributes {stable_mosaic.version = 11 : i64} {
  func.func @kernel(%arg0: i32, %arg1: i32, %arg2: memref<2x20x32x128xbf16, #tpu.memory_space<any>>, %arg3: memref<3x384x128xbf16, #tpu.memory_space<vmem>>, %arg4: memref<3x384x128xbf16, #tpu.memory_space<vmem>>, %arg5: memref<1x128xf32, #tpu.memory_space<vmem>>, %arg6: memref<1x128xf32, #tpu.memory_space<vmem>>, %arg7: memref<1x24x128xf32, #tpu.memory_space<vmem>>, %arg8: memref<1x8x16x128xbf16, #tpu.memory_space<vmem>>, %arg9: memref<2x12x32x128xbf16, #tpu.memory_space<vmem>>, %arg10: memref<2x!tpu.dma_semaphore, #tpu.memory_space<semaphore_mem>>) attributes {dimension_semantics = [#tpu.dimension_semantics<parallel>, #tpu.dimension_semantics<arbitrary>], iteration_bounds = array<i64: 2, 2>, scalar_prefetch = 0 : i64, scratch_operands = 2 : i64, tpu.core_type = #tpu.core_type<tc>, window_params = [{}, {pipeline_mode = #tpu.pipeline_mode<synchronous>, transform_indices = @transform_1, window_bounds = array<i64: 3, 384, 128>}, {pipeline_mode = #tpu.pipeline_mode<synchronous>, transform_indices = @transform_2, window_bounds = array<i64: 3, 384, 128>}, {pipeline_mode = #tpu.pipeline_mode<synchronous>, transform_indices = @transform_3, window_bounds = array<i64: 1, 128>}, {pipeline_mode = #tpu.pipeline_mode<synchronous>, transform_indices = @transform_4, window_bounds = array<i64: 1, 128>}, {pipeline_mode = #tpu.pipeline_mode<synchronous>, transform_indices = @transform_5, window_bounds = array<i64: 1, 24, 128>}, {transform_indices = @transform_6, window_bounds = array<i64: 1, 8, 16, 128>}]} {
    %c2_i32 = arith.constant 2 : i32
    %c0_i32 = arith.constant 0 : i32
    %0 = arith.cmpi eq, %c2_i32, %c0_i32 : i32
    %c1_i32 = arith.constant 1 : i32
    %1 = arith.select %0, %c1_i32, %c2_i32 : i32
    %2 = arith.remsi %arg1, %1 : i32
    %c0_i32_0 = arith.constant 0 : i32
    %3 = arith.cmpi ne, %2, %c0_i32_0 : i32
    %c0_i32_1 = arith.constant 0 : i32
    %4 = arith.cmpi slt, %2, %c0_i32_1 : i32
    %c0_i32_2 = arith.constant 0 : i32
    %5 = arith.cmpi slt, %1, %c0_i32_2 : i32
    %6 = arith.xori %4, %5 : i1
    %7 = arith.andi %6, %3 : i1
    %8 = arith.addi %2, %1 : i32
    %9 = arith.select %7, %8, %2 : i32
    %c1_i32_3 = arith.constant 1 : i32
    %10 = arith.subi %c1_i32_3, %9 : i32
    %c0_i32_4 = arith.constant 0 : i32
    %11 = arith.cmpi eq, %arg1, %c0_i32_4 : i32
    %12 = arith.extui %11 : i1 to i32
    %c0_i32_5 = arith.constant 0 : i32
    %13 = arith.cmpi ne, %12, %c0_i32_5 : i32
    scf.if %13 {
      %c0_i32_58 = arith.constant 0 : i32
      %c0_i32_59 = arith.constant 0 : i32
      %c0_i32_60 = arith.constant 0 : i32
      %c0_i32_61 = arith.constant 0 : i32
      %c0_i32_62 = arith.constant 0 : i32
      %106 = tpu.memref_slice %arg2[%arg0, %c0_i32_60, %c0_i32_61, %c0_i32_62] : memref<2x20x32x128xbf16, #tpu.memory_space<any>> -> memref<1x12x32x128xbf16, #tpu.memory_space<any>>
      %107 = tpu.memref_squeeze %106 : memref<1x12x32x128xbf16, #tpu.memory_space<any>> -> memref<12x32x128xbf16, #tpu.memory_space<any>>
      %c0_i32_63 = arith.constant 0 : i32
      %c0_i32_64 = arith.constant 0 : i32
      %c0_i32_65 = arith.constant 0 : i32
      %108 = tpu.memref_slice %arg9[%c0_i32_58, %c0_i32_63, %c0_i32_64, %c0_i32_65] : memref<2x12x32x128xbf16, #tpu.memory_space<vmem>> -> memref<1x12x32x128xbf16, #tpu.memory_space<vmem>>
      %109 = tpu.memref_squeeze %108 : memref<1x12x32x128xbf16, #tpu.memory_space<vmem>> -> memref<12x32x128xbf16, #tpu.memory_space<vmem>>
      %110 = tpu.memref_slice %arg10[%c0_i32_59] : memref<2x!tpu.dma_semaphore, #tpu.memory_space<semaphore_mem>> -> memref<1x!tpu.dma_semaphore, #tpu.memory_space<semaphore_mem>>
      %111 = tpu.memref_squeeze %110 : memref<1x!tpu.dma_semaphore, #tpu.memory_space<semaphore_mem>> -> memref<!tpu.dma_semaphore, #tpu.memory_space<semaphore_mem>>
      tpu.enqueue_dma source(%107 : memref<12x32x128xbf16, #tpu.memory_space<any>>) target(%109 : memref<12x32x128xbf16, #tpu.memory_space<vmem>>) target_semaphore(%111 : memref<!tpu.dma_semaphore, #tpu.memory_space<semaphore_mem>>)
    } else {
    }
    %c1_i32_6 = arith.constant 1 : i32
    %14 = arith.addi %arg1, %c1_i32_6 : i32
    %c2_i32_7 = arith.constant 2 : i32
    %15 = arith.cmpi slt, %14, %c2_i32_7 : i32
    %16 = arith.extui %15 : i1 to i32
    %c0_i32_8 = arith.constant 0 : i32
    %17 = arith.cmpi ne, %16, %c0_i32_8 : i32
    scf.if %17 {
      %c1_i32_58 = arith.constant 1 : i32
      %106 = arith.addi %arg1, %c1_i32_58 : i32
      %c8_i32_59 = arith.constant 8 : i32
      %107 = arith.muli %106, %c8_i32_59 : i32
      %c0_i32_60 = arith.constant 0 : i32
      %c0_i32_61 = arith.constant 0 : i32
      %108 = tpu.memref_slice %arg2[%arg0, %107, %c0_i32_60, %c0_i32_61] : memref<2x20x32x128xbf16, #tpu.memory_space<any>> -> memref<1x12x32x128xbf16, #tpu.memory_space<any>>
      %109 = tpu.memref_squeeze %108 : memref<1x12x32x128xbf16, #tpu.memory_space<any>> -> memref<12x32x128xbf16, #tpu.memory_space<any>>
      %c0_i32_62 = arith.constant 0 : i32
      %c0_i32_63 = arith.constant 0 : i32
      %c0_i32_64 = arith.constant 0 : i32
      %110 = tpu.memref_slice %arg9[%10, %c0_i32_62, %c0_i32_63, %c0_i32_64] : memref<2x12x32x128xbf16, #tpu.memory_space<vmem>> -> memref<1x12x32x128xbf16, #tpu.memory_space<vmem>>
      %111 = tpu.memref_squeeze %110 : memref<1x12x32x128xbf16, #tpu.memory_space<vmem>> -> memref<12x32x128xbf16, #tpu.memory_space<vmem>>
      %112 = tpu.memref_slice %arg10[%10] : memref<2x!tpu.dma_semaphore, #tpu.memory_space<semaphore_mem>> -> memref<1x!tpu.dma_semaphore, #tpu.memory_space<semaphore_mem>>
      %113 = tpu.memref_squeeze %112 : memref<1x!tpu.dma_semaphore, #tpu.memory_space<semaphore_mem>> -> memref<!tpu.dma_semaphore, #tpu.memory_space<semaphore_mem>>
      tpu.enqueue_dma source(%109 : memref<12x32x128xbf16, #tpu.memory_space<any>>) target(%111 : memref<12x32x128xbf16, #tpu.memory_space<vmem>>) target_semaphore(%113 : memref<!tpu.dma_semaphore, #tpu.memory_space<semaphore_mem>>)
    } else {
    }
    %c8_i32 = arith.constant 8 : i32
    %18 = arith.muli %arg1, %c8_i32 : i32
    %c0_i32_9 = arith.constant 0 : i32
    %c0_i32_10 = arith.constant 0 : i32
    %19 = tpu.memref_slice %arg2[%arg0, %18, %c0_i32_9, %c0_i32_10] : memref<2x20x32x128xbf16, #tpu.memory_space<any>> -> memref<1x12x32x128xbf16, #tpu.memory_space<any>>
    %20 = tpu.memref_squeeze %19 : memref<1x12x32x128xbf16, #tpu.memory_space<any>> -> memref<12x32x128xbf16, #tpu.memory_space<any>>
    %c0_i32_11 = arith.constant 0 : i32
    %c0_i32_12 = arith.constant 0 : i32
    %c0_i32_13 = arith.constant 0 : i32
    %21 = tpu.memref_slice %arg9[%9, %c0_i32_11, %c0_i32_12, %c0_i32_13] : memref<2x12x32x128xbf16, #tpu.memory_space<vmem>> -> memref<1x12x32x128xbf16, #tpu.memory_space<vmem>>
    %22 = tpu.memref_squeeze %21 : memref<1x12x32x128xbf16, #tpu.memory_space<vmem>> -> memref<12x32x128xbf16, #tpu.memory_space<vmem>>
    %23 = tpu.memref_slice %arg10[%9] : memref<2x!tpu.dma_semaphore, #tpu.memory_space<semaphore_mem>> -> memref<1x!tpu.dma_semaphore, #tpu.memory_space<semaphore_mem>>
    %24 = tpu.memref_squeeze %23 : memref<1x!tpu.dma_semaphore, #tpu.memory_space<semaphore_mem>> -> memref<!tpu.dma_semaphore, #tpu.memory_space<semaphore_mem>>
    tpu.wait_dma2 semaphore(%24 : memref<!tpu.dma_semaphore, #tpu.memory_space<semaphore_mem>>) src(%20 : memref<12x32x128xbf16, #tpu.memory_space<any>>) dst(%22 : memref<12x32x128xbf16, #tpu.memory_space<vmem>>)
    %25 = arith.index_cast %9 : i32 to index
    %c0 = arith.constant 0 : index
    %c0_14 = arith.constant 0 : index
    %c0_15 = arith.constant 0 : index
    %26 = vector.load %arg9[%25, %c0, %c0_14, %c0_15] : memref<2x12x32x128xbf16, #tpu.memory_space<vmem>>, vector<1x12x32x128xbf16>
    %27 = vector.shape_cast %26 : vector<1x12x32x128xbf16> to vector<12x32x128xbf16>
    %28 = vector.extract_strided_slice %27 {offsets = [0, 6, 0], sizes = [12, 24, 128], strides = [1, 1, 1]} : vector<12x32x128xbf16> to vector<12x24x128xbf16>
    %29 = vector.extract_strided_slice %27 {offsets = [0, 7, 0], sizes = [12, 24, 128], strides = [1, 1, 1]} : vector<12x32x128xbf16> to vector<12x24x128xbf16>
    %30 = vector.extract_strided_slice %27 {offsets = [0, 8, 0], sizes = [12, 24, 128], strides = [1, 1, 1]} : vector<12x32x128xbf16> to vector<12x24x128xbf16>
    %31 = tpu.concatenate %28, %29, %30 in 2 : vector<12x24x128xbf16>, vector<12x24x128xbf16>, vector<12x24x128xbf16> -> vector<12x24x384xbf16>
    %32 = vector.shape_cast %31 : vector<12x24x384xbf16> to vector<288x384xbf16>
    %cst = arith.constant 0.000000e+00 : f32
    %33 = vector.broadcast %cst : f32 to vector<240x128xf32>
    %34 = vector.extract_strided_slice %32 {offsets = [0, 0], sizes = [240, 384], strides = [1, 1]} : vector<288x384xbf16> to vector<240x384xbf16>
    %c0_16 = arith.constant 0 : index
    %c0_17 = arith.constant 0 : index
    %c0_18 = arith.constant 0 : index
    %35 = vector.load %arg3[%c0_16, %c0_17, %c0_18] : memref<3x384x128xbf16, #tpu.memory_space<vmem>>, vector<1x384x128xbf16>
    %36 = vector.shape_cast %35 : vector<1x384x128xbf16> to vector<384x128xbf16>
    %cst_19 = arith.constant dense<0.000000e+00> : vector<240x128xf32>
    %37 = tpu.matmul %34, %36, %cst_19 {dimension_numbers = #tpu.dot_dimension_numbers<[1], [0], [0], [1], [0, 0, 1, 1], [], []>} : vector<240x384xbf16>, vector<384x128xbf16>, vector<240x128xf32> -> vector<240x128xf32>
    %38 = arith.addf %33, %37 : vector<240x128xf32>
    %39 = vector.extract_strided_slice %32 {offsets = [24, 0], sizes = [240, 384], strides = [1, 1]} : vector<288x384xbf16> to vector<240x384xbf16>
    %c1 = arith.constant 1 : index
    %c0_20 = arith.constant 0 : index
    %c0_21 = arith.constant 0 : index
    %40 = vector.load %arg3[%c1, %c0_20, %c0_21] : memref<3x384x128xbf16, #tpu.memory_space<vmem>>, vector<1x384x128xbf16>
    %41 = vector.shape_cast %40 : vector<1x384x128xbf16> to vector<384x128xbf16>
    %cst_22 = arith.constant dense<0.000000e+00> : vector<240x128xf32>
    %42 = tpu.matmul %39, %41, %cst_22 {dimension_numbers = #tpu.dot_dimension_numbers<[1], [0], [0], [1], [0, 0, 1, 1], [], []>} : vector<240x384xbf16>, vector<384x128xbf16>, vector<240x128xf32> -> vector<240x128xf32>
    %43 = arith.addf %38, %42 : vector<240x128xf32>
    %44 = vector.extract_strided_slice %32 {offsets = [48, 0], sizes = [240, 384], strides = [1, 1]} : vector<288x384xbf16> to vector<240x384xbf16>
    %c2 = arith.constant 2 : index
    %c0_23 = arith.constant 0 : index
    %c0_24 = arith.constant 0 : index
    %45 = vector.load %arg3[%c2, %c0_23, %c0_24] : memref<3x384x128xbf16, #tpu.memory_space<vmem>>, vector<1x384x128xbf16>
    %46 = vector.shape_cast %45 : vector<1x384x128xbf16> to vector<384x128xbf16>
    %cst_25 = arith.constant dense<0.000000e+00> : vector<240x128xf32>
    %47 = tpu.matmul %44, %46, %cst_25 {dimension_numbers = #tpu.dot_dimension_numbers<[1], [0], [0], [1], [0, 0, 1, 1], [], []>} : vector<240x384xbf16>, vector<384x128xbf16>, vector<240x128xf32> -> vector<240x128xf32>
    %48 = arith.addf %43, %47 : vector<240x128xf32>
    %49 = vector.shape_cast %48 : vector<240x128xf32> to vector<10x24x128xf32>
    %c0_26 = arith.constant 0 : index
    %c0_27 = arith.constant 0 : index
    %50 = vector.load %arg5[%c0_26, %c0_27] : memref<1x128xf32, #tpu.memory_space<vmem>>, vector<1x128xf32>
    %51 = vector.shape_cast %50 : vector<1x128xf32> to vector<1x1x128xf32>
    %52 = vector.broadcast %51 : vector<1x1x128xf32> to vector<10x24x128xf32>
    %53 = arith.addf %49, %52 : vector<10x24x128xf32>
    %c0_28 = arith.constant 0 : index
    %c0_29 = arith.constant 0 : index
    %c0_30 = arith.constant 0 : index
    %54 = vector.load %arg7[%c0_28, %c0_29, %c0_30] : memref<1x24x128xf32, #tpu.memory_space<vmem>>, vector<1x24x128xf32>
    %55 = vector.broadcast %54 : vector<1x24x128xf32> to vector<10x24x128xf32>
    %56 = arith.mulf %53, %55 : vector<10x24x128xf32>
    %cst_31 = arith.constant 0.000000e+00 : f32
    %57 = vector.broadcast %cst_31 : f32 to vector<10x24x128xf32>
    %58 = arith.maximumf %56, %57 : vector<10x24x128xf32>
    %c0_i32_32 = arith.constant 0 : i32
    %59 = arith.cmpi eq, %arg1, %c0_i32_32 : i32
    %cst_33 = arith.constant 0.000000e+00 : f32
    %cst_34 = arith.constant 1.000000e+00 : f32
    %60 = arith.select %59, %cst_33, %cst_34 : f32
    %c1_i32_35 = arith.constant 1 : i32
    %61 = arith.cmpi eq, %arg1, %c1_i32_35 : i32
    %cst_36 = arith.constant 0.000000e+00 : f32
    %cst_37 = arith.constant 1.000000e+00 : f32
    %62 = arith.select %61, %cst_36, %cst_37 : f32
    %63 = vector.extract_strided_slice %58 {offsets = [0, 0, 0], sizes = [1, 24, 128], strides = [1, 1, 1]} : vector<10x24x128xf32> to vector<1x24x128xf32>
    %64 = vector.broadcast %60 : f32 to vector<1x24x128xf32>
    %65 = arith.mulf %63, %64 : vector<1x24x128xf32>
    %66 = vector.extract_strided_slice %58 {offsets = [1, 0, 0], sizes = [8, 24, 128], strides = [1, 1, 1]} : vector<10x24x128xf32> to vector<8x24x128xf32>
    %67 = vector.extract_strided_slice %58 {offsets = [9, 0, 0], sizes = [1, 24, 128], strides = [1, 1, 1]} : vector<10x24x128xf32> to vector<1x24x128xf32>
    %68 = vector.broadcast %62 : f32 to vector<1x24x128xf32>
    %69 = arith.mulf %67, %68 : vector<1x24x128xf32>
    %70 = tpu.concatenate %65, %66, %69 in 0 : vector<1x24x128xf32>, vector<8x24x128xf32>, vector<1x24x128xf32> -> vector<10x24x128xf32>
    %71 = arith.truncf %70 : vector<10x24x128xf32> to vector<10x24x128xbf16>
    %72 = vector.extract_strided_slice %71 {offsets = [0, 0, 0], sizes = [10, 16, 128], strides = [1, 1, 1]} : vector<10x24x128xbf16> to vector<10x16x128xbf16>
    %73 = vector.extract_strided_slice %71 {offsets = [0, 1, 0], sizes = [10, 16, 128], strides = [1, 1, 1]} : vector<10x24x128xbf16> to vector<10x16x128xbf16>
    %74 = vector.extract_strided_slice %71 {offsets = [0, 2, 0], sizes = [10, 16, 128], strides = [1, 1, 1]} : vector<10x24x128xbf16> to vector<10x16x128xbf16>
    %75 = tpu.concatenate %72, %73, %74 in 2 : vector<10x16x128xbf16>, vector<10x16x128xbf16>, vector<10x16x128xbf16> -> vector<10x16x384xbf16>
    %76 = vector.shape_cast %75 : vector<10x16x384xbf16> to vector<160x384xbf16>
    %cst_38 = arith.constant 0.000000e+00 : f32
    %77 = vector.broadcast %cst_38 : f32 to vector<128x128xf32>
    %78 = vector.extract_strided_slice %76 {offsets = [0, 0], sizes = [128, 384], strides = [1, 1]} : vector<160x384xbf16> to vector<128x384xbf16>
    %c0_39 = arith.constant 0 : index
    %c0_40 = arith.constant 0 : index
    %c0_41 = arith.constant 0 : index
    %79 = vector.load %arg4[%c0_39, %c0_40, %c0_41] : memref<3x384x128xbf16, #tpu.memory_space<vmem>>, vector<1x384x128xbf16>
    %80 = vector.shape_cast %79 : vector<1x384x128xbf16> to vector<384x128xbf16>
    %cst_42 = arith.constant dense<0.000000e+00> : vector<128x128xf32>
    %81 = tpu.matmul %78, %80, %cst_42 {dimension_numbers = #tpu.dot_dimension_numbers<[1], [0], [0], [1], [0, 0, 1, 1], [], []>} : vector<128x384xbf16>, vector<384x128xbf16>, vector<128x128xf32> -> vector<128x128xf32>
    %82 = arith.addf %77, %81 : vector<128x128xf32>
    %83 = vector.extract_strided_slice %76 {offsets = [16, 0], sizes = [128, 384], strides = [1, 1]} : vector<160x384xbf16> to vector<128x384xbf16>
    %c1_43 = arith.constant 1 : index
    %c0_44 = arith.constant 0 : index
    %c0_45 = arith.constant 0 : index
    %84 = vector.load %arg4[%c1_43, %c0_44, %c0_45] : memref<3x384x128xbf16, #tpu.memory_space<vmem>>, vector<1x384x128xbf16>
    %85 = vector.shape_cast %84 : vector<1x384x128xbf16> to vector<384x128xbf16>
    %cst_46 = arith.constant dense<0.000000e+00> : vector<128x128xf32>
    %86 = tpu.matmul %83, %85, %cst_46 {dimension_numbers = #tpu.dot_dimension_numbers<[1], [0], [0], [1], [0, 0, 1, 1], [], []>} : vector<128x384xbf16>, vector<384x128xbf16>, vector<128x128xf32> -> vector<128x128xf32>
    %87 = arith.addf %82, %86 : vector<128x128xf32>
    %88 = vector.extract_strided_slice %76 {offsets = [32, 0], sizes = [128, 384], strides = [1, 1]} : vector<160x384xbf16> to vector<128x384xbf16>
    %c2_47 = arith.constant 2 : index
    %c0_48 = arith.constant 0 : index
    %c0_49 = arith.constant 0 : index
    %89 = vector.load %arg4[%c2_47, %c0_48, %c0_49] : memref<3x384x128xbf16, #tpu.memory_space<vmem>>, vector<1x384x128xbf16>
    %90 = vector.shape_cast %89 : vector<1x384x128xbf16> to vector<384x128xbf16>
    %cst_50 = arith.constant dense<0.000000e+00> : vector<128x128xf32>
    %91 = tpu.matmul %88, %90, %cst_50 {dimension_numbers = #tpu.dot_dimension_numbers<[1], [0], [0], [1], [0, 0, 1, 1], [], []>} : vector<128x384xbf16>, vector<384x128xbf16>, vector<128x128xf32> -> vector<128x128xf32>
    %92 = arith.addf %87, %91 : vector<128x128xf32>
    %93 = vector.extract_strided_slice %27 {offsets = [2, 8, 0], sizes = [8, 16, 128], strides = [1, 1, 1]} : vector<12x32x128xbf16> to vector<8x16x128xbf16>
    %94 = arith.extf %93 : vector<8x16x128xbf16> to vector<8x16x128xf32>
    %95 = vector.shape_cast %92 : vector<128x128xf32> to vector<8x16x128xf32>
    %c0_51 = arith.constant 0 : index
    %c0_52 = arith.constant 0 : index
    %96 = vector.load %arg6[%c0_51, %c0_52] : memref<1x128xf32, #tpu.memory_space<vmem>>, vector<1x128xf32>
    %97 = vector.shape_cast %96 : vector<1x128xf32> to vector<1x1x128xf32>
    %98 = vector.broadcast %97 : vector<1x1x128xf32> to vector<8x16x128xf32>
    %99 = arith.addf %95, %98 : vector<8x16x128xf32>
    %100 = arith.addf %99, %94 : vector<8x16x128xf32>
    %cst_53 = arith.constant 0.000000e+00 : f32
    %101 = vector.broadcast %cst_53 : f32 to vector<8x16x128xf32>
    %102 = arith.maximumf %100, %101 : vector<8x16x128xf32>
    %103 = arith.truncf %102 : vector<8x16x128xf32> to vector<8x16x128xbf16>
    %104 = vector.shape_cast %103 : vector<8x16x128xbf16> to vector<1x8x16x128xbf16>
    %c0_54 = arith.constant 0 : index
    %c0_55 = arith.constant 0 : index
    %c0_56 = arith.constant 0 : index
    %c0_57 = arith.constant 0 : index
    %105 = vector.load %arg8[%c0_54, %c0_55, %c0_56, %c0_57] : memref<1x8x16x128xbf16, #tpu.memory_space<vmem>>, vector<1x8x16x128xbf16>
    tpu.vector_store %arg8[%c0_54, %c0_55, %c0_56, %c0_57], %104 {strides = array<i32>} : memref<1x8x16x128xbf16, #tpu.memory_space<vmem>>, vector<1x8x16x128xbf16>,
    return
  }
  func.func @transform_1(%arg0: i32, %arg1: i32) -> (i32, i32, i32) {
    %c0_i32 = arith.constant 0 : i32
    %c0_i32_0 = arith.constant 0 : i32
    %c0_i32_1 = arith.constant 0 : i32
    %c0_i32_2 = arith.constant 0 : i32
    return %c0_i32, %c0_i32_0, %c0_i32_1 : i32, i32, i32
  }
  func.func @transform_2(%arg0: i32, %arg1: i32) -> (i32, i32, i32) {
    %c0_i32 = arith.constant 0 : i32
    %c0_i32_0 = arith.constant 0 : i32
    %c0_i32_1 = arith.constant 0 : i32
    %c0_i32_2 = arith.constant 0 : i32
    return %c0_i32, %c0_i32_0, %c0_i32_1 : i32, i32, i32
  }
  func.func @transform_3(%arg0: i32, %arg1: i32) -> (i32, i32) {
    %c0_i32 = arith.constant 0 : i32
    %c0_i32_0 = arith.constant 0 : i32
    %c0_i32_1 = arith.constant 0 : i32
    return %c0_i32, %c0_i32_0 : i32, i32
  }
  func.func @transform_4(%arg0: i32, %arg1: i32) -> (i32, i32) {
    %c0_i32 = arith.constant 0 : i32
    %c0_i32_0 = arith.constant 0 : i32
    %c0_i32_1 = arith.constant 0 : i32
    return %c0_i32, %c0_i32_0 : i32, i32
  }
  func.func @transform_5(%arg0: i32, %arg1: i32) -> (i32, i32, i32) {
    %c0_i32 = arith.constant 0 : i32
    %c0_i32_0 = arith.constant 0 : i32
    %c0_i32_1 = arith.constant 0 : i32
    %c0_i32_2 = arith.constant 0 : i32
    return %c0_i32, %c0_i32_0, %c0_i32_1 : i32, i32, i32
  }
  func.func @transform_6(%arg0: i32, %arg1: i32) -> (i32, i32, i32, i32) {
    %c0_i32 = arith.constant 0 : i32
    %c0_i32_0 = arith.constant 0 : i32
    %c0_i32_1 = arith.constant 0 : i32
    return %arg0, %arg1, %c0_i32, %c0_i32_0 : i32, i32, i32, i32
  }
}

</mosaic_0001>

<bundles_post_ra>
// kernel: tpu_custom_call.1
= control target key start
LH: loop header
LB: loop body
LE: loop exit
PB: predicated region body
PF: predicated region fallthrough
CT: control target
= control target key end

     0   :  { %s8723_s0 = inlined_call_operand.hbm [shape: bf16[2,20,32,128], index: 0, kind: input, shape index: {}]   ;;  %s8724_s1 = inlined_call_operand.hbm [shape: bf16[3,384,128], index: 1, kind: input, shape index: {}]   ;;  %s8725_s2 = inlined_call_operand.hbm [shape: bf16[3,384,128], index: 2, kind: input, shape index: {}]   ;;  %s8726_s3 = inlined_call_operand.vmem [shape: f32[1,128], index: 3, kind: input, shape index: {}]   ;;  %s8727_s4 = inlined_call_operand.vmem [shape: f32[1,128], index: 4, kind: input, shape index: {}]   ;;  %s8728_s5 = inlined_call_operand.hbm [shape: f32[1,24,128], index: 5, kind: input, shape index: {}]   ;;  %s8729_s6 = inlined_call_operand.hbm [shape: bf16[2,16,16,128], index: 6, kind: output, shape index: {}]  }
   0x1   :  { %8785 = sst [smem:[#allocation54_spill]] %s8724_s1 }
   0x2   :  { %8786 = sst [smem:[#allocation55_spill]] %s8725_s2 }
   0x3   :  { %11 = vsyncpa [#allocation5], 0 }
   0x4   :  { %12 = vsyncpa [#allocation8], 0 }
   0x5   :  { %13 = vsyncpa [#allocation6], 0 }
   0x6   :  { %15 = vsyncpa [#allocation6 + $0x1], 0  ;;  %s6828_s21 = smov 0   ;;  %s6830_s22 = smov 0  }
   0x7   :  { %s6832_s23 = smov 0   ;;  %s6834_s24 = smov 0  }
   0x8   :  { %s6836_s25 = smov 0   ;;  %s6838_s26 = smov 0  }
   0x9   :  { %s6840_s27 = smov 0   ;;  %s6842_s28 = smov 0  }
   0xa LB: > { %8787 = sst [smem:[#allocation21_spill]] %s6758_s23  ;;  %s4731_s29 = sadd.s32 4294967295, %s6778_s28   ;;  %s6778_s28 = sphi %s6842_s28, %s21_s28   ;;  %s6774_s27 = sphi %s6840_s27, %s8872_s27   ;;  %s6770_s26 = sphi %s6838_s26, %s8871_s26   ;;  %s6766_s25 = sphi %s6836_s25, %s8875_s25   ;;  %s6762_s24 = sphi %s6834_s24, %s8869_s24   ;;  %s6758_s23 = sphi %s6832_s23, %s8868_s23   ;;  %s6754_s22 = sphi %s6830_s22, %s8874_s22   ;;  %s6750_s21 = sphi %s6828_s21, %s8873_s21  }
   0xb   : > { %8788 = sst [smem:[#allocation22_spill]] %s6770_s26  ;;  %s4732_s30 = sadd.s32 4294967294, %s6778_s28  }
   0xc   : > { %8789 = sst [smem:[#allocation23_spill]] %s6774_s27  ;;  %s30_s7 = sadd.s32 1, %s6770_s26 }
   0xd   : > { %s33_s8 = sadd.s32 1, %s6774_s27  ;;  %p31_p0 = scmp.ge.s32.totalorder %s30_s7, 2 }
   0xe   : > { %s147_s9 = sadd.s32 1, %s6758_s23  ;;  %p157_p1 = scmp.ne.s32.totalorder %s6758_s23, %s6754_s22 }
   0xf   : > { %p158_p2 = scmp.eq.s32.totalorder %s4731_s29, 3  ;;  %s8877_s7 = smov (%p31_p0, %s30_s7), 0 }
  0x10   : > { %8790 = sst [smem:[#allocation24_spill]] %s8877_s7  ;;  %s8879_s8 = smov (!%p31_p0, %s33_s8), %s6774_s27 }
  0x11   : > { %s143_s10 = ssub.s32 %s6770_s26, %s8877_s7  ;;  %p6880_p3 = por %p158_p2, %p157_p1 }
  0x12   : > { %p35_p4 = scmp.ge.s32.totalorder %s8879_s8, 2  ;;  %p163_p5 = scmp.ne.s32.totalorder %s6754_s22, %s6750_s21 }
  0x13   : > { %s8791_s11 = scalar_select %p6880_p3, 1, 0 }
  0x14   : > { %p164_p6 = scmp.eq.s32.totalorder %s4732_s30, 3  ;;  %p4733_p7 = scmp.ge.s32.totalorder %s6778_s28, 1 }
  0x15   : > { %s8881_s8 = smov (%p35_p4, %s8879_s8), 0  ;;  %p171_p9 = scmp.lt.s32.totalorder %s6778_s28, 5 }
  0x16   : > { %8792 = sst [smem:[#allocation25_spill]] %s8881_s8  ;;  %p6889_p8 = por %p164_p6, %p163_p5 }
  0x17   : > { %s142_s13 = ssub.s32 %s6774_s27, %s8881_s8  ;;  %p6896_p10 = pnand %p4733_p7, %p171_p9 }
  0x18   : > { %s8793_s12 = scalar_select %p6889_p8, 1, 0 }
  0x19   : > { %s144_s14 = sor.u32 %s143_s10, %s142_s13  ;;  %p6900_p12 = scmp.eq.s32.totalorder %s4731_s29, 0 }
  0x1a   : > { %8794 = sst [smem:[#allocation26_spill]] %s8793_s12  ;;  %p145_p11 = scmp.eq.s32.totalorder %s144_s14, 0 }
  0x1b   : > { %s8795_s15 = scalar_select %p6896_p10, 1, 0 }
  0x1c   : > { %s8796_s16 = scalar_select %p6900_p12, 1, 0 }
  0x1d   : > { %p6274_p13 = pneg %p6896_p10  ;;  %s6780_s19 = smov [#allocation7]  }
  0x1e   : > { %s6907_s17 = scalar_select %p145_p11, %s6758_s23, %s147_s9  }
  0x1f   : > { %p6911_p0 = pnand %p6900_p12, %p6274_p13  ;;  %s196_s20 = sshll.u32 %s6780_s19, 4  ;;  %s197_s20 = int_to_ptr.vmem [resolvable:$true] %s196_s20 }
  0x20   : > { %8797 = sst [smem:[#allocation27_spill]] %s6907_s17  ;;  %s8799_s2 = sld [smem:[#allocation55_spill]] }
  0x21   : > { %p6923_p2 = pneg %p6911_p0 }
  0x26   : > { %s6533_s29 = scalar_lea.hbm %s8799_s2, 9216 }
  0x27   : > { %p6534_p1 = scmp.ne.s32.totalorder %s8799_s2, %s6533_s29  ;;  %p6540_p6 = scmp.lt.u32.totalorder %s6533_s29, %s8799_s2 }
  0x29   : > { %p6536_p4 = pnand %p6923_p2, %p6534_p1 }
  0x2b   : > { %p6537_p5 = pneg %p6536_p4 }
  0x2d   : > { %p6542_p7 = pnand %p6540_p6, %p6537_p5 }
  0x2f   : > { %6545 = shalt.err (!%p6542_p7)
}
  0x30   : > { %s6546_s30 = scalar_lea.vmem %s197_s20, 9216  ;;  %p6554_p8 = scmp.lt.s32.totalorder %s197_s20, %s197_s20 }
  0x31   : > { %p6547_p9 = scmp.ne.s32.totalorder %s197_s20, %s6546_s30  ;;  %p6555_p3 = scmp.lt.s32.totalorder %s6546_s30, %s6546_s30 }
  0x33   : > { %p6549_p11 = pnand %p6547_p9, %p6923_p2  ;;  %p6556_p12 = por %p6555_p3, %p6554_p8 }
  0x35   : > { %p6550_p13 = pneg %p6549_p11 }
  0x37   : > { %p6557_p10 = pnand %p6556_p12, %p6550_p13 }
  0x39   : > { %6560 = shalt.err (!%p6557_p10)
}
  0x3a   : > { %s6781_s10 = smov 64   ;;  %s6782_s13 = smov 4  }
  0x3b   : > { %6280 = dma.hbm_to_vmem [thread:$0]  (!%p6911_p0), %s8799_s2, 9216, %s197_s20, [#allocation8], %s6781_s10, %s6781_s10, %s6782_s13  }
  0x3c   : > { %s6783_s14 = smov [#allocation4]   ;;  %s6784_s7 = smov [#allocation9]  }
  0x3d   : > { %s183_s19 = sshll.u32 %s6783_s14, 4  ;;  %s215_s27 = sshll.u32 %s6784_s7, 4  ;;  %s184_s19 = int_to_ptr.vmem [resolvable:$true] %s183_s19  ;;  %s6939_s27 = int_to_ptr.vmem [resolvable:$true] %s215_s27 }
  0x3e   : > { %s8801_s1 = sld [smem:[#allocation54_spill]] }
  0x44   : > { %s6561_s17 = scalar_lea.hbm %s8801_s1, 9216 }
  0x45   : > { %p6562_p3 = scmp.ne.s32.totalorder %s8801_s1, %s6561_s17  ;;  %p6568_p12 = scmp.lt.u32.totalorder %s6561_s17, %s8801_s1 }
  0x47   : > { %p6564_p8 = pnand %p6562_p3, %p6923_p2 }
  0x49   : > { %p6565_p10 = pneg %p6564_p8 }
  0x4b   : > { %p6570_p1 = pnand %p6568_p12, %p6565_p10 }
  0x4d   : > { %6573 = shalt.err (!%p6570_p1)
}
  0x4e   : > { %s6574_s7 = scalar_lea.vmem %s184_s19, 9216  ;;  %p6582_p7 = scmp.lt.s32.totalorder %s184_s19, %s184_s19 }
  0x4f   : > { %p6575_p4 = scmp.ne.s32.totalorder %s184_s19, %s6574_s7  ;;  %p6583_p9 = scmp.lt.s32.totalorder %s6574_s7, %s6574_s7 }
  0x51   : > { %p6577_p5 = pnand %p6575_p4, %p6923_p2  ;;  %p6584_p11 = por %p6583_p9, %p6582_p7 }
  0x53   : > { %p6578_p6 = pneg %p6577_p5 }
  0x55   : > { %p6585_p13 = pnand %p6584_p11, %p6578_p6 }
  0x57   : > { %6588 = shalt.err (!%p6585_p13)
}
  0x58   : > { %6277 = dma.hbm_to_vmem [thread:$0]  (!%p6911_p0), %s8801_s1, 9216, %s184_s19, [#allocation5], %s6781_s10, %s6781_s10, %s6782_s13  }
  0x59   : > { %s6589_s29 = scalar_lea.hbm %s8728_s5, 384 }
  0x5a   : > { %p6590_p3 = scmp.ne.s32.totalorder %s8728_s5, %s6589_s29  ;;  %p6596_p12 = scmp.lt.u32.totalorder %s6589_s29, %s8728_s5 }
  0x5c   : > { %p6592_p8 = pnand %p6590_p3, %p6923_p2 }
  0x5e   : > { %p6593_p10 = pneg %p6592_p8 }
  0x60   : > { %p6598_p1 = pnand %p6596_p12, %p6593_p10 }
  0x62   : > { %6601 = shalt.err (!%p6598_p1)
}
  0x63   : > { %s6602_s10 = scalar_lea.vmem %s6939_s27, 384  ;;  %p6610_p7 = scmp.lt.s32.totalorder %s6939_s27, %s6939_s27 }
  0x64   : > { %p6603_p4 = scmp.ne.s32.totalorder %s6939_s27, %s6602_s10  ;;  %p6611_p9 = scmp.lt.s32.totalorder %s6602_s10, %s6602_s10 }
  0x66   : > { %p6605_p5 = pnand %p6603_p4, %p6923_p2  ;;  %p6612_p11 = por %p6611_p9, %p6610_p7 }
  0x68   : > { %p6606_p6 = pneg %p6605_p5 }
  0x6a   : > { %p6613_p13 = pnand %p6612_p11, %p6606_p6 }
  0x6c   : > { %6616 = shalt.err (!%p6613_p13)
}
  0x6d   : > { %s6785_s13 = smov 128   ;;  %s6786_s19 = smov 8  }
  0x6e   : > { %6283 = dma.hbm_to_vmem [thread:$0]  (!%p6911_p0), %s8728_s5, 384, %s6939_s27, [#allocation8], %s6785_s13, %s6785_s13, %s6786_s19  }
  0x6f   : > { %p8802_p3 = scmp.ne.s32.totalorder %s8795_s15, 0 }
  0x71   : > { %231 = sbr.rel (%p8802_p3) target bundleno = 1149 (0x47d), region = 40 }
  0x78   : > { %p8803_p2 = scmp.ne.s32.totalorder %s8796_s16, 0 }
  0x7a   : > { %6735 = dma.done.wait (%p8803_p2), [#allocation5], 9216  }
  0x7b   : > { %6737 = vsyncadd (%p8803_p2), [#allocation5], 4294958080 }
  0x7c   : > { %6739 = dma.done.wait (%p8803_p2), [#allocation8], 9600  }
  0x7d   : > { %6741 = vsyncadd (%p8803_p2), [#allocation8], 4294957696  ;;  %s8740_s27 = sand.u32 1, %s6754_s22   ;;  %p8743_p0 = scmp.eq.s32.totalorder %s6762_s24, 0 }
  0x7e   : > { %s6996_s15 = sshll.u32 %s8740_s27, 6  ;;  %s5142_s18 = smul.u32 5120, %s6766_s25 }
  0x7f   : > { %p264_p8 = scmp.lt.s32.totalorder %s6762_s24, 0  ;;  %s6787_s16 = smov [#allocation2]  }
  0x80   : > { %s283_s12 = scalar_lea.hbm %s8723_s0, %s5142_s18  ;;  %s291_s17 = sshll.u32 %s6787_s16, 4  ;;  %s7003_s17 = int_to_ptr.vmem [resolvable:$true] %s291_s17 }
  0x81   : > { %s265_s29 = ssub.s32 0, %s6762_s24  ;;  %s6617_s14 = scalar_lea.hbm %s283_s12, 3072 }
  0x82   : > { %p6618_p10 = scmp.ne.s32.totalorder %s283_s12, %s6617_s14  ;;  %s8742_s20 = scalar_lea.hbm %s8723_s0, 10240 }
  0x83   : > { %p6622_p4 = scmp.lt.u32.totalorder %s283_s12, %s8723_s0  ;;  %p6623_p5 = scmp.lt.u32.totalorder %s8742_s20, %s6617_s14 }
  0x84   : > { %p6619_p12 = pnand %p6618_p10, %p8743_p0  ;;  %p6625_p7 = scmp.lt.u32.totalorder %s6617_s14, %s283_s12 }
  0x85   : > { %p6624_p6 = por %p6623_p5, %p6622_p4 }
  0x86   : > { %p6620_p1 = pneg %p6619_p12 }
  0x87   : > { %p6626_p9 = por %p6625_p7, %p6624_p6 }
  0x89   : > { %p6627_p11 = pnand %p6626_p9, %p6620_p1 }
  0x8b   : > { %6630 = shalt.err (!%p6627_p11)  }
  0x8c   : > { %s6631_s23 = scalar_lea.vmem %s7003_s17, 3072  ;;  %s8741_s18 = scalar_lea.vmem %s7003_s17, 6144 }
  0x8d   : > { %p6632_p13 = scmp.ne.s32.totalorder %s7003_s17, %s6631_s23  ;;  %p6638_p10 = scmp.lt.s32.totalorder %s7003_s17, %s7003_s17 }
  0x8e   : > { %p6639_p12 = scmp.lt.s32.totalorder %s8741_s18, %s6631_s23 }
  0x8f   : > { %p6633_p3 = pnand %p6632_p13, %p8743_p0 }
  0x90   : > { %p6640_p4 = por %p6639_p12, %p6638_p10 }
  0x91   : > { %p6634_p2 = pneg %p6633_p3 }
  0x93   : > { %p6641_p5 = pnand %p6640_p4, %p6634_p2 }
  0x95   : > { %6644 = shalt.err (!%p6641_p5)  }
  0x96   : > { %6269 = dma.hbm_to_vmem [thread:$0]  (%p8743_p0), %s283_s12, 3072, %s7003_s17, [#allocation3] }
  0x97   : > { %s4742_s9 = smin.u32 %s6762_s24, %s265_s29  ;;  %s295_s26 = sadd.s32 1, %s6762_s24 }
  0x98   : > { %s267_s16 = sand.u32 1, %s4742_s9   ;;  %s4748_s30 = sshll.u32 %s6762_s24, 5 }
  0x99   : > { %s268_s14 = ssub.s32 0, %s267_s16  ;;  %s4656_s8 = smul.u32 80, %s6766_s25 }
  0x9a   : > { %s8883_s14 = smov (!%p264_p8, %s268_s14), %s267_s16  ;;  %p7038_p6 = scmp.lt.s32.totalorder %s295_s26, 2 }
  0x9b   : > { %p4744_p1 = scmp.lt.s32.totalorder %s8883_s14, 0  ;;  %s274_s10 = sadd.s32 2, %s8883_s14 }
  0x9c   : > { %s4657_s13 = sadd.s32 %s4748_s30, %s4656_s8 }
  0x9d   : > { %s8885_s10 = smov (!%p4744_p1, %s274_s10), %s8883_s14  ;;  %s4749_s12 = sshll.u32 %s4657_s13, 6 }
  0x9e   : > { %s276_s29 = ssub.s32 1, %s8885_s10  ;;  %s4659_s9 = scalar_lea.hbm %s8723_s0, %s4749_s12 }
  0x9f   : > { %s4660_s16 = scalar_lea.hbm %s4659_s9, 2048  ;;  %s5143_s27 = smul.u32 192, %s276_s29 }
  0xa0   : > { %s5144_s18 = smul.u32 192, %s8885_s10  ;;  %s309_s14 = scalar_lea.sflag [#allocation3], %s276_s29 }
  0xa1   : > { %s308_s20 = scalar_lea.vmem [#allocation2], %s5143_s27  ;;  %s6673_s8 = scalar_lea.hbm %s4659_s9, 5120 }
  0xa2   : > { %s317_s30 = sshll.u32 %s308_s20, 4  ;;  %p6646_p8 = scmp.ne.s32.totalorder %s4660_s16, %s6673_s8  ;;  %s318_s30 = int_to_ptr.vmem [resolvable:$true] %s317_s30 }
  0xa3   : > { %p6650_p11 = scmp.lt.u32.totalorder %s4660_s16, %s8723_s0  ;;  %s8805_s12 = scalar_lea.hbm %s8723_s0, 10240 }
  0xa4   : > { %p6647_p7 = pnand %p6646_p8, %p7038_p6  ;;  %p6651_p13 = scmp.lt.u32.totalorder %s8805_s12, %s6673_s8 }
  0xa5   : > { %p6653_p2 = scmp.lt.u32.totalorder %s6673_s8, %s4660_s16 }
  0xa6   : > { %p6648_p9 = pneg %p6647_p7  ;;  %p6652_p3 = por %p6651_p13, %p6650_p11 }
  0xa8   : > { %p6654_p10 = por %p6653_p2, %p6652_p3 }
  0xaa   : > { %p6655_p12 = pnand %p6654_p10, %p6648_p9 }
  0xac   : > { %6658 = shalt.err (!%p6655_p12)  }
  0xad   : > { %s6659_s27 = scalar_lea.vmem %s318_s30, 3072  ;;  %p6666_p8 = scmp.lt.s32.totalorder %s318_s30, %s7003_s17 }
  0xae   : > { %p6660_p4 = scmp.ne.s32.totalorder %s318_s30, %s6659_s27  ;;  %s8806_s1 = scalar_lea.vmem %s7003_s17, 6144 }
  0xaf   : > { %p6667_p7 = scmp.lt.s32.totalorder %s8806_s1, %s6659_s27 }
  0xb0   : > { %p6661_p5 = pnand %p6660_p4, %p7038_p6 }
  0xb1   : > { %p6668_p0 = por %p6667_p7, %p6666_p8 }
  0xb2   : > { %p6662_p1 = pneg %p6661_p5 }
  0xb4   : > { %p6669_p11 = pnand %p6668_p0, %p6662_p1 }
  0xb6   : > { %6672 = shalt.err (!%p6669_p11)  }
  0xb7   : > { %6271 = dma.hbm_to_vmem [thread:$0]  (%p7038_p6), %s4660_s16, 3072, %s318_s30, %s309_s14 }
  0xb8   : > { %s7064_s2 = scalar_lea.vmem [#allocation10], %s6996_s15  ;;  %s7066_s20 = scalar_lea.vmem [#allocation2], %s5144_s18 }
  0xb9   : > { %s324_s29 = scalar_lea.sflag [#allocation3], %s8885_s10 }
  0xba   : > { %6742 = dma.done.wait %s324_s29, 3072 }
  0xbb   : > { %6743 = vsyncadd %s324_s29, 4294964224  ;;  %v8744_v0 = vmov 0.0   ;;  %vm6789_vm0 = vmmov 0   ;;  %v6373_v1 = vld [vmem:[#allocation4 + $0x100] sm:$0xff]   ;;  %v6376_v4 = vld [vmem:[#allocation4 + $0x108] sm:$0xff]   ;;  %vm836_vm1 = vcmask 1040384  }
  0xbc   : > { %5836 = vmatprep.subr.bf16.mxu1 %v8744_v0  ;;  %5852 = vmatprep.mubr.msk.bf16.mxu1 %vm6789_vm0, %v8744_v0  ;;  %v6374_v2 = vld [vmem:[#allocation4 + $0xc0] sm:$0xff]   ;;  %v6377_v5 = vld [vmem:[#allocation4 + $0xc8] sm:$0xff]   ;;  %v6379_v7 = vld [vmem:[#allocation4 + $0x110] sm:$0xff]   ;;  %vm837_vm2 = vcmask 1044484   ;;  %vm559_vm3 = vcmask 1046528   ;;  %p8862_p0 = scmp.eq.s32.totalorder %s6762_s24, 0 }
  0xbd   : > { %5209 = vmatprep.subr.bf16.mxu0 %v6373_v1  ;;  %v6375_v3 = vld [vmem:[#allocation4 + $0x140] sm:$0xff]   ;;  %v6378_v6 = vld [vmem:[#allocation4 + $0x148] sm:$0xff]   ;;  %v6380_v8 = vld [vmem:[#allocation4 + $0xd0] sm:$0xff]   ;;  %vm354_vm4 = vsmask.f32 7424  ;;  %p3012_p6 = scmp.eq.s32.totalorder %s6762_s24, 1 }
  0xbe   : > { %5210 = vmatpush3.bf16.msra.mxu0 %v6374_v2  ;;  %5837 = vmatpush3.bf16.msra.mxu1 %v6375_v3  ;;  %v6381_v9 = vld [vmem:[#allocation4 + $0x150] sm:$0xff]   ;;  %v6382_v10 = vld [vmem:[#allocation4 + $0x118] sm:$0xff]   ;;  %v6385_v13 = vld [vmem:[#allocation4 + $0x120] sm:$0xff]   ;;  %s3011_s18 = scalar_select %p8862_p0, 0.0, 1.0  ;;  %vm4408_vm6 = vcmask 1043456  }
  0xbf   : > { %5211 = vmatprep.subr.bf16.mxu0 %v6376_v4  ;;  %5838 = vmatprep.subr.bf16.mxu1 %v8744_v0  ;;  %v6383_v11 = vld [vmem:[#allocation4 + $0xd8] sm:$0xff]   ;;  %v6386_v14 = vld [vmem:[#allocation4 + $0xe0] sm:$0xff]   ;;  %v6388_v16 = vld [vmem:[#allocation4 + $0x128] sm:$0xff]   ;;  %s3013_s10 = scalar_select %p3012_p6, 0.0, 1.0 }
  0xc0   : > { %v6384_v12 = vld [vmem:[#allocation4 + $0x158] sm:$0xff]   ;;  %v6387_v15 = vld [vmem:[#allocation4 + $0x160] sm:$0xff]   ;;  %v6389_v17 = vld [vmem:[#allocation4 + $0xe8] sm:$0xff]   ;;  %s5161_s23 = sshll.u32 %s6762_s24, 4  ;;  %s5136_s9 = sshll.u32 %s6766_s25, 5 }
  0xc1   : > { %v6390_v18 = vld [vmem:[#allocation4 + $0x168] sm:$0xff]   ;;  %v6391_v19 = vld [vmem:[#allocation4 + $0x130] sm:$0xff]   ;;  %v6394_v22 = vld [vmem:[#allocation4 + $0x138] sm:$0xff]   ;;  %s4606_s24 = sadd.s32 %s5161_s23, %s5136_s9  ;;  %s4609_s16 = sshll.u32 %s7064_s2, 4  ;;  %s8665_s16 = int_to_ptr.vmem [resolvable:$true] %s4609_s16 }
  0xc2   : > { %5212 = vmatpush3.bf16.msra.mxu0 %v6377_v5  ;;  %5839 = vmatpush3.bf16.msra.mxu1 %v6378_v6  ;;  %v6392_v20 = vld [vmem:[#allocation4 + $0xf0] sm:$0xff]   ;;  %v333_v24 = vld [vmem:[%s7066_s20 + $0x18] sm:$0xff]  ;;  %v6397_v35 = vld [vmem:[#allocation4 + $0x40] sm:$0xff]   ;;  %s5137_s25 = sshll.u32 %s4606_s24, 6  ;;  %s8863_s26 = sand.u32 1, %s6754_s22  }
  0xc3   : > { %5213 = vmatprep.subr.bf16.mxu0 %v6379_v7  ;;  %5840 = vmatprep.subr.bf16.mxu1 %v8744_v0  ;;  %v6393_v21 = vld [vmem:[#allocation4 + $0x170] sm:$0xff]   ;;  %v378_v27 = vshll.u32 %v333_v24, 16  ;;  %v382_v28 = vshrl.u32 %v333_v24, 16  ;;  %v6395_v29 = vld [vmem:[#allocation4 + $0xf8] sm:$0xff]   ;;  %v7080_v32 = vrot.slane %v333_v24, 1  ;;  %v334_v38 = vld [vmem:[%s7066_s20 + $0x20] sm:$0xff]  ;;  %s8663_s8 = scalar_lea.hbm %s8729_s6, %s5137_s25 }
  0xc4   : > { %v332_v23 = vld [vmem:[%s7066_s20 + $0x10] sm:$0xff]  ;;  %v6396_v30 = vld [vmem:[#allocation4 + $0x178] sm:$0xff]   ;;  %v7091_v44 = vld [vmem:[%s7066_s20 + $0x28] sm:$0xff]  ;;  %v386_v47 = vshrl.u32 %v334_v38, 16  ;;  %v388_v48 = vshll.u32 %v334_v38, 16  ;;  %v566_v2 = vrot.slane %v334_v38, 1 }
  0xc5   : > { %v371_v25 = vshrl.u32 %v332_v23, 16  ;;  %v373_v26 = vshll.u32 %v332_v23, 16  ;;  %v563_v31 = vrot.slane %v332_v23, 1  ;;  %v380_v34 = vrot.slane %v378_v27, 1  ;;  %vm7095_vm5 = vmor %vm836_vm1, %vm837_vm2  ;;  %v6399_v5 = vld [vmem:[#allocation4 + $0x80] sm:$0xff]   ;;  %s8671_s13 = scalar_lea.sflag [#allocation6], %s8863_s26 }
  0xc6   : > { %5214 = vmatpush3.bf16.msra.mxu0 %v6380_v8  ;;  %5841 = vmatpush3.bf16.msra.mxu1 %v6381_v9  ;;  %v4765_v37 = vcombine.low %v7080_v32, %v7080_v32  ;;  %v4767_v39 = vcombine.high %v7080_v32, %v7080_v32  ;;  %v393_v49 = vshll.u32 %v7091_v44, 16  ;;  %v390_v56 = vrot.slane %v388_v48, 1  ;;  %v6403_v48 = vld [vmem:[#allocation4 + $0x50] sm:$0xff]   ;;  %v6456_v45 = vld [vmem:[#allocation7 + $0x120] sm:$0xff]   ;;  %s6674_s12 = scalar_lea.vmem %s8665_s16, 1024  ;;  %p8864_p13 = scmp.ne.s32.totalorder %s8791_s11, 0 }
  0xc7   : > { %5215 = vmatprep.subr.bf16.mxu0 %v6382_v10  ;;  %5842 = vmatprep.subr.bf16.mxu1 %v8744_v0  ;;  %v375_v33 = vrot.slane %v373_v26, 1  ;;  %v565_v36 = vsel %vm559_vm3, %v563_v31, %v7080_v32  ;;  %v384_v41 = vor.u32 %v382_v28, %v380_v34  ;;  %v567_v7 = vrot.slane %v7091_v44, 1  ;;  %v6402_v26 = vld [vmem:[#allocation4 + $0x88] sm:$0xff]   ;;  %p6675_p9 = scmp.ne.s32.totalorder %s8665_s16, %s6674_s12  ;;  %s6790_s27 = smov [#allocation10]  }
  0xc8   : > { %v4761_v42 = vcombine.low %v565_v36, %v565_v36  ;;  %v4763_v43 = vcombine.high %v565_v36, %v565_v36  ;;  %v7099_v46 = vrot.slane %v4765_v37, 7  ;;  %v395_v57 = vrot.slane %v393_v49, 1  ;;  %v7151_v36 = vld [vmem:[%s7066_s20 + $0x38] sm:$0xff]  ;;  %v6405_v49 = vld [vmem:[#allocation4 + $0x90] sm:$0xff]   ;;  %s6678_s1 = sshll.u32 %s6790_s27, 4  ;;  %s6679_s1 = int_to_ptr.vmem [resolvable:$false] %s6678_s1 }
  0xc9   : > { %v376_v40 = vor.u32 %v375_v33, %v371_v25  ;;  %v4764_v51 = vcombine.low %v333_v24, %v384_v41  ;;  %v4766_v61 = vcombine.high %v333_v24, %v384_v41  ;;  %v391_v1 = vor.u32 %v390_v56, %v386_v47  ;;  %v6400_v25 = vld [vmem:[#allocation4 + $0x48] sm:$0xff]   ;;  %p6676_p3 = pnand %p6675_p9, %p8864_p13  ;;  %p6681_p10 = scmp.lt.s32.totalorder %s8665_s16, %s6679_s1 }
  0xca   : > { %5216 = vmatpush3.bf16.msra.mxu0 %v6383_v11  ;;  %5843 = vmatpush3.bf16.msra.mxu1 %v6384_v12  ;;  %v4851_v52 = vrot.slane %v4761_v42, 11  ;;  %v865_v53 = vrot.slane %v4763_v43, 7  ;;  %v877_v27 = vrot.slane %v4767_v39, 7  ;;  %v4773_v33 = vcombine.low %v567_v7, %v567_v7  ;;  %v6401_v41 = vld [vmem:[#allocation4 + $0x8] sm:$0xff]  }
  0xcb   : > { %5217 = vmatprep.subr.bf16.mxu0 %v6385_v13  ;;  %5844 = vmatprep.subr.bf16.mxu1 %v8744_v0  ;;  %v381_v50 = vsel %vm354_vm4, %v376_v40, %v380_v34  ;;  %v868_v58 = vrot.slane %v4764_v51, 7  ;;  %v874_v6 = vrot.slane %v4766_v61, 7  ;;  %v396_v11 = vsel %vm354_vm4, %v391_v1, %v395_v57  ;;  %p6677_p2 = pneg %p6676_p3 }
  0xcc   : > { %v4760_v54 = vcombine.low %v332_v23, %v381_v50  ;;  %v4762_v55 = vcombine.high %v332_v23, %v381_v50  ;;  %v7105_v59 = vsel %vm7095_vm5, %v4851_v52, %v865_v53  ;;  %v870_v60 = vrot.slane %v865_v53, 4 }
  0xcd   : > { %v873_v3 = vrot.slane %v868_v58, 4  ;;  %v4768_v12 = vcombine.low %v334_v38, %v396_v11  ;;  %v4770_v13 = vcombine.high %v334_v38, %v396_v11  ;;  %v4775_v34 = vcombine.high %v567_v7, %v567_v7  ;;  %v6406_v11 = vld [vmem:[#allocation4 + $0x58] sm:$0xff]  }
  0xce   : > { %5218 = vmatpush3.bf16.msra.mxu0 %v6386_v14  ;;  %5845 = vmatpush3.bf16.msra.mxu1 %v6387_v15  ;;  %v4850_v62 = vrot.slane %v4760_v54, 11  ;;  %v861_v63 = vrot.slane %v4762_v55, 7  ;;  %v7111_v4 = vsel %vm7095_vm5, %v870_v60, %v7099_v46  ;;  %v568_v15 = vsel %vm559_vm3, %v566_v2, %v567_v7 }
  0xcf   : > { %5219 = vmatprep.subr.bf16.mxu0 %v6388_v16  ;;  %5846 = vmatprep.subr.bf16.mxu1 %v8744_v0  ;;  %v4874_v10 = vcombine.low %v7105_v59, %v7111_v4  ;;  %v7123_v14 = vsel %vm7095_vm5, %v873_v3, %v874_v6  ;;  %v4852_v23 = vrot.slane %v4768_v12, 11  ;;  %v7135_v24 = vrot.slane %v4770_v13, 7  ;;  %v6408_v12 = vld [vmem:[#allocation4 + $0x98] sm:$0xff]  }
  0xd0   : > { %v7116_v8 = vsel %vm7095_vm5, %v4850_v62, %v861_v63  ;;  %v867_v9 = vrot.slane %v861_v63, 4  ;;  %v891_v47 = vrot.slane %v4773_v33, 7  ;;  %v897_v50 = vrot.slane %v4775_v34, 7  ;;  %v6409_v34 = vld [vmem:[#allocation4 + $0x60] sm:$0xff]  }
  0xd1   : > { %v7144_v31 = vsel %vm7095_vm5, %v4852_v23, %v7135_v24  ;;  %v887_v32 = vrot.slane %v7135_v24, 4  ;;  %v408_v53 = vshll.u32 %v7151_v36, 16  ;;  %v412_v62 = vshrl.u32 %v7151_v36, 16  ;;  %v7206_v23 = vld [vmem:[%s7066_s20 + $0x48] sm:$0xff] }
  0xd2   : > { %5220 = vmatpush3.bf16.msra.mxu0 %v6389_v17  ;;  %5847 = vmatpush3.bf16.msra.mxu1 %v6390_v18  ;;  %v7128_v16 = vsel %vm7095_vm5, %v867_v9, %v868_v58  ;;  %v6398_v17 = vld [vmem:[#allocation4] sm:$0xff]   ;;  %v4769_v18 = vcombine.low %v568_v15, %v568_v15  ;;  %8809 = vst [vmem:[#allocation28_spill] sm:$0xff] %v7144_v31  ;;  %v7189_v3 = vrot.slane %v7151_v36, 1 }
  0xd3   : > { %5221 = vmatprep.subr.bf16.mxu0 %v6391_v19  ;;  %5848 = vmatprep.subr.bf16.mxu1 %v8744_v0  ;;  %v4771_v19 = vcombine.high %v568_v15, %v568_v15  ;;  %v4876_v37 = vcombine.high %v7123_v14, %v7144_v31  ;;  %v4875_v38 = vcombine.low %v7123_v14, %v7144_v31  ;;  %v7177_v58 = vld [vmem:[%s7066_s20 + $0x40] sm:$0xff]  ;;  %v410_v61 = vrot.slane %v408_v53, 1 }
  0xd4   : > { %v4853_v28 = vrot.slane %v4769_v18, 11  ;;  %v4781_v18 = vcombine.low %v7189_v3, %v7189_v3 }
  0xd5   : > { %v414_v9 = vor.u32 %v412_v62, %v410_v61  ;;  %v4783_v62 = vcombine.high %v7189_v3, %v7189_v3 }
  0xd6   : > { %5222 = vmatpush3.bf16.msra.mxu0 %v6392_v20  ;;  %5849 = vmatpush3.bf16.msra.mxu1 %v6393_v21  ;;  %v876_v20 = vrot.slane %v7099_v46, 4  ;;  %v4873_v21 = vcombine.high %v7116_v8, %v7128_v16 }
  0xd7   : > { %5223 = vmatprep.subr.bf16.mxu0 %v6394_v22  ;;  %5850 = vmatprep.subr.bf16.mxu1 %v8744_v0  ;;  %v4872_v22 = vcombine.low %v7116_v8, %v7128_v16 }
  0xd8   : > { %1532 = vmatprep.mubr.bf16.mxu0 %v4873_v21  ;;  %v7159_v39 = vsel %vm7095_vm5, %v876_v20, %v877_v27  ;;  %v4780_v20 = vcombine.low %v7151_v36, %v414_v9  ;;  %v7214_v27 = vrot.slane %v4781_v18, 7  ;;  %v6415_v18 = vld [vmem:[#allocation4 + $0x70] sm:$0xff]  }
  0xda   : > { %5224 = vmatpush3.bf16.msra.mxu0 %v6395_v29  ;;  %5851 = vmatpush3.bf16.msra.mxu1 %v6396_v30  ;;  %v885_v29 = vrot.slane %v4771_v19, 7  ;;  %v397_v30 = vshrl.u32 %v7091_v44, 16 }
  0xdb   : > { %5338 = vmatprep.subr.bf16.mxu0 %v6397_v35  ;;  %5912 = vmatprep.subr.bf16.mxu1 %v8744_v0  ;;  %v7148_v35 = vld [vmem:[%s7066_s20 + $0x30] sm:$0xff] }
  0xdc   : > { %v7163_v40 = vsel %vm7095_vm5, %v4853_v28, %v885_v29  ;;  %v399_v43 = vor.u32 %v397_v30, %v395_v57  ;;  %v890_v46 = vrot.slane %v885_v29, 4  ;;  %v401_v51 = vshrl.u32 %v7148_v35, 16  ;;  %v6407_v28 = vld [vmem:[#allocation4 + $0x18] sm:$0xff]  }
  0xdd   : > { %5853 = vmatmul.mubr.bf16.vlgmr.msra.gmra.mrb[0].mxu1 %v4874_v10  ;;  %1533 = vmatmul.mubr.bf16.vlgmr.msra.gmra.mrb[0].mxu0 %v4872_v22  ;;  %8810 = vst [vmem:[#allocation29_spill] sm:$0xff] %v7163_v40  ;;  %v4877_v42 = vcombine.low %v7159_v39, %v7163_v40  ;;  %v403_v52 = vshll.u32 %v7148_v35, 16  ;;  %v896_v57 = vrot.slane %v891_v47, 4  ;;  %v569_v63 = vrot.slane %v7148_v35, 1 }
  0xde   : > { %5913 = vmatpush3.bf16.msra.mxu1 %v6399_v5  ;;  %5856 = vmatprep.mubr.msk.bf16.mxu1 %vm6789_vm0, %v8744_v0  ;;  %v4772_v54 = vcombine.low %v7091_v44, %v399_v43  ;;  %v4774_v55 = vcombine.high %v7091_v44, %v399_v43  ;;  %v7174_v56 = vsel %vm7095_vm5, %v890_v46, %v891_v47  ;;  %v6404_v5 = vld [vmem:[#allocation4 + $0x10] sm:$0xff]   ;;  %v416_v10 = vshrl.u32 %v7177_v58, 16 }
  0xdf   : > { %5914 = vmatprep.subr.bf16.mxu1 %v8744_v0  ;;  %5339 = vmatpush3.bf16.msra.mxu0 %v6398_v17  ;;  %8811 = vst [vmem:[#allocation30_spill] sm:$0xff] %v7174_v56  ;;  %v405_v60 = vrot.slane %v403_v52, 1  ;;  %v7186_v44 = vsel %vm7095_vm5, %v896_v57, %v897_v50  ;;  %v571_v17 = vsel %vm559_vm3, %v569_v63, %v7189_v3  ;;  %v423_v43 = vshll.u32 %v7206_v23, 16 }
  0xe0   : > { %1540 = vmatprep.mubr.bf16.mxu0 %v4876_v37  ;;  %5340 = vmatprep.subr.bf16.mxu0 %v6400_v25  ;;  %v888_v1 = vrot.slane %v4772_v54, 7  ;;  %v894_v2 = vrot.slane %v4774_v55, 7  ;;  %8812 = vst [vmem:[#allocation31_spill] sm:$0xff] %v7186_v44  ;;  %v4880_v6 = vcombine.low %v7174_v56, %v7186_v44  ;;  %v4777_v21 = vcombine.low %v571_v17, %v571_v17  ;;  %v6411_v37 = vld [vmem:[#allocation4 + $0xa0] sm:$0xff]  }
  0xe1   : > { %v406_v7 = vor.u32 %v405_v60, %v401_v51  ;;  %v4779_v22 = vcombine.high %v571_v17, %v571_v17  ;;  %v4782_v46 = vcombine.high %v7151_v36, %v414_v9  ;;  %v425_v36 = vrot.slane %v423_v43, 1  ;;  %v6413_v9 = vld [vmem:[#allocation4 + $0x28] sm:$0xff]  }
  0xe2   : > { %5915 = vmatpush3.bf16.msra.mxu1 %v6402_v26  ;;  %v7196_v13 = vsel %vm7095_vm5, %v887_v32, %v888_v1  ;;  %v893_v15 = vrot.slane %v888_v1, 4  ;;  %v908_v32 = vrot.slane %v4780_v20, 7  ;;  %v4855_v33 = vrot.slane %v4777_v21, 11  ;;  %v6412_v1 = vld [vmem:[#allocation4 + $0x68] sm:$0xff]  }
  0xe3   : > { %5916 = vmatprep.subr.bf16.mxu1 %v8744_v0  ;;  %5341 = vmatpush3.bf16.msra.mxu0 %v6401_v41  ;;  %v411_v19 = vsel %vm354_vm4, %v406_v7, %v410_v61  ;;  %v914_v55 = vrot.slane %v4782_v46, 7  ;;  %v573_v57 = vrot.slane %v7206_v23, 1  ;;  %v916_v63 = vrot.slane %v7214_v27, 4  ;;  %v6414_v17 = vld [vmem:[#allocation4 + $0xa8] sm:$0xff]  }
  0xe4   : > { %5342 = vmatprep.subr.bf16.mxu0 %v6403_v48  ;;  %v7210_v24 = vsel %vm7095_vm5, %v893_v15, %v894_v2  ;;  %v4776_v25 = vcombine.low %v7148_v35, %v411_v19  ;;  %v4778_v26 = vcombine.high %v7148_v35, %v411_v19  ;;  %v418_v35 = vshll.u32 %v7177_v58, 16 }
  0xe5   : > { %5857 = vmatmul.mubr.bf16.gmra.mrb[4].mxu1 %v4877_v42  ;;  %1541 = vmatmul.mubr.bf16.gmra.mrb[4].mxu0 %v4875_v38  ;;  %8813 = vst [vmem:[#allocation32_spill] sm:$0xff] %v7210_v24  ;;  %v4879_v29 = vcombine.high %v7196_v13, %v7210_v24  ;;  %v4878_v30 = vcombine.low %v7196_v13, %v7210_v24  ;;  %v905_v42 = vrot.slane %v4779_v22, 7  ;;  %v913_v47 = vrot.slane %v908_v32, 4 }
  0xe6   : > { %5860 = vmatprep.mubr.msk.bf16.mxu1 %vm6789_vm0, %v8744_v0  ;;  %5917 = vmatpush3.bf16.msra.mxu1 %v6405_v49  ;;  %v4854_v38 = vrot.slane %v4776_v25, 11  ;;  %v901_v41 = vrot.slane %v4778_v26, 7  ;;  %v572_v48 = vrot.slane %v7177_v58, 1  ;;  %v6410_v49 = vld [vmem:[#allocation4 + $0x20] sm:$0xff]   ;;  %v420_v54 = vrot.slane %v418_v35, 1  ;;  %v6417_v35 = vld [vmem:[#allocation4 + $0xb0] sm:$0xff]  }
  0xe7   : > { %5918 = vmatprep.subr.bf16.mxu1 %v8744_v0  ;;  %5343 = vmatpush3.bf16.msra.mxu0 %v6404_v5  ;;  %v7233_v52 = vsel %vm7095_vm5, %v4855_v33, %v905_v42  ;;  %v910_v53 = vrot.slane %v905_v42, 4  ;;  %v7259_v3 = vsel %vm7095_vm5, %v913_v47, %v914_v55  ;;  %v427_v15 = vshrl.u32 %v7206_v23, 16  ;;  %v6416_v42 = vld [vmem:[#allocation4 + $0x30] sm:$0xff]  }
  0xe8   : > { %5344 = vmatprep.subr.bf16.mxu0 %v6406_v11  ;;  %1548 = vmatprep.mubr.bf16.mxu0 %v4879_v29  ;;  %v7227_v50 = vsel %vm7095_vm5, %v4854_v38, %v901_v41  ;;  %v907_v51 = vrot.slane %v901_v41, 4  ;;  %8815 = vst [vmem:[#allocation34_spill] sm:$0xff] %v7233_v52  ;;  %v421_v7 = vor.u32 %v420_v54, %v416_v10  ;;  %8818 = vst [vmem:[#allocation37_spill] sm:$0xff] %v7259_v3  ;;  %v7275_v38 = vld [vmem:[%s7066_s20 + $0x50] sm:$0xff]  ;;  %v7278_v41 = vld [vmem:[%s7066_s20 + $0x58] sm:$0xff] }
  0xe9   : > { %8814 = vst [vmem:[#allocation33_spill] sm:$0xff] %v7227_v50  ;;  %v7243_v61 = vsel %vm7095_vm5, %v910_v53, %v7214_v27  ;;  %v574_v11 = vsel %vm559_vm3, %v572_v48, %v573_v57  ;;  %v4789_v22 = vcombine.low %v573_v57, %v573_v57  ;;  %v429_v27 = vor.u32 %v427_v15, %v425_v36 }
  0xea   : > { %5919 = vmatpush3.bf16.msra.mxu1 %v6408_v12  ;;  %v7238_v60 = vsel %vm7095_vm5, %v907_v51, %v908_v32  ;;  %8817 = vst [vmem:[#allocation36_spill] sm:$0xff] %v7243_v61  ;;  %v917_v12 = vrot.slane %v4783_v62, 7  ;;  %v426_v19 = vsel %vm354_vm4, %v421_v7, %v425_v36  ;;  %v4785_v20 = vcombine.low %v574_v11, %v574_v11  ;;  %v7296_v62 = vld [vmem:[%s7066_s20 + $0x60] sm:$0xff] }
  0xeb   : > { %5920 = vmatprep.subr.bf16.mxu1 %v8744_v0  ;;  %5345 = vmatpush3.bf16.msra.mxu0 %v6407_v28  ;;  %8816 = vst [vmem:[#allocation35_spill] sm:$0xff] %v7238_v60  ;;  %v4882_v2 = vcombine.high %v7227_v50, %v7238_v60  ;;  %v4881_v5 = vcombine.low %v7227_v50, %v7238_v60  ;;  %v931_v32 = vrot.slane %v4789_v22, 7  ;;  %v438_v15 = vshll.u32 %v7278_v41, 16  ;;  %v6421_v22 = vld [vmem:[#allocation4 + $0x1c0] sm:$0xff]  }
  0xec   : > { %5346 = vmatprep.subr.bf16.mxu0 %v6409_v34  ;;  %v4787_v21 = vcombine.high %v574_v11, %v574_v11  ;;  %v4784_v10 = vcombine.low %v7177_v58, %v426_v19  ;;  %v4786_v25 = vcombine.high %v7177_v58, %v426_v19  ;;  %v7268_v26 = vsel %vm7095_vm5, %v916_v63, %v917_v12  ;;  %v7299_v63 = vld [vmem:[%s7066_s20 + $0x68] sm:$0xff] }
  0xed   : > { %5861 = vmatmul.mubr.bf16.gmra.mrb[8].mxu1 %v4880_v6  ;;  %1549 = vmatmul.mubr.bf16.gmra.mrb[8].mxu0 %v4878_v30  ;;  %v4883_v6 = vcombine.low %v7233_v52, %v7243_v61  ;;  %8819 = vst [vmem:[#allocation38_spill] sm:$0xff] %v7268_v26  ;;  %v4857_v28 = vrot.slane %v4785_v20, 11  ;;  %v4791_v30 = vcombine.high %v573_v57, %v573_v57  ;;  %v936_v47 = vrot.slane %v931_v32, 4 }
  0xee   : > { %5864 = vmatprep.mubr.msk.bf16.mxu1 %vm6789_vm0, %v8744_v0  ;;  %5921 = vmatpush3.bf16.msra.mxu1 %v6411_v37  ;;  %v925_v29 = vrot.slane %v4787_v21, 7  ;;  %v4856_v33 = vrot.slane %v4784_v10, 11  ;;  %v921_v34 = vrot.slane %v4786_v25, 7  ;;  %v4788_v37 = vcombine.low %v7206_v23, %v429_v27 }
  0xef   : > { %5922 = vmatprep.subr.bf16.mxu1 %v8744_v0  ;;  %5347 = vmatpush3.bf16.msra.mxu0 %v6410_v49  ;;  %v4790_v58 = vcombine.high %v7206_v23, %v429_v27  ;;  %v937_v48 = vrot.slane %v4791_v30, 7  ;;  %v6418_v49 = vld [vmem:[#allocation4 + $0x78] sm:$0xff]   ;;  %v431_v11 = vshrl.u32 %v7275_v38, 16  ;;  %v433_v12 = vshll.u32 %v7275_v38, 16 }
  0xf0   : > { %1556 = vmatprep.mubr.bf16.mxu0 %v4882_v2  ;;  %5348 = vmatprep.subr.bf16.mxu0 %v6412_v1  ;;  %v7282_v43 = vsel %vm7095_vm5, %v4857_v28, %v925_v29  ;;  %v930_v46 = vrot.slane %v925_v29, 4  ;;  %v7286_v23 = vsel %vm7095_vm5, %v4856_v33, %v921_v34  ;;  %v927_v51 = vrot.slane %v921_v34, 4  ;;  %v6419_v1 = vld [vmem:[#allocation4 + $0x38] sm:$0xff]  }
  0xf1   : > { %8820 = vst [vmem:[#allocation39_spill] sm:$0xff] %v7282_v43  ;;  %8821 = vst [vmem:[#allocation40_spill] sm:$0xff] %v7286_v23  ;;  %v928_v53 = vrot.slane %v4788_v37, 7  ;;  %v4885_v54 = vcombine.high %v7259_v3, %v7286_v23  ;;  %v4884_v36 = vcombine.low %v7259_v3, %v7286_v23  ;;  %v4886_v55 = vcombine.low %v7268_v26, %v7282_v43 }
  0xf2   : > { %5923 = vmatpush3.bf16.msra.mxu1 %v6414_v17  ;;  %v934_v57 = vrot.slane %v4790_v58, 7  ;;  %v7311_v7 = vsel %vm7095_vm5, %v936_v47, %v937_v48  ;;  %v442_v17 = vshrl.u32 %v7278_v41, 16  ;;  %v575_v19 = vrot.slane %v7275_v38, 1 }
  0xf3   : > { %5349 = vmatpush3.bf16.msra.mxu0 %v6413_v9  ;;  %5924 = vmatprep.subr.bf16.mxu1 %v8744_v0  ;;  %v7303_v2 = vsel %vm7095_vm5, %v927_v51, %v928_v53  ;;  %8824 = vst [vmem:[#allocation43_spill] sm:$0xff] %v7311_v7  ;;  %v6420_v9 = vld [vmem:[#allocation4 + $0xb8] sm:$0xff]   ;;  %v7323_v20 = vrot.slane %v7278_v41, 1  ;;  %v446_v21 = vshrl.u32 %v7296_v62, 16  ;;  %v435_v27 = vrot.slane %v433_v12, 1 }
  0xf4   : > { %5350 = vmatprep.subr.bf16.mxu0 %v6415_v18  ;;  %8822 = vst [vmem:[#allocation41_spill] sm:$0xff] %v7303_v2  ;;  %v440_v28 = vrot.slane %v438_v15, 1  ;;  %v453_v33 = vshll.u32 %v7299_v63, 16  ;;  %v578_v48 = vrot.slane %v7296_v62, 1 }
  0xf5   : > { %5865 = vmatmul.mubr.bf16.gmra.mrb[12].mxu1 %v4883_v6  ;;  %1557 = vmatmul.mubr.bf16.gmra.mrb[12].mxu0 %v4881_v5  ;;  %v933_v5 = vrot.slane %v928_v53, 4  ;;  %v7307_v6 = vsel %vm7095_vm5, %v930_v46, %v931_v32  ;;  %v577_v29 = vsel %vm559_vm3, %v575_v19, %v7323_v20  ;;  %v4797_v30 = vcombine.low %v7323_v20, %v7323_v20 }
  0xf6   : > { %5868 = vmatprep.mubr.msk.bf16.mxu1 %vm6789_vm0, %v8744_v0  ;;  %8823 = vst [vmem:[#allocation42_spill] sm:$0xff] %v7307_v6  ;;  %1564 = vmatprep.mubr.bf16.mxu0 %v4885_v54  ;;  %v4889_v25 = vcombine.low %v7307_v6, %v7311_v7  ;;  %v448_v32 = vshll.u32 %v7296_v62, 16  ;;  %v436_v34 = vor.u32 %v435_v27, %v431_v11  ;;  %v455_v47 = vrot.slane %v453_v33, 1 }
  0xf7   : > { %5351 = vmatpush3.bf16.msra.mxu0 %v6416_v42  ;;  %5925 = vmatpush3.bf16.msra.mxu1 %v6417_v35  ;;  %v7319_v18 = vsel %vm7095_vm5, %v933_v5, %v934_v57  ;;  %v444_v37 = vor.u32 %v442_v17, %v440_v28  ;;  %v4793_v58 = vcombine.low %v577_v29, %v577_v29  ;;  %v951_v35 = vrot.slane %v4797_v30, 7 }
  0xf8   : > { %8825 = vst [vmem:[#allocation44_spill] sm:$0xff] %v7319_v18  ;;  %5352 = vmatprep.subr.bf16.mxu0 %v6418_v49  ;;  %5926 = vmatprep.subr.bf16.mxu1 %v8744_v0  ;;  %v4888_v10 = vcombine.high %v7303_v2, %v7319_v18  ;;  %v4795_v42 = vcombine.high %v577_v29, %v577_v29  ;;  %v450_v46 = vrot.slane %v448_v32, 1 }
  0xf9   : > { %v441_v49 = vsel %vm354_vm4, %v436_v34, %v440_v28  ;;  %v4796_v51 = vcombine.low %v7278_v41, %v444_v37  ;;  %v4859_v53 = vrot.slane %v4793_v58, 11  ;;  %v4798_v5 = vcombine.high %v7278_v41, %v444_v37 }
  0xfa   : > { %v945_v54 = vrot.slane %v4795_v42, 7  ;;  %v4794_v57 = vcombine.high %v7275_v38, %v441_v49  ;;  %v4799_v33 = vcombine.high %v7323_v20, %v7323_v20  ;;  %v956_v58 = vrot.slane %v951_v35, 4 }
  0xfb   : > { %5353 = vmatpush3.bf16.msra.mxu0 %v6419_v1  ;;  %5927 = vmatpush3.bf16.msra.mxu1 %v6420_v9  ;;  %v451_v1 = vor.u32 %v450_v46, %v446_v21  ;;  %v4887_v9 = vcombine.low %v7303_v2, %v7319_v18  ;;  %v948_v11 = vrot.slane %v4796_v51, 7 }
  0xfc   : > { %5467 = vmatprep.subr.bf16.mxu0 %v6421_v22  ;;  %5988 = vmatprep.subr.bf16.mxu1 %v8744_v0  ;;  %v950_v12 = vrot.slane %v945_v54, 4  ;;  %v941_v17 = vrot.slane %v4794_v57, 7  ;;  %v7351_v19 = vsel %vm7095_vm5, %v4859_v53, %v945_v54  ;;  %v457_v57 = vshrl.u32 %v7299_v63, 16 }
  0xfd   : > { %5869 = vmatmul.mubr.bf16.gmra.mrb[16].mxu1 %v4886_v55  ;;  %1565 = vmatmul.mubr.bf16.gmra.mrb[16].mxu0 %v4884_v36  ;;  %v4792_v55 = vcombine.low %v7275_v38, %v441_v49  ;;  %v579_v36 = vrot.slane %v7299_v63, 1  ;;  %8826 = vst [vmem:[#allocation45_spill] sm:$0xff] %v7351_v19  ;;  %v456_v22 = vsel %vm354_vm4, %v451_v1, %v455_v47  ;;  %v953_v29 = vrot.slane %v948_v11, 4  ;;  %v7378_v49 = vld [vmem:[%s7066_s20 + $0x70] sm:$0xff] }
  0xfe   : > { %5872 = vmatprep.mubr.msk.bf16.mxu1 %vm6789_vm0, %v8744_v0  ;;  %1572 = vmatprep.mubr.bf16.mxu0 %v4888_v10  ;;  %v7356_v38 = vsel %vm7095_vm5, %v950_v12, %v951_v35  ;;  %v4800_v41 = vcombine.low %v7296_v62, %v456_v22  ;;  %v4802_v21 = vcombine.high %v7296_v62, %v456_v22  ;;  %v954_v10 = vrot.slane %v4798_v5, 7  ;;  %v7396_v5 = vld [vmem:[%s7066_s20 + $0x78] sm:$0xff] }
  0xff   : > { %v4858_v15 = vrot.slane %v4792_v55, 11  ;;  %8827 = vst [vmem:[#allocation46_spill] sm:$0xff] %v7356_v38  ;;  %v947_v28 = vrot.slane %v941_v17, 4  ;;  %v4892_v46 = vcombine.low %v7351_v19, %v7356_v38  ;;  %v4805_v1 = vcombine.low %v579_v36, %v579_v36 }
 0x100   : > { %v4860_v30 = vrot.slane %v4800_v41, 11  ;;  %v961_v32 = vrot.slane %v4802_v21, 7  ;;  %v7382_v20 = vsel %vm7095_vm5, %v953_v29, %v954_v10  ;;  %v4807_v12 = vcombine.high %v579_v36, %v579_v36 }
 0x101   : > { %v7362_v27 = vsel %vm7095_vm5, %v4858_v15, %v941_v17  ;;  %v7371_v62 = vsel %vm7095_vm5, %v947_v28, %v948_v11  ;;  %8830 = vst [vmem:[#allocation49_spill] sm:$0xff] %v7382_v20  ;;  %v7403_v17 = vld [vmem:[%s7066_s20 + $0x80] sm:$0xff]  ;;  %v459_v41 = vor.u32 %v457_v57, %v455_v47  ;;  %v971_v21 = vrot.slane %v4805_v1, 7 }
 0x102   : > { %8828 = vst [vmem:[#allocation47_spill] sm:$0xff] %v7362_v27  ;;  %8829 = vst [vmem:[#allocation48_spill] sm:$0xff] %v7371_v62  ;;  %v4891_v42 = vcombine.high %v7362_v27, %v7371_v62  ;;  %v7386_v51 = vsel %vm7095_vm5, %v4860_v30, %v961_v32  ;;  %v4890_v54 = vcombine.low %v7362_v27, %v7371_v62  ;;  %v967_v11 = vrot.slane %v961_v32, 4 }
 0x103   : > { %8831 = vst [vmem:[#allocation50_spill] sm:$0xff] %v7386_v51  ;;  %v4894_v22 = vcombine.high %v7382_v20, %v7386_v51  ;;  %v463_v10 = vshll.u32 %v7378_v49, 16  ;;  %v461_v28 = vshrl.u32 %v7378_v49, 16  ;;  %v468_v29 = vshll.u32 %v7396_v5, 16 }
 0x104   : > { %v4804_v32 = vcombine.low %v7299_v63, %v459_v41  ;;  %v4806_v47 = vcombine.high %v7299_v63, %v459_v41  ;;  %v4893_v57 = vcombine.low %v7382_v20, %v7386_v51 }
 0x105   : > { %5873 = vmatmul.mubr.bf16.gmra.mrb[20].mxu1 %v4889_v25  ;;  %v580_v25 = vsel %vm559_vm3, %v578_v48, %v579_v36  ;;  %1573 = vmatmul.mubr.bf16.gmra.mrb[20].mxu0 %v4887_v9  ;;  %v957_v48 = vrot.slane %v4799_v33, 7  ;;  %v472_v36 = vshrl.u32 %v7396_v5, 16  ;;  %v977_v33 = vrot.slane %v4807_v12, 7 }
 0x106   : > { %5876 = vmatprep.mubr.msk.bf16.mxu1 %vm6789_vm0, %v8744_v0  ;;  %v4801_v34 = vcombine.low %v580_v25, %v580_v25  ;;  %v4803_v37 = vcombine.high %v580_v25, %v580_v25  ;;  %1580 = vmatprep.mubr.bf16.mxu0 %v4891_v42  ;;  %v581_v25 = vrot.slane %v7378_v49, 1  ;;  %v582_v42 = vrot.slane %v7396_v5, 1 }
 0x107   : > { %v7392_v55 = vsel %vm7095_vm5, %v956_v58, %v957_v48  ;;  %v470_v58 = vrot.slane %v468_v29, 1  ;;  %v974_v48 = vrot.slane %v4806_v47, 7 }
 0x108   : > { %v4861_v35 = vrot.slane %v4801_v34, 11  ;;  %v965_v53 = vrot.slane %v4803_v37, 7  ;;  %8832 = vst [vmem:[#allocation51_spill] sm:$0xff] %v7392_v55  ;;  %v976_v34 = vrot.slane %v971_v21, 4  ;;  %v465_v37 = vrot.slane %v463_v10, 1 }
 0x109   : > { %v474_v63 = vor.u32 %v472_v36, %v470_v58  ;;  %v583_v12 = vsel %vm559_vm3, %v581_v25, %v582_v42 }
 0x10a   : > { %v7400_v9 = vsel %vm7095_vm5, %v4861_v35, %v965_v53  ;;  %v970_v15 = vrot.slane %v965_v53, 4  ;;  %v476_v35 = vshrl.u32 %v7403_v17, 16  ;;  %v478_v53 = vshll.u32 %v7403_v17, 16 }
 0x10b   : > { %v4895_v30 = vcombine.low %v7392_v55, %v7400_v9  ;;  %v466_v1 = vor.u32 %v465_v37, %v461_v28  ;;  %v4809_v10 = vcombine.low %v583_v12, %v583_v12  ;;  %v4811_v29 = vcombine.high %v583_v12, %v583_v12  ;;  %v7441_v37 = vld [vmem:[%s7066_s20 + $0x88] sm:$0xff] }
 0x10c   : > { %v4812_v47 = vcombine.low %v7396_v5, %v474_v63  ;;  %v7436_v36 = vsel %vm7095_vm5, %v970_v15, %v971_v21  ;;  %v4814_v51 = vcombine.high %v7396_v5, %v474_v63  ;;  %v4815_v63 = vcombine.high %v582_v42, %v582_v42 }
 0x10d   : > { %5877 = vmatmul.mubr.bf16.gmra.mrb[24].mxu1 %v4892_v46  ;;  %1581 = vmatmul.mubr.bf16.gmra.mrb[24].mxu0 %v4890_v54  ;;  %v968_v46 = vrot.slane %v4804_v32, 7  ;;  %v471_v32 = vsel %vm354_vm4, %v466_v1, %v470_v58 }
 0x10e   : > { %5880 = vmatprep.mubr.msk.bf16.mxu1 %vm6789_vm0, %v8744_v0  ;;  %1588 = vmatprep.mubr.bf16.mxu0 %v4894_v22  ;;  %v4813_v22 = vcombine.low %v582_v42, %v582_v42  ;;  %v480_v0 = vrot.slane %v478_v53, 1  ;;  %v4810_v25 = vcombine.high %v7378_v49, %v471_v32  ;;  %v985_v53 = vrot.slane %v4811_v29, 7 }
 0x10f   : > { %v7426_v41 = vsel %vm7095_vm5, %v967_v11, %v968_v46  ;;  %v973_v54 = vrot.slane %v968_v46, 4  ;;  %v4808_v11 = vcombine.low %v7378_v49, %v471_v32  ;;  %v8834_v46 = vmov 0.0  }
 0x110   : > { %8833 = vst [vmem:[#allocation52_spill] sm:$0xff] %v7426_v41  ;;  %v981_v21 = vrot.slane %v4810_v25, 7  ;;  %v988_v1 = vrot.slane %v4812_v47, 7  ;;  %v991_v12 = vrot.slane %v4813_v22, 7  ;;  %v481_v49 = vor.u32 %v480_v0, %v476_v35 }
 0x111   : > { %v7432_v28 = vsel %vm7095_vm5, %v973_v54, %v974_v48  ;;  %v4863_v48 = vrot.slane %v4809_v10, 11  ;;  %v4862_v15 = vrot.slane %v4808_v11, 11  ;;  %v990_v54 = vrot.slane %v985_v53, 4 }
 0x112   : > { %v4897_v58 = vcombine.high %v7426_v41, %v7432_v28  ;;  %v483_v32 = vshll.u32 %v7441_v37, 16  ;;  %v584_v10 = vrot.slane %v7403_v17, 1  ;;  %v4896_v29 = vcombine.low %v7426_v41, %v7432_v28 }
 0x113   : > { %v993_v35 = vrot.slane %v988_v1, 4  ;;  %v585_v47 = vrot.slane %v7441_v37, 1  ;;  %v996_v22 = vrot.slane %v991_v12, 4  ;;  %v7471_v25 = vsel %vm7095_vm5, %v4863_v48, %v985_v53 }
 0x114   : > { %v485_v0 = vrot.slane %v483_v32, 1 }
 0x115   : > { %5881 = vmatmul.mubr.bf16.gmra.mrb[28].mxu1 %v4895_v30  ;;  %v7449_v30 = vsel %vm7095_vm5, %v976_v34, %v977_v33  ;;  %1589 = vmatmul.mubr.bf16.gmra.mrb[28].mxu0 %v4893_v57  ;;  %v7457_v33 = vsel %vm7095_vm5, %v4862_v15, %v981_v21  ;;  %v987_v34 = vrot.slane %v981_v21, 4  ;;  %v994_v57 = vrot.slane %v4814_v51, 7 }
 0x116   : > { %5884 = vmatprep.mubr.msk.bf16.mxu1 %vm6789_vm0, %v8834_v46  ;;  %v4898_v38 = vcombine.low %v7436_v36, %v7449_v30  ;;  %1596 = vmatprep.mubr.bf16.mxu0 %v4897_v58  ;;  %v7475_v58 = vsel %vm7095_vm5, %v990_v54, %v991_v12  ;;  %v486_v15 = vsel %vm354_vm4, %v481_v49, %v485_v0  ;;  %v487_v12 = vshrl.u32 %v7441_v37, 16 }
 0x117   : > { %v7465_v5 = vsel %vm7095_vm5, %v987_v34, %v988_v1  ;;  %v4816_v21 = vcombine.low %v7403_v17, %v486_v15  ;;  %v4818_v51 = vcombine.high %v7403_v17, %v486_v15  ;;  %v586_v42 = vsel %vm559_vm3, %v584_v10, %v585_v47 }
 0x118   : > { %v4900_v11 = vcombine.high %v7457_v33, %v7465_v5  ;;  %v997_v1 = vrot.slane %v4815_v63, 7  ;;  %v4817_v48 = vcombine.low %v586_v42, %v586_v42  ;;  %v4819_v53 = vcombine.high %v586_v42, %v586_v42 }
 0x119   : > { %v4821_v54 = vcombine.low %v585_v47, %v585_v47  ;;  %v4864_v32 = vrot.slane %v4816_v21, 11  ;;  %v1001_v49 = vrot.slane %v4818_v51, 7  ;;  %v489_v17 = vor.u32 %v487_v12, %v485_v0  ;;  %v7498_v51 = vld [vmem:[%s7066_s20 + $0x98] sm:$0xff]  ;;  %v7514_v12 = vld [vmem:[%s7066_s20 + $0xa8] sm:$0xff] }
 0x11a   : > { %v4865_v34 = vrot.slane %v4817_v48, 11  ;;  %v1005_v41 = vrot.slane %v4819_v53, 7  ;;  %v4901_v10 = vcombine.low %v7471_v25, %v7475_v58  ;;  %v7488_v63 = vsel %vm7095_vm5, %v993_v35, %v994_v57  ;;  %v7506_v35 = vld [vmem:[%s7066_s20 + $0xa0] sm:$0xff] }
 0x11b   : > { %v7492_v15 = vsel %vm7095_vm5, %v996_v22, %v997_v1  ;;  %v7494_v21 = vrot.slane %v4821_v54, 7  ;;  %v4820_v0 = vcombine.low %v7441_v37, %v489_v17  ;;  %v1007_v42 = vrot.slane %v1001_v49, 4 }
 0x11c   : > { %v7510_v57 = vsel %vm7095_vm5, %v4865_v34, %v1005_v41  ;;  %v4822_v22 = vcombine.high %v7441_v37, %v489_v17  ;;  %v1010_v1 = vrot.slane %v1005_v41, 4  ;;  %v502_v55 = vshrl.u32 %v7498_v51, 16 }
 0x11d   : > { %5885 = vmatmul.mubr.bf16.gmra.mrb[32].mxu1 %v4898_v38  ;;  %v4823_v38 = vcombine.high %v585_v47, %v585_v47  ;;  %1597 = vmatmul.mubr.bf16.gmra.mrb[32].mxu0 %v4896_v29  ;;  %v348_v47 = vld [vmem:[%s7066_s20 + $0x90] sm:$0xff]  ;;  %v7502_v29 = vsel %vm7095_vm5, %v4864_v32, %v1001_v49  ;;  %v498_v32 = vshll.u32 %v7498_v51, 16  ;;  %v4899_v49 = vcombine.low %v7457_v33, %v7465_v5 }
 0x11e   : > { %5888 = vmatprep.mubr.msk.bf16.mxu1 %vm6789_vm0, %v8834_v46  ;;  %1604 = vmatprep.mubr.bf16.mxu0 %v4900_v11  ;;  %v491_v53 = vshrl.u32 %v348_v47, 16  ;;  %v1008_v11 = vrot.slane %v4820_v0, 7  ;;  %v493_v54 = vshll.u32 %v348_v47, 16  ;;  %v1014_v34 = vrot.slane %v4822_v22, 7 }
 0x11f   : > { %v1017_v48 = vrot.slane %v4823_v38, 7  ;;  %v4903_v38 = vcombine.high %v7488_v63, %v7502_v29  ;;  %v587_v62 = vrot.slane %v348_v47, 1  ;;  %v4902_v41 = vcombine.low %v7488_v63, %v7502_v29 }
 0x120   : > { %v4904_v37 = vcombine.low %v7492_v15, %v7510_v57  ;;  %v1013_v17 = vrot.slane %v1008_v11, 4  ;;  %v495_v0 = vrot.slane %v493_v54, 1  ;;  %v1016_v20 = vrot.slane %v7494_v21, 4 }
 0x121   : > { %v500_v7 = vrot.slane %v498_v32, 1  ;;  %v508_v22 = vshll.u32 %v7506_v35, 16  ;;  %v7536_v19 = vsel %vm7095_vm5, %v1010_v1, %v7494_v21  ;;  %v506_v27 = vshrl.u32 %v7506_v35, 16 }
 0x122   : > { %v496_v18 = vor.u32 %v495_v0, %v491_v53  ;;  %v513_v43 = vshll.u32 %v7514_v12, 16  ;;  %v7542_v54 = vsel %vm7095_vm5, %v1007_v42, %v1008_v11  ;;  %v7546_v32 = vsel %vm7095_vm5, %v1013_v17, %v1014_v34 }
 0x123   : > { %v504_v6 = vor.u32 %v502_v55, %v500_v7  ;;  %v510_v11 = vrot.slane %v508_v22, 1  ;;  %v590_v55 = vrot.slane %v7506_v35, 1 }
 0x124   : > { %v501_v21 = vsel %vm354_vm4, %v496_v18, %v500_v7  ;;  %v515_v17 = vrot.slane %v513_v43, 1  ;;  %v7563_v18 = vsel %vm7095_vm5, %v1016_v20, %v1017_v48  ;;  %v7566_v43 = vrot.slane %v7514_v12, 1 }
 0x125   : > { %5889 = vmatmul.mubr.bf16.gmra.mrb[36].mxu1 %v4901_v10  ;;  %v7530_v10 = vrot.slane %v7498_v51, 1  ;;  %1605 = vmatmul.mubr.bf16.gmra.mrb[36].mxu0 %v4899_v49  ;;  %v4824_v0 = vcombine.low %v348_v47, %v501_v21  ;;  %v4826_v2 = vcombine.high %v348_v47, %v501_v21  ;;  %v4828_v42 = vcombine.low %v7498_v51, %v504_v6 }
 0x126   : > { %5892 = vmatprep.mubr.msk.bf16.mxu1 %vm6789_vm0, %v8834_v46  ;;  %1612 = vmatprep.mubr.bf16.mxu0 %v4903_v38  ;;  %v511_v7 = vor.u32 %v510_v11, %v506_v27  ;;  %v4830_v27 = vcombine.high %v7498_v51, %v504_v6  ;;  %v592_v20 = vsel %vm559_vm3, %v590_v55, %v7566_v43 }
 0x127   : > { %v589_v23 = vsel %vm559_vm3, %v587_v62, %v7530_v10  ;;  %v4829_v49 = vcombine.low %v7530_v10, %v7530_v10  ;;  %v4866_v62 = vrot.slane %v4824_v0, 11  ;;  %v1021_v38 = vrot.slane %v4826_v2, 7 }
 0x128   : > { %v4825_v1 = vcombine.low %v589_v23, %v589_v23  ;;  %v4827_v53 = vcombine.high %v589_v23, %v589_v23  ;;  %v4906_v23 = vcombine.high %v7542_v54, %v7546_v32  ;;  %v1028_v47 = vrot.slane %v4828_v42, 7 }
 0x129   : > { %v7555_v26 = vrot.slane %v4829_v49, 7  ;;  %v516_v2 = vsel %vm354_vm4, %v511_v7, %v515_v17  ;;  %v7578_v48 = vsel %vm7095_vm5, %v4866_v62, %v1021_v38  ;;  %v1034_v49 = vrot.slane %v4830_v27, 7  ;;  %v7600_v7 = vld [vmem:[%s7066_s20 + $0x8] sm:$0xff] }
 0x12a   : > { %v4867_v61 = vrot.slane %v4825_v1, 11  ;;  %v1025_v34 = vrot.slane %v4827_v53, 7  ;;  %v4832_v21 = vcombine.low %v7506_v35, %v516_v2  ;;  %v4834_v1 = vcombine.high %v7506_v35, %v516_v2 }
 0x12b   : > { %v4907_v53 = vcombine.low %v7536_v19, %v7563_v18  ;;  %v1033_v51 = vrot.slane %v1028_v47, 4  ;;  %v4831_v0 = vcombine.high %v7530_v10, %v7530_v10  ;;  %v4833_v55 = vcombine.low %v592_v20, %v592_v20 }
 0x12c   : > { %v1030_v22 = vrot.slane %v1025_v34, 4  ;;  %v7582_v6 = vsel %vm7095_vm5, %v4867_v61, %v1025_v34  ;;  %v4868_v42 = vrot.slane %v4832_v21, 11  ;;  %v1041_v11 = vrot.slane %v4834_v1, 7 }
 0x12d   : > { %5893 = vmatmul.mubr.bf16.gmra.mrb[40].mxu1 %v4904_v37  ;;  %v1027_v37 = vrot.slane %v1021_v38, 4  ;;  %1613 = vmatmul.mubr.bf16.gmra.mrb[40].mxu0 %v4902_v41  ;;  %v517_v61 = vshrl.u32 %v7514_v12, 16  ;;  %v4905_v34 = vcombine.low %v7542_v54, %v7546_v32  ;;  %v4835_v62 = vcombine.high %v592_v20, %v592_v20  ;;  %v330_v38 = vld [vmem:[%s7066_s20] sm:$0xff] }
 0x12e   : > { %5896 = vmatprep.mubr.msk.bf16.mxu1 %vm6789_vm0, %v8834_v46  ;;  %1620 = vmatprep.mubr.bf16.mxu0 %v4906_v23  ;;  %v7591_v41 = vsel %vm7095_vm5, %v1030_v22, %v7555_v26  ;;  %v1036_v22 = vrot.slane %v7555_v26, 4  ;;  %v1037_v2 = vrot.slane %v4831_v0, 7  ;;  %v4837_v27 = vcombine.low %v7566_v43, %v7566_v43 }
 0x12f   : > { %v7586_v35 = vsel %vm7095_vm5, %v1027_v37, %v1028_v47  ;;  %v4910_v10 = vcombine.low %v7582_v6, %v7591_v41  ;;  %v519_v47 = vor.u32 %v517_v61, %v515_v17  ;;  %v7610_v37 = vsel %vm7095_vm5, %v1033_v51, %v1034_v49 }
 0x130   : > { %v4909_v23 = vcombine.high %v7578_v48, %v7586_v35  ;;  %v7617_v21 = vsel %vm7095_vm5, %v4868_v42, %v1041_v11  ;;  %v4869_v1 = vrot.slane %v4833_v55, 11  ;;  %v1045_v17 = vrot.slane %v4835_v62, 7 }
 0x131   : > { %v4838_v20 = vcombine.high %v7514_v12, %v519_v47  ;;  %v356_v61 = vshrl.u32 %v330_v38, 16  ;;  %v358_v51 = vshll.u32 %v330_v38, 16  ;;  %v363_v49 = vshll.u32 %v7600_v7, 16 }
 0x132   : > { %v1047_v26 = vrot.slane %v1041_v11, 4  ;;  %v367_v60 = vshrl.u32 %v7600_v7, 16  ;;  %v560_v3 = vrot.slane %v330_v38, 1  ;;  %v1051_v44 = vrot.slane %v4837_v27, 7 }
 0x133   : > { %v360_v42 = vrot.slane %v358_v51, 1  ;;  %v365_v52 = vrot.slane %v363_v49, 1  ;;  %v561_v55 = vrot.slane %v7600_v7, 1  ;;  %v1054_v62 = vrot.slane %v4838_v20, 7 }
 0x134   : > { %v4912_v11 = vcombine.high %v7610_v37, %v7617_v21  ;;  %v7635_v51 = vsel %vm7095_vm5, %v1036_v22, %v1037_v2  ;;  %v7639_v20 = vsel %vm7095_vm5, %v4869_v1, %v1045_v17  ;;  %v1056_v1 = vrot.slane %v1051_v44, 4 }
 0x135   : > { %5897 = vmatmul.mubr.bf16.gmra.mrb[44].mxu1 %v4907_v53  ;;  %v4836_v53 = vcombine.low %v7514_v12, %v519_v47  ;;  %1621 = vmatmul.mubr.bf16.gmra.mrb[44].mxu0 %v4905_v34  ;;  %v4908_v12 = vcombine.low %v7578_v48, %v7586_v35  ;;  %v4839_v47 = vcombine.high %v7566_v43, %v7566_v43 }
 0x136   : > { %5900 = vmatprep.mubr.msk.bf16.mxu1 %vm6789_vm0, %v8834_v46  ;;  %1628 = vmatprep.mubr.bf16.mxu0 %v4909_v23  ;;  %v361_v23 = vor.u32 %v360_v42, %v356_v61  ;;  %v562_v27 = vsel %vm559_vm3, %v560_v3, %v561_v55  ;;  %8835 = vst [vmem:[#allocation53_spill] sm:$0xff] %v7639_v20  ;;  %v1050_v3 = vrot.slane %v1045_v17, 4 }
 0x137   : > { %v1048_v0 = vrot.slane %v4836_v53, 7  ;;  %v369_v53 = vor.u32 %v367_v60, %v365_v52  ;;  %v4753_v43 = vcombine.low %v562_v27, %v562_v27  ;;  %v4757_v60 = vcombine.low %v561_v55, %v561_v55 }
 0x138   : > { %v366_v49 = vsel %vm354_vm4, %v361_v23, %v365_v52  ;;  %v4759_v42 = vcombine.high %v561_v55, %v561_v55  ;;  %v4913_v22 = vcombine.low %v7635_v51, %v7639_v20 }
 0x139   : > { %v1053_v34 = vrot.slane %v1048_v0, 4  ;;  %v4756_v61 = vcombine.low %v7600_v7, %v369_v53  ;;  %v4752_v24 = vcombine.low %v330_v38, %v366_v49  ;;  %v4754_v50 = vcombine.high %v330_v38, %v366_v49 }
 0x13a   : > { %v7647_v2 = vsel %vm7095_vm5, %v1047_v26, %v1048_v0  ;;  %v4849_v23 = vrot.slane %v4753_v43, 11  ;;  %v857_v49 = vrot.slane %v4759_v42, 7  ;;  %v4758_v20 = vcombine.high %v7600_v7, %v369_v53 }
 0x13b   : > { %v7651_v52 = vsel %vm7095_vm5, %v1053_v34, %v1054_v62  ;;  %v841_v55 = vrot.slane %v4754_v50, 7  ;;  %v848_v17 = vrot.slane %v4756_v61, 7  ;;  %v4848_v38 = vrot.slane %v4752_v24, 11 }
 0x13c   : > { %v4911_v26 = vcombine.low %v7610_v37, %v7617_v21  ;;  %v4915_v0 = vcombine.high %v7647_v2, %v7651_v52  ;;  %v7662_v24 = vsel %vm7095_vm5, %v1050_v3, %v1051_v44  ;;  %v854_v7 = vrot.slane %v4758_v20, 7  ;;  %v6429_v3 = vld [vmem:[#allocation4 + $0x210] sm:$0xff]  }
 0x13d   : > { %5901 = vmatmul.mubr.bf16.gmra.mrb[48].mxu1 %v4910_v10  ;;  %v4755_v10 = vcombine.high %v562_v27, %v562_v27  ;;  %1629 = vmatmul.mubr.bf16.gmra.mrb[48].mxu0 %v4908_v12  ;;  %v1057_v27 = vrot.slane %v4839_v47, 7  ;;  %v851_v12 = vrot.slane %v4757_v60, 7  ;;  %v847_v56 = vrot.slane %v841_v55, 4 }
 0x13e   : > { %5904 = vmatprep.mubr.msk.bf16.mxu1 %vm6789_vm0, %v8834_v46  ;;  %1636 = vmatprep.mubr.bf16.mxu0 %v4912_v11  ;;  %v853_v31 = vrot.slane %v848_v17, 4  ;;  %v842_v47 = vsel %vm7095_vm5, %v4848_v38, %v841_v55  ;;  %v4914_v44 = vcombine.low %v7647_v2, %v7651_v52  ;;  %v7682_v61 = vcombine.low %v7400_v9, %v7436_v36  ;;  %v6432_v55 = vld [vmem:[#allocation4 + $0x218] sm:$0xff]   ;;  %v6435_v38 = vld [vmem:[#allocation4 + $0x220] sm:$0xff]  }
 0x13f   : > { %v845_v40 = vrot.slane %v4755_v10, 7  ;;  %v7666_v50 = vsel %vm7095_vm5, %v1056_v1, %v1057_v27  ;;  %v856_v34 = vrot.slane %v851_v12, 4  ;;  %v849_v11 = vsel %vm7095_vm5, %v847_v56, %v848_v17  ;;  %v6430_v27 = vld [vmem:[#allocation4 + $0x1d8] sm:$0xff]  }
 0x140   : > { %v4916_v62 = vcombine.low %v7662_v24, %v7666_v50  ;;  %v4942_v43 = vcombine.high %v842_v47, %v849_v11  ;;  %v7686_v60 = vcombine.high %v7432_v28, %v7457_v33  ;;  %v7690_v56 = vcombine.low %v7432_v28, %v7457_v33 }
 0x141   : > { %v850_v10 = vrot.slane %v845_v40, 4  ;;  %v846_v53 = vsel %vm7095_vm5, %v4849_v23, %v845_v40  ;;  %v7694_v40 = vcombine.low %v7449_v30, %v7471_v25  ;;  %v7698_v42 = vcombine.high %v7465_v5, %v7488_v63  ;;  %v6433_v23 = vld [vmem:[#allocation4 + $0x1e0] sm:$0xff]  }
 0x142   : > { %v7702_v9 = vcombine.low %v7465_v5, %v7488_v63  ;;  %v7706_v36 = vcombine.low %v7475_v58, %v7492_v15  ;;  %v7712_v28 = vcombine.high %v7502_v29, %v7542_v54  ;;  %v7716_v30 = vcombine.low %v7502_v29, %v7542_v54  ;;  %v6423_v15 = vld [vmem:[#allocation4 + $0x200] sm:$0xff]  }
 0x143   : > { %v852_v20 = vsel %vm7095_vm5, %v850_v10, %v851_v12  ;;  %v7720_v33 = vcombine.low %v7510_v57, %v7536_v19  ;;  %v7724_v5 = vcombine.high %v7546_v32, %v7578_v48  ;;  %v7728_v25 = vcombine.low %v7546_v32, %v7578_v48  ;;  %v6422_v32 = vld [vmem:[#allocation4 + $0x180] sm:$0xff]   ;;  %v6424_v48 = vld [vmem:[#allocation4 + $0x1c8] sm:$0xff]   ;;  %v8836_v12 = vld [vmem:[#allocation28_spill] sm:$0xff] }
 0x144   : > { %v7732_v58 = vcombine.low %v7563_v18, %v7582_v6  ;;  %v7736_v63 = vcombine.high %v7586_v35, %v7610_v37  ;;  %v7740_v19 = vcombine.low %v7586_v35, %v7610_v37  ;;  %v7744_v29 = vcombine.low %v7591_v41, %v7635_v51  ;;  %v6426_v6 = vld [vmem:[#allocation4 + $0x208] sm:$0xff]   ;;  %v6427_v51 = vld [vmem:[#allocation4 + $0x1d0] sm:$0xff]  }
 0x145   : > { %5905 = vmatmul.mubr.bf16.gmra.mrb[52].mxu1 %v4913_v22  ;;  %1637 = vmatmul.mubr.bf16.gmra.mrb[52].mxu0 %v4911_v26  ;;  %v4943_v57 = vcombine.low %v846_v53, %v852_v20  ;;  %v855_v54 = vsel %vm7095_vm5, %v853_v31, %v854_v7  ;;  %v4941_v18 = vcombine.low %v842_v47, %v849_v11  ;;  %v6425_v31 = vld [vmem:[#allocation4 + $0x188] sm:$0xff]   ;;  %v8838_v7 = vld [vmem:[#allocation29_spill] sm:$0xff]  ;;  %v6440_v20 = vld [vmem:[#allocation4 + $0x1b0] sm:$0xff]  }
 0x146   : > { %5908 = vmatprep.mubr.msk.bf16.mxu1 %vm6789_vm0, %v8834_v46  ;;  %1644 = vmatprep.mubr.bf16.mxu0 %v4915_v0  ;;  %v4945_v35 = vcombine.high %v855_v54, %v7116_v8  ;;  %v858_v41 = vsel %vm7095_vm5, %v856_v34, %v857_v49  ;;  %v4944_v22 = vcombine.low %v855_v54, %v7116_v8  ;;  %v6431_v8 = vld [vmem:[#allocation4 + $0x198] sm:$0xff]   ;;  %v6438_v26 = vld [vmem:[#allocation4 + $0x228] sm:$0xff]   ;;  %v6439_v34 = vld [vmem:[#allocation4 + $0x1f0] sm:$0xff]  }
 0x147   : > { %v4946_v37 = vcombine.low %v858_v41, %v7105_v59  ;;  %v4948_v1 = vcombine.high %v7128_v16, %v7123_v14  ;;  %v6428_v59 = vld [vmem:[#allocation4 + $0x190] sm:$0xff]   ;;  %v4949_v17 = vcombine.low %v7111_v4, %v7159_v39  ;;  %v4947_v10 = vcombine.low %v7128_v16, %v7123_v14  ;;  %v6434_v4 = vld [vmem:[#allocation4 + $0x1a0] sm:$0xff]   ;;  %v6436_v39 = vld [vmem:[#allocation4 + $0x1e8] sm:$0xff]  }
 0x148   : > { %v7769_v49 = vcombine.high %v8836_v12, %v7196_v13  ;;  %v8837_v0 = vld [vmem:[#allocation30_spill] sm:$0xff]  ;;  %v7782_v47 = vcombine.low %v8836_v12, %v7196_v13  ;;  %v8839_v11 = vld [vmem:[#allocation33_spill] sm:$0xff]  ;;  %v8854_v12 = vld [vmem:[#allocation43_spill] sm:$0xff] }
 0x149   : > { %v7776_v14 = vcombine.low %v8838_v7, %v8837_v0  ;;  %v6437_v16 = vld [vmem:[#allocation4 + $0x1a8] sm:$0xff]   ;;  %v8856_v0 = vld [vmem:[#allocation48_spill] sm:$0xff] }
 0x14a   : > { %v8841_v13 = vld [vmem:[#allocation34_spill] sm:$0xff] }
 0x14b   : > { %v8845_v41 = vld [vmem:[#allocation38_spill] sm:$0xff] }
 0x14d   : > { %5909 = vmatmul.mubr.bf16.gmra.mrb[56].mxu1 %v4916_v62  ;;  %1645 = vmatmul.mubr.bf16.gmra.mrb[56].mxu0 %v4914_v44  ;;  %v6441_v62 = vld [vmem:[#allocation4 + $0x230] sm:$0xff]   ;;  %v8840_v44 = vld [vmem:[#allocation32_spill] sm:$0xff] }
 0x14e   : > { %5928 = vmatprep.mubr.msk.bf16.mxu1 %vm6789_vm0, %v8834_v46  ;;  %2081 = vmatprep.mubr.bf16.mxu0 %v4942_v43  ;;  %v7787_v53 = vcombine.high %v8840_v44, %v8839_v11  ;;  %v6442_v43 = vld [vmem:[#allocation4 + $0x1f8] sm:$0xff]  }
 0x155   : > { %5929 = vmatmul.mubr.bf16.vlgmr.msra.gmra.mrb[60].mxu1 %v4943_v57  ;;  %2082 = vmatmul.mubr.bf16.vlgmr.msra.gmra.mrb[60].mxu0 %v4941_v18  ;;  %v8842_v57 = vld [vmem:[#allocation31_spill] sm:$0xff]  ;;  %v7800_v18 = vcombine.low %v8840_v44, %v8839_v11  ;;  %v8859_v44 = vld [vmem:[#allocation52_spill] sm:$0xff] }
 0x156   : > { %5989 = vmatpush3.bf16.msra.mxu1 %v6423_v15  ;;  %5932 = vmatprep.mubr.msk.bf16.mxu1 %vm6789_vm0, %v8834_v46  ;;  %v6444_v15 = vld [vmem:[#allocation4 + $0x238] sm:$0xff]   ;;  %v7795_v54 = vcombine.low %v8842_v57, %v8841_v13 }
 0x157   : > { %5990 = vmatprep.subr.bf16.mxu1 %v8834_v46  ;;  %5468 = vmatpush3.bf16.msra.mxu0 %v6422_v32  ;;  %v6443_v32 = vld [vmem:[#allocation4 + $0x1b8] sm:$0xff]  }
 0x158   : > { %2089 = vmatprep.mubr.bf16.mxu0 %v4945_v35  ;;  %5469 = vmatprep.subr.bf16.mxu0 %v6424_v48  ;;  %v8843_v48 = vld [vmem:[#allocation37_spill] sm:$0xff] }
 0x15a   : > { %5991 = vmatpush3.bf16.msra.mxu1 %v6426_v6  ;;  %v8844_v6 = vld [vmem:[#allocation35_spill] sm:$0xff] }
 0x15b   : > { %5992 = vmatprep.subr.bf16.mxu1 %v8834_v46  ;;  %5470 = vmatpush3.bf16.msra.mxu0 %v6425_v31  ;;  %v7805_v35 = vcombine.high %v8844_v6, %v8843_v48 }
 0x15c   : > { %5471 = vmatprep.subr.bf16.mxu0 %v6427_v51  ;;  %v7817_v51 = vcombine.low %v8844_v6, %v8843_v48 }
 0x15d   : > { %5933 = vmatmul.mubr.bf16.gmra.mrb[64].mxu1 %v4946_v37  ;;  %2090 = vmatmul.mubr.bf16.gmra.mrb[64].mxu0 %v4944_v22  ;;  %v8846_v37 = vld [vmem:[#allocation36_spill] sm:$0xff] }
 0x15e   : > { %5936 = vmatprep.mubr.msk.bf16.mxu1 %vm6789_vm0, %v8834_v46  ;;  %5993 = vmatpush3.bf16.msra.mxu1 %v6429_v3  ;;  %v7812_v31 = vcombine.low %v8846_v37, %v8845_v41  ;;  %v8847_v3 = vld [vmem:[#allocation41_spill] sm:$0xff]  ;;  %v8848_v22 = vld [vmem:[#allocation40_spill] sm:$0xff] }
 0x15f   : > { %5994 = vmatprep.subr.bf16.mxu1 %v8834_v46  ;;  %2097 = vmatprep.mubr.bf16.mxu0 %v4948_v1  ;;  %v7822_v1 = vcombine.high %v8848_v22, %v8847_v3 }
 0x160   : > { %5472 = vmatpush3.bf16.msra.mxu0 %v6428_v59  ;;  %v8849_v59 = vld [vmem:[#allocation42_spill] sm:$0xff] }
 0x161   : > { %5473 = vmatprep.subr.bf16.mxu0 %v6430_v27  ;;  %v8850_v27 = vld [vmem:[#allocation39_spill] sm:$0xff] }
 0x162   : > { %5995 = vmatpush3.bf16.msra.mxu1 %v6432_v55  ;;  %v7829_v55 = vcombine.low %v8850_v27, %v8849_v59 }
 0x163   : > { %5996 = vmatprep.subr.bf16.mxu1 %v8834_v46 }
 0x164   : > { %5474 = vmatpush3.bf16.msra.mxu0 %v6431_v8  ;;  %v8851_v8 = vld [vmem:[#allocation47_spill] sm:$0xff] }
 0x165   : > { %5937 = vmatmul.mubr.bf16.gmra.mrb[68].mxu1 %v4949_v17  ;;  %5475 = vmatprep.subr.bf16.mxu0 %v6433_v23  ;;  %v7834_v17 = vcombine.low %v8848_v22, %v8847_v3  ;;  %v8852_v23 = vld [vmem:[#allocation44_spill] sm:$0xff] }
 0x166   : > { %5940 = vmatprep.mubr.msk.bf16.mxu1 %vm6789_vm0, %v8834_v46  ;;  %5997 = vmatpush3.bf16.msra.mxu1 %v6435_v38  ;;  %v7839_v38 = vcombine.high %v8852_v23, %v8851_v8 }
 0x167   : > { %5998 = vmatprep.subr.bf16.mxu1 %v8834_v46  ;;  %2098 = vmatmul.mubr.bf16.gmra.mrb[68].mxu0 %v4947_v10  ;;  %v8853_v10 = vld [vmem:[#allocation45_spill] sm:$0xff] }
 0x168   : > { %2105 = vmatprep.mubr.bf16.mxu0 %v7769_v49  ;;  %5476 = vmatpush3.bf16.msra.mxu0 %v6434_v4  ;;  %v7846_v4 = vcombine.low %v8854_v12, %v8853_v10 }
 0x169   : > { %5477 = vmatprep.subr.bf16.mxu0 %v6436_v39  ;;  %v7851_v39 = vcombine.low %v8852_v23, %v8851_v8 }
 0x16a   : > { %5999 = vmatpush3.bf16.msra.mxu1 %v6438_v26  ;;  %v8855_v26 = vld [vmem:[#allocation49_spill] sm:$0xff] }
 0x16b   : > { %6000 = vmatprep.subr.bf16.mxu1 %v8834_v46  ;;  %v7856_v7 = vcombine.high %v8856_v0, %v8855_v26  ;;  %v7868_v11 = vcombine.low %v8856_v0, %v8855_v26 }
 0x16c   : > { %5478 = vmatpush3.bf16.msra.mxu0 %v6437_v16  ;;  %v8857_v16 = vld [vmem:[#allocation51_spill] sm:$0xff] }
 0x16d   : > { %5941 = vmatmul.mubr.bf16.gmra.mrb[72].mxu1 %v7776_v14  ;;  %5479 = vmatprep.subr.bf16.mxu0 %v6439_v34  ;;  %v8858_v34 = vld [vmem:[#allocation46_spill] sm:$0xff] }
 0x16e   : > { %5944 = vmatprep.mubr.msk.bf16.mxu1 %vm6789_vm0, %v8834_v46  ;;  %6001 = vmatpush3.bf16.msra.mxu1 %v6441_v62  ;;  %v7863_v62 = vcombine.low %v8858_v34, %v8857_v16 }
 0x16f   : > { %6002 = vmatprep.subr.bf16.mxu1 %v8834_v46  ;;  %2106 = vmatmul.mubr.bf16.gmra.mrb[72].mxu0 %v7782_v47 }
 0x170   : > { %2113 = vmatprep.mubr.bf16.mxu0 %v7787_v53  ;;  %5480 = vmatpush3.bf16.msra.mxu0 %v6440_v20  ;;  %v8860_v20 = vld [vmem:[#allocation50_spill] sm:$0xff] }
 0x171   : > { %5481 = vmatprep.subr.bf16.mxu0 %v6442_v43  ;;  %v7873_v43 = vcombine.high %v8860_v20, %v8859_v44 }
 0x172   : > { %6003 = vmatpush3.bf16.msra.mxu1 %v6444_v15  ;;  %v7881_v15 = vcombine.low %v8860_v20, %v8859_v44 }
 0x174   : > { %5482 = vmatpush3.bf16.msra.mxu0 %v6443_v32 }
 0x175   : > { %5945 = vmatmul.mubr.bf16.gmra.mrb[76].mxu1 %v7795_v54 }
 0x176   : > { %5948 = vmatprep.mubr.msk.bf16.mxu1 %vm6789_vm0, %v8834_v46 }
 0x177   : > { %2114 = vmatmul.mubr.bf16.gmra.mrb[76].mxu0 %v7800_v18 }
 0x178   : > { %2121 = vmatprep.mubr.bf16.mxu0 %v7805_v35 }
 0x17d   : > { %5949 = vmatmul.mubr.bf16.gmra.mrb[80].mxu1 %v7812_v31 }
 0x17e   : > { %5952 = vmatprep.mubr.msk.bf16.mxu1 %vm6789_vm0, %v8834_v46 }
 0x17f   : > { %2122 = vmatmul.mubr.bf16.gmra.mrb[80].mxu0 %v7817_v51 }
 0x180   : > { %2129 = vmatprep.mubr.bf16.mxu0 %v7822_v1 }
 0x185   : > { %5953 = vmatmul.mubr.bf16.gmra.mrb[84].mxu1 %v7829_v55 }
 0x186   : > { %5956 = vmatprep.mubr.msk.bf16.mxu1 %vm6789_vm0, %v8834_v46 }
 0x187   : > { %2130 = vmatmul.mubr.bf16.gmra.mrb[84].mxu0 %v7834_v17 }
 0x188   : > { %2137 = vmatprep.mubr.bf16.mxu0 %v7839_v38 }
 0x18d   : > { %5957 = vmatmul.mubr.bf16.gmra.mrb[88].mxu1 %v7846_v4 }
 0x18e   : > { %5960 = vmatprep.mubr.msk.bf16.mxu1 %vm6789_vm0, %v8834_v46 }
 0x18f   : > { %2138 = vmatmul.mubr.bf16.gmra.mrb[88].mxu0 %v7851_v39 }
 0x190   : > { %2145 = vmatprep.mubr.bf16.mxu0 %v7856_v7 }
 0x195   : > { %5961 = vmatmul.mubr.bf16.gmra.mrb[92].mxu1 %v7863_v62 }
 0x196   : > { %5964 = vmatprep.mubr.msk.bf16.mxu1 %vm6789_vm0, %v8834_v46 }
 0x197   : > { %2146 = vmatmul.mubr.bf16.gmra.mrb[92].mxu0 %v7868_v11 }
 0x198   : > { %2153 = vmatprep.mubr.bf16.mxu0 %v7873_v43 }
 0x19d   : > { %5965 = vmatmul.mubr.bf16.gmra.mrb[96].mxu1 %v7682_v61 }
 0x19e   : > { %5968 = vmatprep.mubr.msk.bf16.mxu1 %vm6789_vm0, %v8834_v46 }
 0x19f   : > { %2154 = vmatmul.mubr.bf16.gmra.mrb[96].mxu0 %v7881_v15 }
 0x1a0   : > { %2161 = vmatprep.mubr.bf16.mxu0 %v7686_v60 }
 0x1a5   : > { %5969 = vmatmul.mubr.bf16.gmra.mrb[100].mxu1 %v7694_v40 }
 0x1a6   : > { %5972 = vmatprep.mubr.msk.bf16.mxu1 %vm6789_vm0, %v8834_v46 }
 0x1a7   : > { %2162 = vmatmul.mubr.bf16.gmra.mrb[100].mxu0 %v7690_v56 }
 0x1a8   : > { %2169 = vmatprep.mubr.bf16.mxu0 %v7698_v42 }
 0x1ad   : > { %5973 = vmatmul.mubr.bf16.gmra.mrb[104].mxu1 %v7706_v36 }
 0x1ae   : > { %5976 = vmatprep.mubr.msk.bf16.mxu1 %vm6789_vm0, %v8834_v46 }
 0x1af   : > { %2170 = vmatmul.mubr.bf16.gmra.mrb[104].mxu0 %v7702_v9 }
 0x1b0   : > { %v1687_v13 = vpop.f32.mrb[0].mxu1  ;;  %2177 = vmatprep.mubr.bf16.mxu0 %v7712_v28  ;;  %v5225_v6 = vpop.f32.mrb[0].mxu0 }
 0x1b1   : > { %v5854_v57 = vpop.f32.mrb[1].mxu1  ;;  %v5226_v41 = vpop.f32.mrb[1].mxu0 }
 0x1b2   : > { %v1690_v32 = vpop.f32.mrb[2].mxu1  ;;  %v5227_v37 = vadd.f32 %v5226_v41, %v5225_v6  ;;  %v5228_v3 = vpop.f32.mrb[2].mxu0 }
 0x1b3   : > { %v5855_v48 = vpop.f32.mrb[3].mxu1  ;;  %v5229_v22 = vpop.f32.mrb[3].mxu0 }
 0x1b4   : > { %v7901_v59 = vadd.f32 %v5227_v37, %v1687_v13  ;;  %v5230_v27 = vadd.f32 %v5229_v22, %v5228_v3 }
 0x1b5   : > { %5977 = vmatmul.mubr.bf16.gmra.mrb[108].mxu1 %v7720_v33 }
 0x1b6   : > { %5980 = vmatprep.mubr.msk.bf16.mxu1 %vm6789_vm0, %v8834_v46  ;;  %v7904_v10 = vadd.f32 %v5230_v27, %v1690_v32 }
 0x1b7   : > { %2178 = vmatmul.mubr.bf16.gmra.mrb[108].mxu0 %v7716_v30 }
 0x1b8   : > { %v1695_v8 = vpop.f32.mrb[4].mxu1  ;;  %2185 = vmatprep.mubr.bf16.mxu0 %v7724_v5  ;;  %v5231_v0 = vpop.f32.mrb[4].mxu0 }
 0x1b9   : > { %v5858_v23 = vpop.f32.mrb[5].mxu1  ;;  %v5232_v16 = vpop.f32.mrb[5].mxu0 }
 0x1ba   : > { %v1698_v12 = vpop.f32.mrb[6].mxu1  ;;  %v5233_v34 = vadd.f32 %v5232_v16, %v5231_v0  ;;  %v5234_v44 = vpop.f32.mrb[6].mxu0 }
 0x1bb   : > { %v5859_v26 = vpop.f32.mrb[7].mxu1  ;;  %v5235_v20 = vpop.f32.mrb[7].mxu0 }
 0x1bc   : > { %v7910_v13 = vadd.f32 %v5233_v34, %v1695_v8  ;;  %v5236_v57 = vadd.f32 %v5235_v20, %v5234_v44 }
 0x1bd   : > { %5981 = vmatmul.mubr.bf16.gmra.mrb[112].mxu1 %v7732_v58 }
 0x1be   : > { %5984 = vmatprep.mubr.msk.bf16.mxu1 %vm6789_vm0, %v8834_v46  ;;  %v7913_v6 = vadd.f32 %v5236_v57, %v1698_v12 }
 0x1bf   : > { %2186 = vmatmul.mubr.bf16.gmra.mrb[112].mxu0 %v7728_v25 }
 0x1c0   : > { %v1703_v48 = vpop.f32.mrb[8].mxu1  ;;  %2193 = vmatprep.mubr.bf16.mxu0 %v7736_v63  ;;  %v5237_v3 = vpop.f32.mrb[8].mxu0 }
 0x1c1   : > { %v5862_v32 = vpop.f32.mrb[9].mxu1  ;;  %v5238_v22 = vpop.f32.mrb[9].mxu0 }
 0x1c2   : > { %v1706_v41 = vpop.f32.mrb[10].mxu1  ;;  %v5239_v27 = vadd.f32 %v5238_v22, %v5237_v3  ;;  %v5240_v23 = vpop.f32.mrb[10].mxu0 }
 0x1c3   : > { %v5863_v37 = vpop.f32.mrb[11].mxu1  ;;  %v5241_v8 = vpop.f32.mrb[11].mxu0 }
 0x1c4   : > { %v7919_v26 = vadd.f32 %v5239_v27, %v1703_v48  ;;  %v5242_v0 = vadd.f32 %v5241_v8, %v5240_v23 }
 0x1c5   : > { %5985 = vmatmul.mubr.bf16.gmra.mrb[116].mxu1 %v7744_v29 }
 0x1c6   : > { %6004 = vmatprep.mubr.msk.bf16.mxu1 %vm6789_vm0, %v8834_v46  ;;  %v7922_v34 = vadd.f32 %v5242_v0, %v1706_v41 }
 0x1c7   : > { %2194 = vmatmul.mubr.bf16.gmra.mrb[116].mxu0 %v7740_v19 }
 0x1c8   : > { %v1711_v16 = vpop.f32.mrb[12].mxu1  ;;  %2607 = vmatprep.mubr.bf16.mxu0 %v7769_v49  ;;  %v5243_v57 = vpop.f32.mrb[12].mxu0 }
 0x1c9   : > { %v5866_v12 = vpop.f32.mrb[13].mxu1  ;;  %v5244_v32 = vpop.f32.mrb[13].mxu0 }
 0x1ca   : > { %v1714_v44 = vpop.f32.mrb[14].mxu1  ;;  %v5245_v37 = vadd.f32 %v5244_v32, %v5243_v57  ;;  %v5246_v3 = vpop.f32.mrb[14].mxu0 }
 0x1cb   : > { %v5867_v20 = vpop.f32.mrb[15].mxu1  ;;  %v5247_v48 = vpop.f32.mrb[15].mxu0 }
 0x1cc   : > { %v7928_v22 = vadd.f32 %v5245_v37, %v1711_v16  ;;  %v5248_v27 = vadd.f32 %v5247_v48, %v5246_v3 }
 0x1cd   : > { %6005 = vmatmul.mubr.bf16.vlgmr.msra.gmra.mrb[120].mxu1 %v7776_v14 }
 0x1ce   : > { %6008 = vmatprep.mubr.msk.bf16.mxu1 %vm6789_vm0, %v8834_v46  ;;  %v7931_v8 = vadd.f32 %v5248_v27, %v1714_v44 }
 0x1cf   : > { %2608 = vmatmul.mubr.bf16.vlgmr.msra.gmra.mrb[120].mxu0 %v7782_v47 }
 0x1d0   : > { %v1719_v23 = vpop.f32.mrb[16].mxu1  ;;  %2615 = vmatprep.mubr.bf16.mxu0 %v7787_v53  ;;  %v5249_v14 = vpop.f32.mrb[16].mxu0 }
 0x1d1   : > { %v5870_v41 = vpop.f32.mrb[17].mxu1  ;;  %v5250_v12 = vpop.f32.mrb[17].mxu0 }
 0x1d2   : > { %v1722_v49 = vpop.f32.mrb[18].mxu1  ;;  %v5251_v20 = vadd.f32 %v5250_v12, %v5249_v14  ;;  %v5252_v57 = vpop.f32.mrb[18].mxu0 }
 0x1d3   : > { %v5871_v0 = vpop.f32.mrb[19].mxu1  ;;  %v5253_v16 = vpop.f32.mrb[19].mxu0 }
 0x1d4   : > { %v7937_v32 = vadd.f32 %v5251_v20, %v1719_v23  ;;  %v5254_v47 = vadd.f32 %v5253_v16, %v5252_v57 }
 0x1d5   : > { %6009 = vmatmul.mubr.bf16.gmra.mrb[124].mxu1 %v7795_v54 }
 0x1d6   : > { %6012 = vmatprep.mubr.msk.bf16.mxu1 %vm6789_vm0, %v8834_v46  ;;  %v7940_v3 = vadd.f32 %v5254_v47, %v1722_v49 }
 0x1d7   : > { %2616 = vmatmul.mubr.bf16.gmra.mrb[124].mxu0 %v7800_v18 }
 0x1d8   : > { %v1727_v37 = vpop.f32.mrb[20].mxu1  ;;  %2623 = vmatprep.mubr.bf16.mxu0 %v7805_v35  ;;  %v5255_v54 = vpop.f32.mrb[20].mxu0 }
 0x1d9   : > { %v5874_v44 = vpop.f32.mrb[21].mxu1  ;;  %v5256_v27 = vpop.f32.mrb[21].mxu0 }
 0x1da   : > { %v1730_v53 = vpop.f32.mrb[22].mxu1  ;;  %v5257_v41 = vadd.f32 %v5256_v27, %v5255_v54  ;;  %v5258_v0 = vpop.f32.mrb[22].mxu0 }
 0x1db   : > { %v5875_v48 = vpop.f32.mrb[23].mxu1  ;;  %v5259_v23 = vpop.f32.mrb[23].mxu0 }
 0x1dc   : > { %v7946_v14 = vadd.f32 %v5257_v41, %v1727_v37  ;;  %v5260_v18 = vadd.f32 %v5259_v23, %v5258_v0 }
 0x1dd   : > { %6013 = vmatmul.mubr.bf16.gmra.mrb[128].mxu1 %v7812_v31 }
 0x1de   : > { %6016 = vmatprep.mubr.msk.bf16.mxu1 %vm6789_vm0, %v8834_v46  ;;  %v7949_v20 = vadd.f32 %v5260_v18, %v1730_v53 }
 0x1df   : > { %2624 = vmatmul.mubr.bf16.gmra.mrb[128].mxu0 %v7817_v51 }
 0x1e0   : > { %v1735_v12 = vpop.f32.mrb[24].mxu1  ;;  %2631 = vmatprep.mubr.bf16.mxu0 %v7822_v1  ;;  %v5261_v31 = vpop.f32.mrb[24].mxu0 }
 0x1e1   : > { %v5878_v49 = vpop.f32.mrb[25].mxu1  ;;  %v5262_v16 = vpop.f32.mrb[25].mxu0 }
 0x1e2   : > { %v1738_v35 = vpop.f32.mrb[26].mxu1  ;;  %v5263_v47 = vadd.f32 %v5262_v16, %v5261_v31  ;;  %v5264_v44 = vpop.f32.mrb[26].mxu0 }
 0x1e3   : > { %v5879_v57 = vpop.f32.mrb[27].mxu1  ;;  %v5265_v37 = vpop.f32.mrb[27].mxu0 }
 0x1e4   : > { %v7955_v48 = vadd.f32 %v5263_v47, %v1735_v12  ;;  %v5266_v51 = vadd.f32 %v5265_v37, %v5264_v44 }
 0x1e5   : > { %6017 = vmatmul.mubr.bf16.gmra.mrb[132].mxu1 %v7829_v55 }
 0x1e6   : > { %6020 = vmatprep.mubr.msk.bf16.mxu1 %vm6789_vm0, %v8834_v46  ;;  %v7958_v27 = vadd.f32 %v5266_v51, %v1738_v35 }
 0x1e7   : > { %2632 = vmatmul.mubr.bf16.gmra.mrb[132].mxu0 %v7834_v17 }
 0x1e8   : > { %v1743_v54 = vpop.f32.mrb[28].mxu1  ;;  %2639 = vmatprep.mubr.bf16.mxu0 %v7839_v38  ;;  %v5267_v55 = vpop.f32.mrb[28].mxu0 }
 0x1e9   : > { %v5882_v53 = vpop.f32.mrb[29].mxu1  ;;  %v5268_v0 = vpop.f32.mrb[29].mxu0 }
 0x1ea   : > { %v1746_v1 = vpop.f32.mrb[30].mxu1  ;;  %v5269_v23 = vadd.f32 %v5268_v0, %v5267_v55  ;;  %v5270_v18 = vpop.f32.mrb[30].mxu0 }
 0x1eb   : > { %v5883_v41 = vpop.f32.mrb[31].mxu1  ;;  %v5271_v12 = vpop.f32.mrb[31].mxu0 }
 0x1ec   : > { %v7964_v49 = vadd.f32 %v5269_v23, %v1743_v54  ;;  %v5272_v17 = vadd.f32 %v5271_v12, %v5270_v18 }
 0x1ed   : > { %6021 = vmatmul.mubr.bf16.gmra.mrb[136].mxu1 %v7846_v4 }
 0x1ee   : > { %6024 = vmatprep.mubr.msk.bf16.mxu1 %vm6789_vm0, %v8834_v46  ;;  %v7967_v31 = vadd.f32 %v5272_v17, %v1746_v1 }
 0x1ef   : > { %2640 = vmatmul.mubr.bf16.gmra.mrb[136].mxu0 %v7851_v39 }
 0x1f0   : > { %v1751_v57 = vpop.f32.mrb[32].mxu1  ;;  %2647 = vmatprep.mubr.bf16.mxu0 %v7856_v7  ;;  %v5273_v4 = vpop.f32.mrb[32].mxu0 }
 0x1f1   : > { %v5886_v35 = vpop.f32.mrb[33].mxu1  ;;  %v5274_v47 = vpop.f32.mrb[33].mxu0 }
 0x1f2   : > { %v1754_v38 = vpop.f32.mrb[34].mxu1  ;;  %v5275_v44 = vadd.f32 %v5274_v47, %v5273_v4  ;;  %v5276_v37 = vpop.f32.mrb[34].mxu0 }
 0x1f3   : > { %v5887_v16 = vpop.f32.mrb[35].mxu1  ;;  %v5277_v51 = vpop.f32.mrb[35].mxu0 }
 0x1f4   : > { %v7973_v54 = vadd.f32 %v5275_v44, %v1751_v57  ;;  %v5278_v39 = vadd.f32 %v5277_v51, %v5276_v37 }
 0x1f5   : > { %6025 = vmatmul.mubr.bf16.gmra.mrb[140].mxu1 %v7863_v62 }
 0x1f6   : > { %6028 = vmatprep.mubr.msk.bf16.mxu1 %vm6789_vm0, %v8834_v46  ;;  %v7976_v41 = vadd.f32 %v5278_v39, %v1754_v38 }
 0x1f7   : > { %2648 = vmatmul.mubr.bf16.gmra.mrb[140].mxu0 %v7868_v11 }
 0x1f8   : > { %v1759_v53 = vpop.f32.mrb[36].mxu1  ;;  %2655 = vmatprep.mubr.bf16.mxu0 %v7873_v43  ;;  %v5279_v62 = vpop.f32.mrb[36].mxu0 }
 0x1f9   : > { %v5890_v1 = vpop.f32.mrb[37].mxu1  ;;  %v5280_v0 = vpop.f32.mrb[37].mxu0 }
 0x1fa   : > { %v1762_v7 = vpop.f32.mrb[38].mxu1  ;;  %v5281_v23 = vadd.f32 %v5280_v0, %v5279_v62  ;;  %v5282_v18 = vpop.f32.mrb[38].mxu0 }
 0x1fb   : > { %v5891_v55 = vpop.f32.mrb[39].mxu1  ;;  %v5283_v12 = vpop.f32.mrb[39].mxu0 }
 0x1fc   : > { %v7982_v17 = vadd.f32 %v5281_v23, %v1759_v53  ;;  %v5284_v11 = vadd.f32 %v5283_v12, %v5282_v18 }
 0x1fd   : > { %6029 = vmatmul.mubr.bf16.gmra.mrb[144].mxu1 %v7682_v61 }
 0x1fe   : > { %6032 = vmatprep.mubr.msk.bf16.mxu1 %vm6789_vm0, %v8834_v46  ;;  %v7985_v38 = vadd.f32 %v5284_v11, %v1762_v7  ;;  %v8003_v11 = vld [vmem:[%s7066_s20 + $0xb0] sm:$0xff] }
 0x1ff   : > { %2656 = vmatmul.mubr.bf16.gmra.mrb[144].mxu0 %v7881_v15 }
 0x200   : > { %v1767_v57 = vpop.f32.mrb[40].mxu1  ;;  %2663 = vmatprep.mubr.bf16.mxu0 %v7686_v60  ;;  %v5285_v61 = vpop.f32.mrb[40].mxu0 }
 0x201   : > { %v5894_v35 = vpop.f32.mrb[41].mxu1  ;;  %v5286_v4 = vpop.f32.mrb[41].mxu0 }
 0x202   : > { %v1770_v43 = vpop.f32.mrb[42].mxu1  ;;  %v5287_v47 = vadd.f32 %v5286_v4, %v5285_v61  ;;  %v5288_v44 = vpop.f32.mrb[42].mxu0  ;;  %v6445_v4 = vld [vmem:[#allocation7 + $0x100] sm:$0xff]  }
 0x203   : > { %v5895_v16 = vpop.f32.mrb[43].mxu1  ;;  %v5289_v37 = vpop.f32.mrb[43].mxu0  ;;  %5596 = vmatprep.subr.bf16.mxu0 %v6445_v4 }
 0x204   : > { %v7991_v51 = vadd.f32 %v5287_v47, %v1767_v57  ;;  %v5290_v15 = vadd.f32 %v5289_v37, %v5288_v44  ;;  %v523_v16 = vshll.u32 %v8003_v11, 16  ;;  %v6446_v47 = vld [vmem:[#allocation7 + $0x140] sm:$0xff]  }
 0x205   : > { %6033 = vmatmul.mubr.bf16.gmra.mrb[148].mxu1 %v7694_v40  ;;  %v6447_v44 = vld [vmem:[#allocation7 + $0xc0] sm:$0xff]   ;;  %6064 = vmatprep.subr.bf16.mxu1 %v6446_v47 }
 0x206   : > { %6036 = vmatprep.mubr.msk.bf16.mxu1 %vm6789_vm0, %v8834_v46  ;;  %v7994_v60 = vadd.f32 %v5290_v15, %v1770_v43  ;;  %v8010_v43 = vld [vmem:[%s7066_s20 + $0xb8] sm:$0xff]  ;;  %5597 = vmatpush3.bf16.msra.mxu0 %v6447_v44 }
 0x207   : > { %2664 = vmatmul.mubr.bf16.gmra.mrb[148].mxu0 %v7690_v56  ;;  %6065 = vmatpush3.bf16.msra.mxu1 %v6446_v47  ;;  %v532_v47 = vshrl.u32 %v8010_v43, 16 }
 0x208   : > { %v1775_v39 = vpop.f32.mrb[44].mxu1  ;;  %2671 = vmatprep.mubr.bf16.mxu0 %v7698_v42  ;;  %v5291_v7 = vpop.f32.mrb[44].mxu0 }
 0x209   : > { %v5898_v53 = vpop.f32.mrb[45].mxu1  ;;  %v5292_v55 = vpop.f32.mrb[45].mxu0 }
 0x20a   : > { %v1778_v1 = vpop.f32.mrb[46].mxu1  ;;  %v5293_v62 = vadd.f32 %v5292_v55, %v5291_v7  ;;  %v5294_v0 = vpop.f32.mrb[46].mxu0  ;;  %v525_v53 = vrot.slane %v523_v16, 1 }
 0x20b   : > { %v5899_v40 = vpop.f32.mrb[47].mxu1  ;;  %v5295_v23 = vpop.f32.mrb[47].mxu0 }
 0x20c   : > { %v8000_v56 = vadd.f32 %v5293_v62, %v1775_v39  ;;  %v5296_v18 = vadd.f32 %v5295_v23, %v5294_v0 }
 0x20d   : > { %6037 = vmatmul.mubr.bf16.gmra.mrb[152].mxu1 %v7706_v36 }
 0x20e   : > { %6040 = vmatprep.mubr.msk.bf16.mxu1 %vm6789_vm0, %v8834_v46  ;;  %v8006_v57 = vadd.f32 %v5296_v18, %v1778_v1  ;;  %v528_v1 = vshll.u32 %v8010_v43, 16 }
 0x20f   : > { %2672 = vmatmul.mubr.bf16.gmra.mrb[152].mxu0 %v7702_v9 }
 0x210   : > { %v1783_v12 = vpop.f32.mrb[48].mxu1  ;;  %2679 = vmatprep.mubr.bf16.mxu0 %v7712_v28  ;;  %v5297_v61 = vpop.f32.mrb[48].mxu0  ;;  %v521_v28 = vshrl.u32 %v8003_v11, 16 }
 0x211   : > { %v5902_v42 = vpop.f32.mrb[49].mxu1  ;;  %v5298_v37 = vpop.f32.mrb[49].mxu0 }
 0x212   : > { %v1786_v35 = vpop.f32.mrb[50].mxu1  ;;  %v5299_v15 = vadd.f32 %v5298_v37, %v5297_v61  ;;  %v5300_v9 = vpop.f32.mrb[50].mxu0  ;;  %v526_v18 = vor.u32 %v525_v53, %v521_v28  ;;  %v530_v42 = vrot.slane %v528_v1, 1 }
 0x213   : > { %v5903_v36 = vpop.f32.mrb[51].mxu1  ;;  %v5301_v39 = vpop.f32.mrb[51].mxu0 }
 0x214   : > { %v8018_v40 = vadd.f32 %v5299_v15, %v1783_v12  ;;  %v5302_v7 = vadd.f32 %v5301_v39, %v5300_v9 }
 0x215   : > { %6041 = vmatmul.mubr.bf16.gmra.mrb[156].mxu1 %v7720_v33 }
 0x216   : > { %6044 = vmatprep.mubr.msk.bf16.mxu1 %vm6789_vm0, %v8834_v46  ;;  %v8021_v62 = vadd.f32 %v5302_v7, %v1786_v35  ;;  %v8029_v35 = vrot.slane %v8010_v43, 1  ;;  %v6448_v7 = vld [vmem:[#allocation7 + $0x108] sm:$0xff]  }
 0x217   : > { %2680 = vmatmul.mubr.bf16.gmra.mrb[156].mxu0 %v7716_v30  ;;  %v593_v30 = vrot.slane %v8003_v11, 1  ;;  %5598 = vmatprep.subr.bf16.mxu0 %v6448_v7 }
 0x218   : > { %v1791_v55 = vpop.f32.mrb[52].mxu1  ;;  %2687 = vmatprep.mubr.bf16.mxu0 %v7724_v5  ;;  %v5303_v36 = vpop.f32.mrb[52].mxu0  ;;  %v531_v5 = vsel %vm354_vm4, %v526_v18, %v530_v42 }
 0x219   : > { %v5906_v33 = vpop.f32.mrb[53].mxu1  ;;  %v5304_v16 = vpop.f32.mrb[53].mxu0  ;;  %v4840_v28 = vcombine.low %v8003_v11, %v531_v5  ;;  %v4842_v53 = vcombine.high %v8003_v11, %v531_v5  ;;  %v595_v1 = vsel %vm559_vm3, %v593_v30, %v8029_v35 }
 0x21a   : > { %v1794_v0 = vpop.f32.mrb[54].mxu1  ;;  %v5305_v12 = vadd.f32 %v5304_v16, %v5303_v36  ;;  %v5306_v61 = vpop.f32.mrb[54].mxu0  ;;  %v4841_v36 = vcombine.low %v595_v1, %v595_v1  ;;  %v4843_v30 = vcombine.high %v595_v1, %v595_v1 }
 0x21b   : > { %v5907_v23 = vpop.f32.mrb[55].mxu1  ;;  %v5307_v4 = vpop.f32.mrb[55].mxu0 }
 0x21c   : > { %v8033_v44 = vadd.f32 %v5305_v12, %v1791_v55  ;;  %v5308_v37 = vadd.f32 %v5307_v4, %v5306_v61  ;;  %v6449_v55 = vld [vmem:[#allocation7 + $0x148] sm:$0xff]   ;;  %v534_v23 = vor.u32 %v532_v47, %v530_v42  ;;  %v4870_v12 = vrot.slane %v4840_v28, 11 }
 0x21d   : > { %6045 = vmatmul.mubr.bf16.gmra.mrb[160].mxu1 %v7732_v58  ;;  %6066 = vmatprep.subr.bf16.mxu1 %v6449_v55  ;;  %v1061_v61 = vrot.slane %v4842_v53, 7  ;;  %v1065_v1 = vrot.slane %v4843_v30, 7 }
 0x21e   : > { %6048 = vmatprep.mubr.msk.bf16.mxu1 %vm6789_vm0, %v8834_v46  ;;  %v8036_v9 = vadd.f32 %v5308_v37, %v1794_v0  ;;  %v4844_v4 = vcombine.low %v8010_v43, %v534_v23  ;;  %6067 = vmatpush3.bf16.msra.mxu1 %v6449_v55 }
 0x21f   : > { %2688 = vmatmul.mubr.bf16.gmra.mrb[160].mxu0 %v7728_v25  ;;  %v6450_v25 = vld [vmem:[#allocation7 + $0xc8] sm:$0xff]   ;;  %v1062_v53 = vsel %vm7095_vm5, %v4870_v12, %v1061_v61  ;;  %v1067_v30 = vrot.slane %v1061_v61, 4  ;;  %v6451_v61 = vld [vmem:[#allocation7 + $0x110] sm:$0xff]  }
 0x220   : > { %v1799_v15 = vpop.f32.mrb[56].mxu1  ;;  %2695 = vmatprep.mubr.bf16.mxu0 %v7736_v63  ;;  %v5309_v18 = vpop.f32.mrb[56].mxu0  ;;  %v5011_v63 = vcombine.high %v7617_v21, %v7647_v2  ;;  %5599 = vmatpush3.bf16.msra.mxu0 %v6450_v25  ;;  %v4846_v25 = vcombine.high %v8010_v43, %v534_v23  ;;  %v4847_v43 = vcombine.high %v8029_v35, %v8029_v35 }
 0x221   : > { %v5910_v58 = vpop.f32.mrb[57].mxu1  ;;  %v5310_v0 = vpop.f32.mrb[57].mxu0  ;;  %5600 = vmatprep.subr.bf16.mxu0 %v6451_v61 }
 0x222   : > { %v1802_v39 = vpop.f32.mrb[58].mxu1  ;;  %v5311_v16 = vadd.f32 %v5310_v0, %v5309_v18  ;;  %v5312_v11 = vpop.f32.mrb[58].mxu0  ;;  %v8861_v58 = vld [vmem:[#allocation53_spill] sm:$0xff] }
 0x223   : > { %v5911_v33 = vpop.f32.mrb[59].mxu1  ;;  %v5313_v42 = vpop.f32.mrb[59].mxu0  ;;  %v5012_v7 = vcombine.low %v8861_v58, %v7662_v24  ;;  %v5010_v24 = vcombine.low %v7617_v21, %v7647_v2 }
 0x224   : > { %v8049_v5 = vadd.f32 %v5311_v16, %v1799_v15  ;;  %v4871_v33 = vrot.slane %v4841_v36, 11  ;;  %v4845_v15 = vcombine.low %v8029_v35, %v8029_v35 }
 0x225   : > { %6049 = vmatmul.mubr.bf16.gmra.mrb[164].mxu1 %v7744_v29  ;;  %v5314_v29 = vadd.f32 %v5313_v42, %v5312_v11 }
 0x226   : > { %6052 = vmatprep.mubr.msk.bf16.mxu1 %vm6789_vm0, %v8834_v46  ;;  %v1066_v11 = vsel %vm7095_vm5, %v4871_v33, %v1065_v1  ;;  %v1071_v23 = vrot.slane %v4845_v15, 7  ;;  %v1077_v15 = vrot.slane %v4847_v43, 7 }
 0x227   : > { %2696 = vmatmul.mubr.bf16.gmra.mrb[164].mxu0 %v7740_v19  ;;  %v8054_v18 = vadd.f32 %v5314_v29, %v1802_v39  ;;  %v1068_v19 = vrot.slane %v4844_v4, 7  ;;  %v5014_v39 = vcombine.high %v7651_v52, %v1062_v53  ;;  %v1074_v4 = vrot.slane %v4846_v25, 7 }
 0x228   : > { %v2236_v47 = vpop.f32.mrb[60].mxu1  ;;  %2703 = vmatprep.mubr.bf16.mxu0 %v5011_v63  ;;  %v5354_v0 = vpop.f32.mrb[60].mxu0  ;;  %v5015_v58 = vcombine.low %v7666_v50, %v1066_v11  ;;  %v1076_v35 = vrot.slane %v1071_v23, 4  ;;  %v6454_v11 = vld [vmem:[#allocation7 + $0x118] sm:$0xff]  }
 0x229   : > { %v5930_v37 = vpop.f32.mrb[61].mxu1  ;;  %v5355_v16 = vpop.f32.mrb[61].mxu0  ;;  %v1073_v42 = vrot.slane %v1068_v19, 4 }
 0x22a   : > { %v2239_v28 = vpop.f32.mrb[62].mxu1  ;;  %v5356_v63 = vadd.f32 %v5355_v16, %v5354_v0  ;;  %v5357_v36 = vpop.f32.mrb[62].mxu0 }
 0x22b   : > { %v5931_v55 = vpop.f32.mrb[63].mxu1  ;;  %v5358_v12 = vpop.f32.mrb[63].mxu0  ;;  %v1075_v25 = vsel %vm7095_vm5, %v1073_v42, %v1074_v4 }
 0x22c   : > { %v2084_v21 = vadd.f32 %v5356_v63, %v7901_v59  ;;  %v5359_v2 = vadd.f32 %v5358_v12, %v5357_v36  ;;  %v1069_v59 = vsel %vm7095_vm5, %v1067_v30, %v1068_v19  ;;  %v6455_v12 = vld [vmem:[#allocation7 + $0xd8] sm:$0xff]  }
 0x22d   : > { %6053 = vmatmul.mubr.bf16.gmra.mrb[168].mxu1 %v5012_v7  ;;  %v1070_v7 = vrot.slane %v1065_v1, 4  ;;  %v5017_v36 = vcombine.high %v1069_v59, %v1075_v25 }
 0x22e   : > { %6056 = vmatprep.mubr.msk.bf16.mxu1 %vm6789_vm0, %v8834_v46  ;;  %v8072_v55 = vadd.f32 %v2236_v47, %v2084_v21  ;;  %v2087_v33 = vadd.f32 %v5359_v2, %v7904_v10  ;;  %v5013_v10 = vcombine.low %v7651_v52, %v1062_v53 }
 0x22f   : > { %2704 = vmatmul.mubr.bf16.gmra.mrb[168].mxu0 %v5010_v24  ;;  %v6453_v24 = vld [vmem:[#allocation7 + $0xd0] sm:$0xff]   ;;  %v1072_v19 = vsel %vm7095_vm5, %v1070_v7, %v1071_v23 }
 0x230   : > { %v2244_v29 = vpop.f32.mrb[64].mxu1  ;;  %2711 = vmatprep.mubr.bf16.mxu0 %v5014_v39  ;;  %v8079_v63 = vadd.f32 %v2239_v28, %v2087_v33  ;;  %v5360_v50 = vpop.f32.mrb[64].mxu0  ;;  %5601 = vmatpush3.bf16.msra.mxu0 %v6453_v24  ;;  %v1078_v28 = vsel %vm7095_vm5, %v1076_v35, %v1077_v15  ;;  %v6452_v23 = vld [vmem:[#allocation7 + $0x150] sm:$0xff]   ;;  %v5016_v35 = vcombine.low %v1069_v59, %v1075_v25 }
 0x231   : > { %v5934_v37 = vpop.f32.mrb[65].mxu1  ;;  %v5361_v47 = vpop.f32.mrb[65].mxu0  ;;  %5602 = vmatprep.subr.bf16.mxu0 %v6454_v11  ;;  %v5018_v4 = vcombine.low %v1072_v19, %v1078_v28  ;;  %6068 = vmatprep.subr.bf16.mxu1 %v6452_v23  ;;  %v6462_v19 = vld [vmem:[#allocation7 + $0xf0] sm:$0xff]  }
 0x232   : > { %v2247_v0 = vpop.f32.mrb[66].mxu1  ;;  %v5362_v1 = vadd.f32 %v5361_v47, %v5360_v50  ;;  %v5363_v39 = vpop.f32.mrb[66].mxu0  ;;  %6069 = vmatpush3.bf16.msra.mxu1 %v6452_v23 }
 0x233   : > { %v5935_v16 = vpop.f32.mrb[67].mxu1  ;;  %v5364_v43 = vpop.f32.mrb[67].mxu0 }
 0x234   : > { %v2092_v30 = vadd.f32 %v5362_v1, %v7910_v13  ;;  %v5365_v52 = vadd.f32 %v5364_v43, %v5363_v39  ;;  %5603 = vmatpush3.bf16.msra.mxu0 %v6455_v12  ;;  %v6460_v16 = vld [vmem:[#allocation7 + $0xe8] sm:$0xff]   ;;  %v6461_v39 = vld [vmem:[#allocation7 + $0x130] sm:$0xff]   ;;  %v6463_v43 = vld [vmem:[#allocation7 + $0x160] sm:$0xff]  }
 0x235   : > { %6057 = vmatmul.mubr.bf16.gmra.mrb[172].mxu1 %v5015_v58  ;;  %v6458_v58 = vld [vmem:[#allocation7 + $0xe0] sm:$0xff]   ;;  %5604 = vmatprep.subr.bf16.mxu0 %v6456_v45 }
 0x236   : > { %6060 = vmatprep.mubr.msk.bf16.mxu1 %vm6789_vm0, %v8834_v46  ;;  %v8089_v21 = vadd.f32 %v2244_v29, %v2092_v30  ;;  %v2095_v46 = vadd.f32 %v5365_v52, %v7913_v6  ;;  %v6459_v6 = vld [vmem:[#allocation7 + $0x128] sm:$0xff]   ;;  %v6464_v52 = vld [vmem:[#allocation7 + $0x138] sm:$0xff]  }
 0x237   : > { %2712 = vmatmul.mubr.bf16.gmra.mrb[172].mxu0 %v5013_v10  ;;  %v6457_v10 = vld [vmem:[#allocation7 + $0x158] sm:$0xff]  }
 0x238   : > { %v2252_v53 = vpop.f32.mrb[68].mxu1  ;;  %2719 = vmatprep.mubr.bf16.mxu0 %v5017_v36  ;;  %v8092_v7 = vadd.f32 %v2247_v0, %v2095_v46  ;;  %5605 = vmatpush3.bf16.msra.mxu0 %v6458_v58  ;;  %v6466_v58 = vld [vmem:[#allocation7 + $0x168] sm:$0xff]  }
 0x239   : > { %v5938_v42 = vpop.f32.mrb[69].mxu1  ;;  %5606 = vmatprep.subr.bf16.mxu0 %v6459_v6  ;;  %6070 = vmatprep.subr.bf16.mxu1 %v6457_v10  ;;  %v6467_v6 = vld [vmem:[#allocation7 + $0x170] sm:$0xff]  }
 0x23a   : > { %v2255_v2 = vpop.f32.mrb[70].mxu1  ;;  %v5366_v13 = vpop.f32.mrb[68].mxu0  ;;  %6071 = vmatpush3.bf16.msra.mxu1 %v6457_v10 }
 0x23b   : > { %v5939_v37 = vpop.f32.mrb[71].mxu1  ;;  %v5367_v33 = vpop.f32.mrb[69].mxu0  ;;  %6072 = vmatprep.subr.bf16.mxu1 %v6463_v43 }
 0x23c   : > { %v5368_v15 = vadd.f32 %v5367_v33, %v5366_v13  ;;  %v5369_v29 = vpop.f32.mrb[70].mxu0  ;;  %5607 = vmatpush3.bf16.msra.mxu0 %v6460_v16 }
 0x23d   : > { %6061 = vmatmul.mubr.bf16.gmra.mrb[176].mxu1 %v5018_v4  ;;  %v5370_v61 = vpop.f32.mrb[71].mxu0  ;;  %5608 = vmatprep.subr.bf16.mxu0 %v6461_v39 }
 0x23e   : > { %v2100_v24 = vadd.f32 %v5368_v15, %v7919_v26  ;;  %v5371_v50 = vadd.f32 %v5370_v61, %v5369_v29  ;;  %6073 = vmatpush3.bf16.msra.mxu1 %v6463_v43 }
 0x23f   : > { %2720 = vmatmul.mubr.bf16.gmra.mrb[176].mxu0 %v5016_v35  ;;  %6074 = vmatprep.subr.bf16.mxu1 %v6466_v58 }
 0x240   : > { %v2260_v47 = vpop.f32.mrb[72].mxu1  ;;  %v8095_v1 = vadd.f32 %v2252_v53, %v2100_v24  ;;  %v2103_v59 = vadd.f32 %v5371_v50, %v7922_v34  ;;  %5609 = vmatpush3.bf16.msra.mxu0 %v6462_v19  ;;  %v6465_v34 = vld [vmem:[#allocation7 + $0xf8] sm:$0xff]  }
 0x241   : > { %v5942_v0 = vpop.f32.mrb[73].mxu1  ;;  %5610 = vmatprep.subr.bf16.mxu0 %v6464_v52 }
 0x242   : > { %v2263_v25 = vpop.f32.mrb[74].mxu1  ;;  %v8098_v28 = vadd.f32 %v2255_v2, %v2103_v59  ;;  %v5372_v11 = vpop.f32.mrb[72].mxu0  ;;  %6075 = vmatpush3.bf16.msra.mxu1 %v6466_v58  ;;  %v6468_v59 = vld [vmem:[#allocation7 + $0x178] sm:$0xff]  }
 0x243   : > { %v5943_v36 = vpop.f32.mrb[75].mxu1  ;;  %v5373_v26 = vpop.f32.mrb[73].mxu0  ;;  %6076 = vmatprep.subr.bf16.mxu1 %v6467_v6 }
 0x244   : > { %v5374_v12 = vadd.f32 %v5373_v26, %v5372_v11  ;;  %v5375_v30 = vpop.f32.mrb[74].mxu0  ;;  %5611 = vmatpush3.bf16.msra.mxu0 %v6465_v34 }
 0x245   : > { %v5376_v53 = vpop.f32.mrb[75].mxu0 }
 0x246   : > { %v2108_v42 = vadd.f32 %v5374_v12, %v7928_v22  ;;  %v5377_v4 = vadd.f32 %v5376_v53, %v5375_v30  ;;  %6077 = vmatpush3.bf16.msra.mxu1 %v6467_v6 }
 0x247   : > { %6078 = vmatprep.subr.bf16.mxu1 %v6468_v59 }
 0x248   : > { %v2268_v46 = vpop.f32.mrb[76].mxu1  ;;  %v8101_v23 = vadd.f32 %v2260_v47, %v2108_v42  ;;  %v2111_v45 = vadd.f32 %v5377_v4, %v7931_v8 }
 0x249   : > { %v5946_v2 = vpop.f32.mrb[77].mxu1 }
 0x24a   : > { %v2271_v37 = vpop.f32.mrb[78].mxu1  ;;  %v8104_v33 = vadd.f32 %v2263_v25, %v2111_v45  ;;  %v5378_v35 = vpop.f32.mrb[76].mxu0  ;;  %6079 = vmatpush3.bf16.msra.mxu1 %v6468_v59 }
 0x24b   : > { %v5947_v13 = vpop.f32.mrb[79].mxu1  ;;  %v5379_v15 = vpop.f32.mrb[77].mxu0 }
 0x24c   : > { %v5380_v22 = vadd.f32 %v5379_v15, %v5378_v35  ;;  %v5381_v29 = vpop.f32.mrb[78].mxu0 }
 0x24d   : > { %v5382_v61 = vpop.f32.mrb[79].mxu0 }
 0x24e   : > { %v2116_v16 = vadd.f32 %v5380_v22, %v7937_v32  ;;  %v5383_v24 = vadd.f32 %v5382_v61, %v5381_v29 }
 0x250   : > { %v2276_v50 = vpop.f32.mrb[80].mxu1  ;;  %v8107_v47 = vadd.f32 %v2268_v46, %v2116_v16  ;;  %v2119_v0 = vadd.f32 %v5383_v24, %v7940_v3 }
 0x251   : > { %v5950_v8 = vpop.f32.mrb[81].mxu1 }
 0x252   : > { %v2279_v10 = vpop.f32.mrb[82].mxu1  ;;  %v8110_v39 = vadd.f32 %v2271_v37, %v2119_v0  ;;  %v5384_v36 = vpop.f32.mrb[80].mxu0 }
 0x253   : > { %v5951_v25 = vpop.f32.mrb[83].mxu1  ;;  %v5385_v19 = vpop.f32.mrb[81].mxu0 }
 0x254   : > { %v5386_v11 = vadd.f32 %v5385_v19, %v5384_v36  ;;  %v5387_v32 = vpop.f32.mrb[82].mxu0 }
 0x255   : > { %v5388_v26 = vpop.f32.mrb[83].mxu0 }
 0x256   : > { %v2124_v43 = vadd.f32 %v5386_v11, %v7946_v14  ;;  %v5389_v12 = vadd.f32 %v5388_v26, %v5387_v32 }
 0x258   : > { %v2284_v30 = vpop.f32.mrb[84].mxu1  ;;  %v8113_v53 = vadd.f32 %v2276_v50, %v2124_v43  ;;  %v2127_v3 = vadd.f32 %v5389_v12, %v7949_v20 }
 0x259   : > { %v5954_v52 = vpop.f32.mrb[85].mxu1 }
 0x25a   : > { %v2287_v34 = vpop.f32.mrb[86].mxu1  ;;  %v8116_v4 = vadd.f32 %v2279_v10, %v2127_v3  ;;  %v5390_v46 = vpop.f32.mrb[84].mxu0 }
 0x25b   : > { %v5955_v42 = vpop.f32.mrb[87].mxu1  ;;  %v5391_v2 = vpop.f32.mrb[85].mxu0 }
 0x25c   : > { %v5392_v45 = vadd.f32 %v5391_v2, %v5390_v46  ;;  %v5393_v37 = vpop.f32.mrb[86].mxu0 }
 0x25d   : > { %v5394_v58 = vpop.f32.mrb[87].mxu0 }
 0x25e   : > { %v2132_v13 = vadd.f32 %v5392_v45, %v7955_v48  ;;  %v5395_v35 = vadd.f32 %v5394_v58, %v5393_v37 }
 0x260   : > { %v2292_v14 = vpop.f32.mrb[88].mxu1  ;;  %v8119_v22 = vadd.f32 %v2284_v30, %v2132_v13  ;;  %v2135_v29 = vadd.f32 %v5395_v35, %v7958_v27 }
 0x261   : > { %v5958_v15 = vpop.f32.mrb[89].mxu1 }
 0x262   : > { %v2295_v6 = vpop.f32.mrb[90].mxu1  ;;  %v8122_v61 = vadd.f32 %v2287_v34, %v2135_v29  ;;  %v5396_v16 = vpop.f32.mrb[88].mxu0 }
 0x263   : > { %v5959_v20 = vpop.f32.mrb[91].mxu1  ;;  %v5397_v24 = vpop.f32.mrb[89].mxu0 }
 0x264   : > { %v5398_v50 = vadd.f32 %v5397_v24, %v5396_v16  ;;  %v5399_v8 = vpop.f32.mrb[90].mxu0 }
 0x265   : > { %v5400_v0 = vpop.f32.mrb[91].mxu0 }
 0x266   : > { %v2140_v10 = vadd.f32 %v5398_v50, %v7964_v49  ;;  %v5401_v59 = vadd.f32 %v5400_v0, %v5399_v8 }
 0x268   : > { %v2300_v48 = vpop.f32.mrb[92].mxu1  ;;  %v8125_v36 = vadd.f32 %v2292_v14, %v2140_v10  ;;  %v2143_v19 = vadd.f32 %v5401_v59, %v7967_v31 }
 0x269   : > { %v5962_v25 = vpop.f32.mrb[93].mxu1 }
 0x26a   : > { %v2303_v11 = vpop.f32.mrb[94].mxu1  ;;  %v8128_v32 = vadd.f32 %v2295_v6, %v2143_v19  ;;  %v5402_v26 = vpop.f32.mrb[92].mxu0 }
 0x26b   : > { %v5963_v27 = vpop.f32.mrb[95].mxu1  ;;  %v5403_v43 = vpop.f32.mrb[93].mxu0 }
 0x26c   : > { %v5404_v12 = vadd.f32 %v5403_v43, %v5402_v26  ;;  %v5405_v30 = vpop.f32.mrb[94].mxu0 }
 0x26d   : > { %v5406_v52 = vpop.f32.mrb[95].mxu0 }
 0x26e   : > { %v2148_v3 = vadd.f32 %v5404_v12, %v7973_v54  ;;  %v5407_v34 = vadd.f32 %v5406_v52, %v5405_v30 }
 0x270   : > { %v2308_v49 = vpop.f32.mrb[96].mxu1  ;;  %v8131_v46 = vadd.f32 %v2300_v48, %v2148_v3  ;;  %v2151_v2 = vadd.f32 %v5407_v34, %v7976_v41 }
 0x271   : > { %v5966_v42 = vpop.f32.mrb[97].mxu1 }
 0x272   : > { %v2311_v45 = vpop.f32.mrb[98].mxu1  ;;  %v8134_v37 = vadd.f32 %v2303_v11, %v2151_v2  ;;  %v5408_v58 = vpop.f32.mrb[96].mxu0  ;;  %v6469_v42 = vld [vmem:[#allocation7 + $0x40] sm:$0xff]  }
 0x273   : > { %v5967_v31 = vpop.f32.mrb[99].mxu1  ;;  %v5409_v13 = vpop.f32.mrb[97].mxu0  ;;  %5676 = vmatprep.subr.bf16.mxu1 %v6469_v42 }
 0x274   : > { %v5410_v35 = vadd.f32 %v5409_v13, %v5408_v58  ;;  %v5411_v14 = vpop.f32.mrb[98].mxu0  ;;  %v6470_v13 = vld [vmem:[#allocation7 + $0x1c0] sm:$0xff]  }
 0x275   : > { %v5412_v15 = vpop.f32.mrb[99].mxu0  ;;  %5756 = vmatprep.subr.bf16.mxu0 %v6470_v13 }
 0x276   : > { %v2156_v29 = vadd.f32 %v5410_v35, %v7982_v17  ;;  %v5413_v6 = vadd.f32 %v5412_v15, %v5411_v14 }
 0x278   : > { %v2316_v54 = vpop.f32.mrb[100].mxu1  ;;  %v8137_v16 = vadd.f32 %v2308_v49, %v2156_v29  ;;  %v2159_v24 = vadd.f32 %v5413_v6, %v7985_v38 }
 0x279   : > { %v5970_v20 = vpop.f32.mrb[101].mxu1 }
 0x27a   : > { %v2319_v50 = vpop.f32.mrb[102].mxu1  ;;  %v8140_v8 = vadd.f32 %v2311_v45, %v2159_v24  ;;  %v5414_v0 = vpop.f32.mrb[100].mxu0 }
 0x27b   : > { %v5971_v41 = vpop.f32.mrb[103].mxu1  ;;  %v5415_v10 = vpop.f32.mrb[101].mxu0 }
 0x27c   : > { %v5416_v59 = vadd.f32 %v5415_v10, %v5414_v0  ;;  %v5417_v48 = vpop.f32.mrb[102].mxu0 }
 0x27d   : > { %v5418_v25 = vpop.f32.mrb[103].mxu0 }
 0x27e   : > { %v2164_v19 = vadd.f32 %v5416_v59, %v7991_v51  ;;  %v5419_v11 = vadd.f32 %v5418_v25, %v5417_v48 }
 0x280   : > { %v2324_v17 = vpop.f32.mrb[104].mxu1  ;;  %v8143_v26 = vadd.f32 %v2316_v54, %v2164_v19  ;;  %v2167_v43 = vadd.f32 %v5419_v11, %v7994_v60 }
 0x281   : > { %v5974_v27 = vpop.f32.mrb[105].mxu1 }
 0x282   : > { %v2327_v12 = vpop.f32.mrb[106].mxu1  ;;  %v8146_v30 = vadd.f32 %v2319_v50, %v2167_v43  ;;  %v5420_v52 = vpop.f32.mrb[104].mxu0 }
 0x283   : > { %v5975_v38 = vpop.f32.mrb[107].mxu1  ;;  %v5421_v3 = vpop.f32.mrb[105].mxu0 }
 0x284   : > { %v5422_v34 = vadd.f32 %v5421_v3, %v5420_v52  ;;  %v5423_v49 = vpop.f32.mrb[106].mxu0 }
 0x285   : > { %v5424_v2 = vpop.f32.mrb[107].mxu0 }
 0x286   : > { %v2172_v45 = vadd.f32 %v5422_v34, %v8000_v56  ;;  %v5425_v51 = vadd.f32 %v5424_v2, %v5423_v49 }
 0x288   : > { %v2332_v31 = vpop.f32.mrb[108].mxu1  ;;  %v8149_v35 = vadd.f32 %v2324_v17, %v2172_v45  ;;  %v2175_v60 = vadd.f32 %v5425_v51, %v8006_v57 }
 0x289   : > { %v5978_v58 = vpop.f32.mrb[109].mxu1 }
 0x28a   : > { %v2335_v14 = vpop.f32.mrb[110].mxu1  ;;  %v8152_v29 = vadd.f32 %v2327_v12, %v2175_v60  ;;  %v5426_v6 = vpop.f32.mrb[108].mxu0 }
 0x28b   : > { %v5979_v15 = vpop.f32.mrb[111].mxu1  ;;  %v5427_v54 = vpop.f32.mrb[109].mxu0 }
 0x28c   : > { %v5428_v20 = vadd.f32 %v5427_v54, %v5426_v6  ;;  %v5429_v24 = vpop.f32.mrb[110].mxu0 }
 0x28d   : > { %v5430_v50 = vpop.f32.mrb[111].mxu0 }
 0x28e   : > { %v2180_v56 = vadd.f32 %v5428_v20, %v8018_v40  ;;  %v5431_v41 = vadd.f32 %v5430_v50, %v5429_v24 }
 0x290   : > { %v2340_v0 = vpop.f32.mrb[112].mxu1  ;;  %v8155_v59 = vadd.f32 %v2332_v31, %v2180_v56  ;;  %v2183_v48 = vadd.f32 %v5431_v41, %v8021_v62 }
 0x291   : > { %v5982_v10 = vpop.f32.mrb[113].mxu1 }
 0x292   : > { %v2343_v57 = vpop.f32.mrb[114].mxu1  ;;  %v8158_v19 = vadd.f32 %v2335_v14, %v2183_v48  ;;  %v5432_v11 = vpop.f32.mrb[112].mxu0 }
 0x293   : > { %v5983_v25 = vpop.f32.mrb[115].mxu1  ;;  %v5433_v17 = vpop.f32.mrb[113].mxu0 }
 0x294   : > { %v5434_v27 = vadd.f32 %v5433_v17, %v5432_v11  ;;  %v5435_v43 = vpop.f32.mrb[114].mxu0  ;;  %v8175_v25 = vld [vmem:[%s8726_s3] ss:$0 sm:$0xff] }
 0x295   : > { %v5436_v12 = vpop.f32.mrb[115].mxu0 }
 0x296   : > { %v2188_v38 = vadd.f32 %v5434_v27, %v8033_v44  ;;  %v5437_v52 = vadd.f32 %v5436_v12, %v5435_v43  ;;  %v8178_v43 = vld [vmem:[#allocation9] sm:$0xff] }
 0x298   : > { %v2348_v40 = vpop.f32.mrb[116].mxu1  ;;  %v8161_v34 = vadd.f32 %v2340_v0, %v2188_v38  ;;  %v2191_v49 = vadd.f32 %v5437_v52, %v8036_v9 }
 0x299   : > { %v5986_v3 = vpop.f32.mrb[117].mxu1 }
 0x29a   : > { %v2351_v42 = vpop.f32.mrb[118].mxu1  ;;  %v8164_v2 = vadd.f32 %v2343_v57, %v2191_v49  ;;  %v5438_v45 = vpop.f32.mrb[116].mxu0  ;;  %v8184_v3 = vld [vmem:[#allocation9 + $0x8] sm:$0xff] }
 0x29b   : > { %v5987_v62 = vpop.f32.mrb[119].mxu1  ;;  %v5439_v51 = vpop.f32.mrb[117].mxu0 }
 0x29c   : > { %v5440_v31 = vadd.f32 %v5439_v51, %v5438_v45  ;;  %v5441_v58 = vpop.f32.mrb[118].mxu0 }
 0x29d   : > { %v5442_v13 = vpop.f32.mrb[119].mxu0 }
 0x29e   : > { %v2196_v60 = vadd.f32 %v5440_v31, %v8049_v5  ;;  %v5443_v14 = vadd.f32 %v5442_v13, %v5441_v58 }
 0x2a0   : > { %v2762_v44 = vpop.f32.mrb[120].mxu1  ;;  %v8167_v6 = vadd.f32 %v2348_v40, %v2196_v60  ;;  %v2199_v54 = vadd.f32 %v5443_v14, %v8054_v18 }
 0x2a1   : > { %v6006_v15 = vpop.f32.mrb[121].mxu1 }
 0x2a2   : > { %v2765_v20 = vpop.f32.mrb[122].mxu1  ;;  %v8170_v24 = vadd.f32 %v2351_v42, %v2199_v54  ;;  %v5483_v50 = vpop.f32.mrb[120].mxu0 }
 0x2a3   : > { %v6007_v9 = vpop.f32.mrb[123].mxu1  ;;  %v5484_v56 = vpop.f32.mrb[121].mxu0 }
 0x2a4   : > { %v5485_v41 = vadd.f32 %v5484_v56, %v5483_v50  ;;  %v5486_v0 = vpop.f32.mrb[122].mxu0 }
 0x2a5   : > { %v5487_v10 = vpop.f32.mrb[123].mxu0 }
 0x2a6   : > { %v2763_v48 = vadd.f32 %v5485_v41, %v2762_v44  ;;  %v5488_v57 = vadd.f32 %v5487_v10, %v5486_v0 }
 0x2a8   : > { %v2770_v5 = vpop.f32.mrb[124].mxu1  ;;  %v2881_v18 = vadd.f32 %v2763_v48, %v8072_v55  ;;  %v2766_v17 = vadd.f32 %v5488_v57, %v2765_v20 }
 0x2a9   : > { %v6010_v11 = vpop.f32.mrb[125].mxu1 }
 0x2aa   : > { %v2773_v27 = vpop.f32.mrb[126].mxu1  ;;  %v2918_v38 = vadd.f32 %v8175_v25, %v2881_v18  ;;  %v2882_v52 = vadd.f32 %v2766_v17, %v8079_v63  ;;  %v5489_v40 = vpop.f32.mrb[124].mxu0  ;;  %v8189_v63 = vstv %s3011_s18 }
 0x2ab   : > { %v6011_v12 = vpop.f32.mrb[127].mxu1  ;;  %v5490_v49 = vpop.f32.mrb[125].mxu0 }
 0x2ac   : > { %v2951_v42 = vmul.f32 %v8178_v43, %v2918_v38  ;;  %v2919_v62 = vadd.f32 %v8175_v25, %v2882_v52  ;;  %v5491_v55 = vadd.f32 %v5490_v49, %v5489_v40  ;;  %v5492_v45 = vpop.f32.mrb[126].mxu0 }
 0x2ad   : > { %v5493_v51 = vpop.f32.mrb[127].mxu0 }
 0x2ae   : > { %v2981_v31 = vmax.f32 %v2951_v42, 0.0  ;;  %v2952_v58 = vmul.f32 %v8184_v3, %v2919_v62  ;;  %v2771_v13 = vadd.f32 %v5491_v55, %v2770_v5  ;;  %v5494_v60 = vadd.f32 %v5493_v51, %v5492_v45 }
 0x2b0   : > { %v2778_v14 = vpop.f32.mrb[128].mxu1  ;;  %v2982_v15 = vmax.f32 %v2952_v58, 0.0  ;;  %v8192_v54 = vadd.f32 %v2771_v13, %v8089_v21  ;;  %v2774_v20 = vadd.f32 %v5494_v60, %v2773_v27  ;;  %v3015_v56 = vmul.f32 %v8189_v63, %v2981_v31 }
 0x2b1   : > { %v6014_v44 = vpop.f32.mrb[129].mxu1 }
 0x2b2   : > { %v2781_v9 = vpop.f32.mrb[130].mxu1  ;;  %v3016_v41 = vmul.f32 %v8189_v63, %v2982_v15  ;;  %v2884_v0 = vadd.f32 %v2774_v20, %v8092_v7  ;;  %v5495_v10 = vpop.f32.mrb[128].mxu0 }
 0x2b3   : > { %v6015_v50 = vpop.f32.mrb[131].mxu1  ;;  %v5496_v48 = vpop.f32.mrb[129].mxu0 }
 0x2b4   : > { %v8197_v57 = vpack.c.bf16 %v3016_v41, %v3015_v56  ;;  %v5497_v5 = vadd.f32 %v5496_v48, %v5495_v10  ;;  %v5498_v11 = vpop.f32.mrb[130].mxu0  ;;  %v2921_v18 = vadd.f32 %v8175_v25, %v2884_v0 }
 0x2b5   : > { %v5499_v17 = vpop.f32.mrb[131].mxu0 }
 0x2b6   : > { %v2779_v21 = vadd.f32 %v5497_v5, %v2778_v14  ;;  %v5500_v12 = vadd.f32 %v5499_v17, %v5498_v11  ;;  %v2954_v42 = vmul.f32 %v8178_v43, %v2921_v18  ;;  %v8206_v14 = vld [vmem:[#allocation9 + $0x10] sm:$0xff] }
 0x2b8   : > { %v2786_v27 = vpop.f32.mrb[132].mxu1  ;;  %v2885_v52 = vadd.f32 %v2779_v21, %v8095_v1  ;;  %v2782_v40 = vadd.f32 %v5500_v12, %v2781_v9  ;;  %v2984_v1 = vmax.f32 %v2954_v42, 0.0 }
 0x2b9   : > { %v6018_v38 = vpop.f32.mrb[133].mxu1 }
 0x2ba   : > { %v2789_v49 = vpop.f32.mrb[134].mxu1  ;;  %v2922_v62 = vadd.f32 %v8175_v25, %v2885_v52  ;;  %v2886_v55 = vadd.f32 %v2782_v40, %v8098_v28  ;;  %v5501_v45 = vpop.f32.mrb[132].mxu0 }
 0x2bb   : > { %v6019_v7 = vpop.f32.mrb[135].mxu1  ;;  %v5502_v51 = vpop.f32.mrb[133].mxu0 }
 0x2bc   : > { %v2955_v31 = vmul.f32 %v8184_v3, %v2922_v62  ;;  %v2923_v58 = vadd.f32 %v8175_v25, %v2886_v55  ;;  %v5503_v13 = vadd.f32 %v5502_v51, %v5501_v45  ;;  %v5504_v60 = vpop.f32.mrb[134].mxu0 }
 0x2bd   : > { %v5505_v44 = vpop.f32.mrb[135].mxu0 }
 0x2be   : > { %v2985_v15 = vmax.f32 %v2955_v31, 0.0  ;;  %v2956_v20 = vmul.f32 %v8206_v14, %v2923_v58  ;;  %v2787_v9 = vadd.f32 %v5503_v13, %v2786_v27  ;;  %v5506_v50 = vadd.f32 %v5505_v44, %v5504_v60 }
 0x2c0   : > { %v2794_v56 = vpop.f32.mrb[136].mxu1  ;;  %v8209_v28 = vpack.c.bf16 %v2985_v15, %v2984_v1  ;;  %v2986_v0 = vmax.f32 %v2956_v20, 0.0  ;;  %v2887_v10 = vadd.f32 %v2787_v9, %v8101_v23  ;;  %v2790_v48 = vadd.f32 %v5506_v50, %v2789_v49 }
 0x2c1   : > { %v6022_v41 = vpop.f32.mrb[137].mxu1 }
 0x2c2   : > { %v2797_v5 = vpop.f32.mrb[138].mxu1  ;;  %v3025_v18 = vpack.c.bf16 %v2986_v0, %v2986_v0  ;;  %v2924_v17 = vadd.f32 %v8175_v25, %v2887_v10  ;;  %v2888_v21 = vadd.f32 %v2790_v48, %v8104_v33  ;;  %v5507_v12 = vpop.f32.mrb[136].mxu0  ;;  %v3057_v27 = vshll.u32 %v8209_v28, 16  ;;  %v6472_v10 = vld [vmem:[#allocation7 + $0x180] sm:$0xff]  }
 0x2c3   : > { %v6023_v11 = vpop.f32.mrb[139].mxu1  ;;  %v5508_v38 = vpop.f32.mrb[137].mxu0  ;;  %v3195_v49 = vrot.slane %v8209_v28, 1  ;;  %v3055_v55 = vshrl.u32 %v8209_v28, 16 }
 0x2c4   : > { %v2957_v52 = vmul.f32 %v8178_v43, %v2924_v17  ;;  %v2925_v40 = vadd.f32 %v8175_v25, %v2888_v21  ;;  %v5509_v42 = vadd.f32 %v5508_v38, %v5507_v12  ;;  %v5510_v7 = vpop.f32.mrb[138].mxu0  ;;  %v3196_v62 = vrot.slane %v3025_v18, 1  ;;  %v6475_v11 = vld [vmem:[#allocation7 + $0x1c8] sm:$0xff]  }
 0x2c5   : > { %v5511_v23 = vpop.f32.mrb[139].mxu0  ;;  %v3059_v45 = vrot.slane %v3057_v27, 1  ;;  %v3062_v51 = vshll.u32 %v3025_v18, 16 }
 0x2c6   : > { %v2958_v33 = vmul.f32 %v8184_v3, %v2925_v40  ;;  %v2795_v31 = vadd.f32 %v5509_v42, %v2794_v56  ;;  %v5512_v58 = vadd.f32 %v5511_v23, %v5510_v7  ;;  %v8221_v60 = vsel %vm559_vm3, %v3195_v49, %v3196_v62  ;;  %v6479_v62 = vld [vmem:[#allocation7 + $0x1d0] sm:$0xff]  }
 0x2c7   : > { %v3060_v1 = vor.u32 %v3059_v45, %v3055_v55  ;;  %v3064_v44 = vrot.slane %v3062_v51, 1  ;;  %v2987_v20 = vmax.f32 %v2957_v52, 0.0  ;;  %6080 = vmatprep.mubr.bf16.mxu1 %v8221_v60  ;;  %v6477_v52 = vld [vmem:[#allocation7 + $0x188] sm:$0xff]  }
 0x2c8   : > { %v2802_v13 = vpop.f32.mrb[140].mxu1  ;;  %v2988_v9 = vmax.f32 %v2958_v33, 0.0  ;;  %v2889_v50 = vadd.f32 %v2795_v31, %v8107_v47  ;;  %v2798_v41 = vadd.f32 %v5512_v58, %v2797_v5 }
 0x2c9   : > { %v6026_v15 = vpop.f32.mrb[141].mxu1  ;;  %v8226_v48 = vsel %vm354_vm4, %v3060_v1, %v3064_v44  ;;  %v6481_v1 = vld [vmem:[#allocation7 + $0x190] sm:$0xff]  }
 0x2ca   : > { %v2805_v0 = vpop.f32.mrb[142].mxu1  ;;  %v8228_v18 = vpack.c.bf16 %v2988_v9, %v2987_v20  ;;  %v2926_v17 = vadd.f32 %v8175_v25, %v2889_v50  ;;  %v2890_v21 = vadd.f32 %v2798_v41, %v8110_v39  ;;  %3505 = vmatprep.mubr.bf16.mxu0 %v8226_v48  ;;  %v5513_v12 = vpop.f32.mrb[140].mxu0  ;;  %v6483_v50 = vld [vmem:[#allocation7 + $0x1d8] sm:$0xff]  }
 0x2cb   : > { %v6027_v56 = vpop.f32.mrb[143].mxu1  ;;  %3506 = vmatmul.mubr.bf16.vlgmr.msra.gmra.mrb[180].mxu0 %v8209_v28  ;;  %v5514_v47 = vpop.f32.mrb[141].mxu0 }
 0x2cc   : > { %v2959_v5 = vmul.f32 %v8206_v14, %v2926_v17  ;;  %v5515_v38 = vadd.f32 %v5514_v47, %v5513_v12  ;;  %v5516_v27 = vpop.f32.mrb[142].mxu0  ;;  %5757 = vmatpush3.bf16.msra.mxu0 %v6472_v10  ;;  %v2927_v40 = vadd.f32 %v8175_v25, %v2890_v21  ;;  %v3069_v7 = vshll.u32 %v8228_v18, 16  ;;  %v6473_v21 = vld [vmem:[#allocation7 + $0x48] sm:$0xff]  }
 0x2cd   : > { %v5517_v42 = vpop.f32.mrb[143].mxu0  ;;  %5758 = vmatprep.subr.bf16.mxu0 %v6475_v11  ;;  %v3198_v15 = vrot.slane %v8228_v18, 1  ;;  %v3067_v17 = vshrl.u32 %v8228_v18, 16 }
 0x2ce   : > { %v2989_v39 = vmax.f32 %v2959_v5, 0.0  ;;  %v2803_v23 = vadd.f32 %v5515_v38, %v2802_v13  ;;  %v5518_v49 = vadd.f32 %v5517_v42, %v5516_v27  ;;  %v2960_v44 = vmul.f32 %v8178_v43, %v2927_v40 }
 0x2cf   : > { %v3071_v9 = vrot.slane %v3069_v7, 1 }
 0x2d0   : > { %v2810_v55 = vpop.f32.mrb[144].mxu1  ;;  %v3027_v51 = vpack.c.bf16 %v2989_v39, %v2989_v39  ;;  %v2891_v33 = vadd.f32 %v2803_v23, %v8113_v53  ;;  %v2806_v31 = vadd.f32 %v5518_v49, %v2805_v0  ;;  %5759 = vmatpush3.bf16.msra.mxu0 %v6477_v52  ;;  %v6471_v53 = vld [vmem:[#allocation7] sm:$0xff]   ;;  %v6485_v52 = vld [vmem:[#allocation7 + $0x198] sm:$0xff]   ;;  %v2990_v40 = vmax.f32 %v2960_v44, 0.0  ;;  %v6476_v44 = vld [vmem:[#allocation7 + $0x50] sm:$0xff]  }
 0x2d1   : > { %v6030_v45 = vpop.f32.mrb[145].mxu1  ;;  %5760 = vmatprep.subr.bf16.mxu0 %v6479_v62  ;;  %v3072_v42 = vor.u32 %v3071_v9, %v3067_v17  ;;  %v6487_v62 = vld [vmem:[#allocation7 + $0x1e0] sm:$0xff]   ;;  %v6478_v17 = vld [vmem:[#allocation7 + $0x10] sm:$0xff]  }
 0x2d2   : > { %v2813_v58 = vpop.f32.mrb[146].mxu1  ;;  %v3199_v41 = vrot.slane %v3027_v51, 1  ;;  %v2928_v13 = vadd.f32 %v8175_v25, %v2891_v33  ;;  %v2892_v10 = vadd.f32 %v2806_v31, %v8116_v4  ;;  %v5519_v56 = vpop.f32.mrb[144].mxu0  ;;  %v3074_v11 = vshll.u32 %v3027_v51, 16  ;;  %v6474_v33 = vld [vmem:[#allocation7 + $0x8] sm:$0xff]  }
 0x2d3   : > { %v6031_v20 = vpop.f32.mrb[147].mxu1  ;;  %v5520_v0 = vpop.f32.mrb[145].mxu0 }
 0x2d4   : > { %v2961_v12 = vmul.f32 %v8184_v3, %v2928_v13  ;;  %v2929_v47 = vadd.f32 %v8175_v25, %v2892_v10  ;;  %v5521_v5 = vadd.f32 %v5520_v0, %v5519_v56  ;;  %v5522_v38 = vpop.f32.mrb[146].mxu0  ;;  %v8246_v27 = vsel %vm559_vm3, %v3198_v15, %v3199_v41  ;;  %5761 = vmatpush3.bf16.msra.mxu0 %v6481_v1  ;;  %v6491_v10 = vld [vmem:[#allocation7 + $0x1e8] sm:$0xff]  }
 0x2d5   : > { %v5523_v4 = vpop.f32.mrb[147].mxu0  ;;  %6081 = vmatmul.mubr.bf16.vlgmr.msra.gmra.mrb[180].mxu1 %v8246_v27  ;;  %v3076_v7 = vrot.slane %v3074_v11, 1  ;;  %5762 = vmatprep.subr.bf16.mxu0 %v6483_v50 }
 0x2d6   : > { %v2991_v39 = vmax.f32 %v2961_v12, 0.0  ;;  %v2962_v23 = vmul.f32 %v8206_v14, %v2929_v47  ;;  %v2811_v49 = vadd.f32 %v5521_v5, %v2810_v55  ;;  %v5524_v45 = vadd.f32 %v5523_v4, %v5522_v38  ;;  %5677 = vmatpush3.bf16.msra.mxu1 %v6471_v53  ;;  %v6489_v55 = vld [vmem:[#allocation7 + $0x1a0] sm:$0xff]  }
 0x2d7   : > { %v8251_v31 = vsel %vm354_vm4, %v3072_v42, %v3076_v7  ;;  %5678 = vmatprep.subr.bf16.mxu1 %v6473_v21  ;;  %v6480_v21 = vld [vmem:[#allocation7 + $0x58] sm:$0xff]  }
 0x2d8   : > { %v2818_v51 = vpop.f32.mrb[148].mxu1  ;;  %v8253_v15 = vpack.c.bf16 %v2991_v39, %v2990_v40  ;;  %v2992_v20 = vmax.f32 %v2962_v23, 0.0  ;;  %v2893_v9 = vadd.f32 %v2811_v49, %v8119_v22  ;;  %v2814_v50 = vadd.f32 %v5524_v45, %v2813_v58  ;;  %3513 = vmatprep.mubr.bf16.mxu0 %v8251_v31  ;;  %5763 = vmatpush3.bf16.msra.mxu0 %v6485_v52  ;;  %v6493_v40 = vld [vmem:[#allocation7 + $0x1a8] sm:$0xff]   ;;  %v6495_v39 = vld [vmem:[#allocation7 + $0x1f0] sm:$0xff]  }
 0x2d9   : > { %v6034_v1 = vpop.f32.mrb[149].mxu1  ;;  %3514 = vmatmul.mubr.bf16.gmra.mrb[184].mxu0 %v8228_v18  ;;  %5764 = vmatprep.subr.bf16.mxu0 %v6487_v62 }
 0x2da   : > { %v2821_v41 = vpop.f32.mrb[150].mxu1  ;;  %v3029_v56 = vpack.c.bf16 %v2992_v20, %v2992_v20  ;;  %v2930_v11 = vadd.f32 %v8175_v25, %v2893_v9  ;;  %v2894_v53 = vadd.f32 %v2814_v50, %v8122_v61  ;;  %v5525_v0 = vpop.f32.mrb[148].mxu0  ;;  %5679 = vmatpush3.bf16.msra.mxu1 %v6474_v33  ;;  %v3081_v58 = vshll.u32 %v8253_v15, 16  ;;  %v6482_v1 = vld [vmem:[#allocation7 + $0x18] sm:$0xff]  }
 0x2db   : > { %v6035_v13 = vpop.f32.mrb[151].mxu1  ;;  %v5526_v22 = vpop.f32.mrb[149].mxu0  ;;  %5680 = vmatprep.subr.bf16.mxu1 %v6476_v44  ;;  %v3201_v61 = vrot.slane %v8253_v15, 1  ;;  %v3079_v42 = vshrl.u32 %v8253_v15, 16 }
 0x2dc   : > { %v2963_v12 = vmul.f32 %v8178_v43, %v2930_v11  ;;  %v2931_v47 = vadd.f32 %v8175_v25, %v2894_v53  ;;  %v5527_v5 = vadd.f32 %v5526_v22, %v5525_v0  ;;  %v5528_v38 = vpop.f32.mrb[150].mxu0  ;;  %v3202_v52 = vrot.slane %v3029_v56, 1  ;;  %5765 = vmatpush3.bf16.msra.mxu0 %v6489_v55  ;;  %v6484_v55 = vld [vmem:[#allocation7 + $0x60] sm:$0xff]   ;;  %v6497_v53 = vld [vmem:[#allocation7 + $0x1b0] sm:$0xff]   ;;  %v6499_v22 = vld [vmem:[#allocation7 + $0x1f8] sm:$0xff]  }
 0x2dd   : > { %v5529_v4 = vpop.f32.mrb[151].mxu0  ;;  %v3083_v7 = vrot.slane %v3081_v58, 1  ;;  %v3086_v62 = vshll.u32 %v3029_v56, 16  ;;  %5766 = vmatprep.subr.bf16.mxu0 %v6491_v10 }
 0x2de   : > { %v2964_v23 = vmul.f32 %v8184_v3, %v2931_v47  ;;  %v2819_v49 = vadd.f32 %v5527_v5, %v2818_v51  ;;  %v5530_v45 = vadd.f32 %v5529_v4, %v5528_v38  ;;  %5681 = vmatpush3.bf16.msra.mxu1 %v6478_v17  ;;  %v8267_v44 = vsel %vm559_vm3, %v3201_v61, %v3202_v52  ;;  %v6488_v5 = vld [vmem:[#allocation7 + $0x68] sm:$0xff]   ;;  %v6501_v4 = vld [vmem:[#allocation7 + $0x1b8] sm:$0xff]  }
 0x2df   : > { %v3084_v20 = vor.u32 %v3083_v7, %v3079_v42  ;;  %v3088_v9 = vrot.slane %v3086_v62, 1  ;;  %5682 = vmatprep.subr.bf16.mxu1 %v6480_v21  ;;  %v2993_v13 = vmax.f32 %v2963_v12, 0.0  ;;  %6084 = vmatprep.mubr.bf16.mxu1 %v8267_v44  ;;  %v8283_v7 = vld [vmem:[#allocation7 + $0x200] sm:$0xff]  }
 0x2e0   : > { %v2826_v33 = vpop.f32.mrb[152].mxu1  ;;  %v2994_v11 = vmax.f32 %v2964_v23, 0.0  ;;  %v2895_v10 = vadd.f32 %v2819_v49, %v8125_v36  ;;  %v2822_v56 = vadd.f32 %v5530_v45, %v2821_v41  ;;  %5767 = vmatpush3.bf16.msra.mxu0 %v6493_v40  ;;  %v6486_v41 = vld [vmem:[#allocation7 + $0x20] sm:$0xff]   ;;  %v6490_v45 = vld [vmem:[#allocation7 + $0x28] sm:$0xff]  }
 0x2e1   : > { %v6038_v50 = vpop.f32.mrb[153].mxu1  ;;  %v8272_v0 = vsel %vm354_vm4, %v3084_v20, %v3088_v9  ;;  %5768 = vmatprep.subr.bf16.mxu0 %v6495_v39  ;;  %v6492_v20 = vld [vmem:[#allocation7 + $0x70] sm:$0xff]  }
 0x2e2   : > { %v2829_v51 = vpop.f32.mrb[154].mxu1  ;;  %v8274_v58 = vpack.c.bf16 %v2994_v11, %v2993_v13  ;;  %v2932_v21 = vadd.f32 %v8175_v25, %v2895_v10  ;;  %v2896_v12 = vadd.f32 %v2822_v56, %v8128_v32  ;;  %3521 = vmatprep.mubr.bf16.mxu0 %v8272_v0  ;;  %v5531_v36 = vpop.f32.mrb[152].mxu0  ;;  %5683 = vmatpush3.bf16.msra.mxu1 %v6482_v1 }
 0x2e3   : > { %v6039_v17 = vpop.f32.mrb[155].mxu1  ;;  %3522 = vmatmul.mubr.bf16.gmra.mrb[188].mxu0 %v8253_v15  ;;  %v5532_v47 = vpop.f32.mrb[153].mxu0  ;;  %5684 = vmatprep.subr.bf16.mxu1 %v6484_v55 }
 0x2e4   : > { %v2965_v38 = vmul.f32 %v8206_v14, %v2932_v21  ;;  %v5533_v52 = vadd.f32 %v5532_v47, %v5531_v36  ;;  %v5534_v40 = vpop.f32.mrb[154].mxu0  ;;  %5769 = vmatpush3.bf16.msra.mxu0 %v6497_v53  ;;  %v2933_v61 = vadd.f32 %v8175_v25, %v2896_v12  ;;  %v3093_v32 = vshll.u32 %v8274_v58, 16 }
 0x2e5   : > { %v5535_v42 = vpop.f32.mrb[155].mxu0  ;;  %5770 = vmatprep.subr.bf16.mxu0 %v6499_v22  ;;  %v3204_v10 = vrot.slane %v8274_v58, 1  ;;  %v3091_v36 = vshrl.u32 %v8274_v58, 16 }
 0x2e6   : > { %v2995_v62 = vmax.f32 %v2965_v38, 0.0  ;;  %v2827_v39 = vadd.f32 %v5533_v52, %v2826_v33  ;;  %v5536_v23 = vadd.f32 %v5535_v42, %v5534_v40  ;;  %5685 = vmatpush3.bf16.msra.mxu1 %v6486_v41  ;;  %v2966_v11 = vmul.f32 %v8178_v43, %v2933_v61  ;;  %v6496_v41 = vld [vmem:[#allocation7 + $0x78] sm:$0xff]  }
 0x2e7   : > { %5686 = vmatprep.subr.bf16.mxu1 %v6488_v5  ;;  %v3095_v53 = vrot.slane %v3093_v32, 1 }
 0x2e8   : > { %v2834_v49 = vpop.f32.mrb[156].mxu1  ;;  %v3031_v9 = vpack.c.bf16 %v2995_v62, %v2995_v62  ;;  %v2897_v50 = vadd.f32 %v2827_v39, %v8131_v46  ;;  %v2830_v55 = vadd.f32 %v5536_v23, %v2829_v51  ;;  %5771 = vmatpush3.bf16.msra.mxu0 %v6501_v4  ;;  %v6494_v46 = vld [vmem:[#allocation7 + $0x30] sm:$0xff]  }
 0x2e9   : > { %v6042_v1 = vpop.f32.mrb[157].mxu1  ;;  %6128 = vmatprep.subr.bf16.mxu0 %v8283_v7  ;;  %v3096_v61 = vor.u32 %v3095_v53, %v3091_v36 }
 0x2ea   : > { %v2837_v13 = vpop.f32.mrb[158].mxu1  ;;  %v2934_v33 = vadd.f32 %v8175_v25, %v2897_v50  ;;  %v2898_v17 = vadd.f32 %v2830_v55, %v8134_v37  ;;  %v5537_v22 = vpop.f32.mrb[156].mxu0  ;;  %v3205_v21 = vrot.slane %v3031_v9, 1  ;;  %v3098_v12 = vshll.u32 %v3031_v9, 16  ;;  %5687 = vmatpush3.bf16.msra.mxu1 %v6490_v45  ;;  %v6498_v1 = vld [vmem:[#allocation7 + $0x38] sm:$0xff]   ;;  %v8302_v50 = vld [vmem:[#allocation7 + $0x80] sm:$0xff]  }
 0x2eb   : > { %v6043_v56 = vpop.f32.mrb[159].mxu1  ;;  %v5538_v51 = vpop.f32.mrb[157].mxu0  ;;  %5688 = vmatprep.subr.bf16.mxu1 %v6492_v20  ;;  %v2996_v37 = vmax.f32 %v2966_v11, 0.0 }
 0x2ec   : > { %v2967_v47 = vmul.f32 %v8184_v3, %v2934_v33  ;;  %v2935_v5 = vadd.f32 %v8175_v25, %v2898_v17  ;;  %v5539_v38 = vadd.f32 %v5538_v51, %v5537_v22  ;;  %v5540_v52 = vpop.f32.mrb[158].mxu0  ;;  %v8295_v40 = vsel %vm559_vm3, %v3204_v10, %v3205_v21 }
 0x2ed   : > { %v5541_v4 = vpop.f32.mrb[159].mxu0  ;;  %6085 = vmatmul.mubr.bf16.gmra.mrb[184].mxu1 %v8295_v40  ;;  %v3100_v42 = vrot.slane %v3098_v12, 1 }
 0x2ee   : > { %v2997_v32 = vmax.f32 %v2967_v47, 0.0  ;;  %v2968_v62 = vmul.f32 %v8206_v14, %v2935_v5  ;;  %v2835_v39 = vadd.f32 %v5539_v38, %v2834_v49  ;;  %v5542_v23 = vadd.f32 %v5541_v4, %v5540_v52  ;;  %5689 = vmatpush3.bf16.msra.mxu1 %v6494_v46 }
 0x2ef   : > { %v8300_v20 = vsel %vm354_vm4, %v3096_v61, %v3100_v42  ;;  %5690 = vmatprep.subr.bf16.mxu1 %v6496_v41 }
 0x2f0   : > { %v2842_v45 = vpop.f32.mrb[160].mxu1  ;;  %v8304_v55 = vpack.c.bf16 %v2997_v32, %v2996_v37  ;;  %v2998_v11 = vmax.f32 %v2968_v62, 0.0  ;;  %v2899_v10 = vadd.f32 %v2835_v39, %v8137_v16  ;;  %v2838_v56 = vadd.f32 %v5542_v23, %v2837_v13  ;;  %3529 = vmatprep.mubr.bf16.mxu0 %v8300_v20 }
 0x2f1   : > { %v6046_v9 = vpop.f32.mrb[161].mxu1  ;;  %3530 = vmatmul.mubr.bf16.gmra.mrb[192].mxu0 %v8274_v58 }
 0x2f2   : > { %v2845_v49 = vpop.f32.mrb[162].mxu1  ;;  %v3033_v33 = vpack.c.bf16 %v2998_v11, %v2998_v11  ;;  %v2936_v17 = vadd.f32 %v8175_v25, %v2899_v10  ;;  %v2900_v22 = vadd.f32 %v2838_v56, %v8140_v8  ;;  %v5543_v21 = vpop.f32.mrb[160].mxu0  ;;  %5691 = vmatpush3.bf16.msra.mxu1 %v6498_v1  ;;  %v3105_v46 = vshll.u32 %v8304_v55, 16 }
 0x2f3   : > { %v6047_v53 = vpop.f32.mrb[163].mxu1  ;;  %v5544_v12 = vpop.f32.mrb[161].mxu0  ;;  %6096 = vmatprep.subr.bf16.mxu1 %v8302_v50  ;;  %v3207_v5 = vrot.slane %v8304_v55, 1  ;;  %v3103_v38 = vshrl.u32 %v8304_v55, 16 }
 0x2f4   : > { %v2969_v16 = vmul.f32 %v8178_v43, %v2936_v17  ;;  %v2937_v13 = vadd.f32 %v8175_v25, %v2900_v22  ;;  %v5545_v51 = vadd.f32 %v5544_v12, %v5543_v21  ;;  %v5546_v36 = vpop.f32.mrb[162].mxu0  ;;  %v3208_v41 = vrot.slane %v3033_v33, 1 }
 0x2f5   : > { %v5547_v47 = vpop.f32.mrb[163].mxu0  ;;  %v3107_v8 = vrot.slane %v3105_v46, 1  ;;  %v3110_v52 = vshll.u32 %v3033_v33, 16 }
 0x2f6   : > { %v2970_v37 = vmul.f32 %v8184_v3, %v2937_v13  ;;  %v2843_v4 = vadd.f32 %v5545_v51, %v2842_v45  ;;  %v5548_v61 = vadd.f32 %v5547_v47, %v5546_v36  ;;  %v8319_v32 = vsel %vm559_vm3, %v3207_v5, %v3208_v41 }
 0x2f7   : > { %v3108_v62 = vor.u32 %v3107_v8, %v3103_v38  ;;  %v3112_v39 = vrot.slane %v3110_v52, 1  ;;  %v2999_v1 = vmax.f32 %v2969_v16, 0.0  ;;  %6088 = vmatprep.mubr.bf16.mxu1 %v8319_v32 }
 0x2f8   : > { %v2850_v42 = vpop.f32.mrb[164].mxu1  ;;  %v3000_v9 = vmax.f32 %v2970_v37, 0.0  ;;  %v2901_v11 = vadd.f32 %v2843_v4, %v8143_v26  ;;  %v2846_v10 = vadd.f32 %v5548_v61, %v2845_v49 }
 0x2f9   : > { %v6050_v23 = vpop.f32.mrb[165].mxu1  ;;  %v8324_v53 = vsel %vm354_vm4, %v3108_v62, %v3112_v39 }
 0x2fa   : > { %v2853_v56 = vpop.f32.mrb[166].mxu1  ;;  %v8326_v33 = vpack.c.bf16 %v3000_v9, %v2999_v1  ;;  %v2938_v17 = vadd.f32 %v8175_v25, %v2901_v11  ;;  %v2902_v22 = vadd.f32 %v2846_v10, %v8146_v30  ;;  %3537 = vmatprep.mubr.bf16.mxu0 %v8324_v53  ;;  %v5549_v21 = vpop.f32.mrb[164].mxu0  ;;  %v2920_v30 = vadd.f32 %v8175_v25, %v8192_v54 }
 0x2fb   : > { %v6051_v45 = vpop.f32.mrb[167].mxu1  ;;  %3538 = vmatmul.mubr.bf16.gmra.mrb[196].mxu0 %v8304_v55  ;;  %v5550_v26 = vpop.f32.mrb[165].mxu0 }
 0x2fc   : > { %v2971_v49 = vmul.f32 %v8206_v14, %v2938_v17  ;;  %v5551_v12 = vadd.f32 %v5550_v26, %v5549_v21  ;;  %v5552_v46 = vpop.f32.mrb[166].mxu0  ;;  %v2939_v16 = vadd.f32 %v8175_v25, %v2902_v22  ;;  %v3117_v51 = vshll.u32 %v8326_v33, 16 }
 0x2fd   : > { %v5553_v13 = vpop.f32.mrb[167].mxu0  ;;  %v3210_v62 = vrot.slane %v8326_v33, 1  ;;  %v2953_v54 = vmul.f32 %v8206_v14, %v2920_v30 }
 0x2fe   : > { %v3001_v36 = vmax.f32 %v2971_v49, 0.0  ;;  %v2851_v41 = vadd.f32 %v5551_v12, %v2850_v42  ;;  %v5554_v47 = vadd.f32 %v5553_v13, %v5552_v46  ;;  %v2972_v61 = vmul.f32 %v8178_v43, %v2939_v16 }
 0x2ff   : > { %v3119_v23 = vrot.slane %v3117_v51, 1 }
 0x300   : > { %v2858_v5 = vpop.f32.mrb[168].mxu1  ;;  %v3035_v8 = vpack.c.bf16 %v3001_v36, %v3001_v36  ;;  %v2903_v52 = vadd.f32 %v2851_v41, %v8149_v35  ;;  %v2854_v37 = vadd.f32 %v5554_v47, %v2853_v56  ;;  %v3115_v35 = vshrl.u32 %v8326_v33, 16 }
 0x301   : > { %v6054_v38 = vpop.f32.mrb[169].mxu1  ;;  %v3002_v49 = vmax.f32 %v2972_v61, 0.0  ;;  %v2983_v47 = vmax.f32 %v2953_v54, 0.0 }
 0x302   : > { %v2861_v4 = vpop.f32.mrb[170].mxu1  ;;  %v2940_v1 = vadd.f32 %v8175_v25, %v2903_v52  ;;  %v2904_v42 = vadd.f32 %v2854_v37, %v8152_v29  ;;  %v5555_v9 = vpop.f32.mrb[168].mxu0  ;;  %v3211_v11 = vrot.slane %v3035_v8, 1  ;;  %v3122_v10 = vshll.u32 %v3035_v8, 16 }
 0x303   : > { %v6055_v39 = vpop.f32.mrb[171].mxu1  ;;  %v5556_v45 = vpop.f32.mrb[169].mxu0  ;;  %v3120_v29 = vor.u32 %v3119_v23, %v3115_v35 }
 0x304   : > { %v2973_v56 = vmul.f32 %v8184_v3, %v2940_v1  ;;  %v2941_v17 = vadd.f32 %v8175_v25, %v2904_v42  ;;  %v5557_v22 = vadd.f32 %v5556_v45, %v5555_v9  ;;  %v5558_v21 = vpop.f32.mrb[170].mxu0  ;;  %v8347_v26 = vsel %vm559_vm3, %v3210_v62, %v3211_v11 }
 0x305   : > { %v5559_v12 = vpop.f32.mrb[171].mxu0  ;;  %6089 = vmatmul.mubr.bf16.gmra.mrb[188].mxu1 %v8347_v26  ;;  %v3124_v46 = vrot.slane %v3122_v10, 1  ;;  %v3017_v9 = vmul.f32 %v8189_v63, %v2983_v47 }
 0x306   : > { %v3003_v16 = vmax.f32 %v2973_v56, 0.0  ;;  %v2974_v13 = vmul.f32 %v8206_v14, %v2941_v17  ;;  %v2859_v51 = vadd.f32 %v5557_v22, %v2858_v5  ;;  %v5560_v36 = vadd.f32 %v5559_v12, %v5558_v21 }
 0x307   : > { %v8352_v30 = vsel %vm354_vm4, %v3120_v29, %v3124_v46 }
 0x308   : > { %v2866_v41 = vpop.f32.mrb[172].mxu1  ;;  %v8354_v8 = vpack.c.bf16 %v3003_v16, %v3002_v49  ;;  %v3004_v52 = vmax.f32 %v2974_v13, 0.0  ;;  %v2905_v37 = vadd.f32 %v2859_v51, %v8155_v59  ;;  %v2862_v61 = vadd.f32 %v5560_v36, %v2861_v4  ;;  %3545 = vmatprep.mubr.bf16.mxu0 %v8352_v30 }
 0x309   : > { %v6058_v38 = vpop.f32.mrb[173].mxu1  ;;  %3546 = vmatmul.mubr.bf16.gmra.mrb[200].mxu0 %v8326_v33 }
 0x30a   : > { %v2869_v62 = vpop.f32.mrb[174].mxu1  ;;  %v3037_v5 = vpack.c.bf16 %v3004_v52, %v3004_v52  ;;  %v2942_v23 = vadd.f32 %v8175_v25, %v2905_v37  ;;  %v2906_v1 = vadd.f32 %v2862_v61, %v8158_v19  ;;  %v5561_v42 = vpop.f32.mrb[172].mxu0  ;;  %v3129_v10 = vshll.u32 %v8354_v8, 16 }
 0x30b   : > { %v6059_v39 = vpop.f32.mrb[175].mxu1  ;;  %v5562_v11 = vpop.f32.mrb[173].mxu0  ;;  %v3213_v17 = vrot.slane %v8354_v8, 1  ;;  %v3127_v22 = vshrl.u32 %v8354_v8, 16 }
 0x30c   : > { %v2975_v59 = vmul.f32 %v8178_v43, %v2942_v23  ;;  %v2943_v4 = vadd.f32 %v8175_v25, %v2906_v1  ;;  %v5563_v54 = vadd.f32 %v5562_v11, %v5561_v42  ;;  %v5564_v45 = vpop.f32.mrb[174].mxu0  ;;  %v3214_v35 = vrot.slane %v3037_v5, 1 }
 0x30d   : > { %v5565_v56 = vpop.f32.mrb[175].mxu0  ;;  %v3131_v21 = vrot.slane %v3129_v10, 1  ;;  %v3134_v19 = vshll.u32 %v3037_v5, 16  ;;  %v3045_v42 = vshll.u32 %v8197_v57, 16 }
 0x30e   : > { %v2976_v49 = vmul.f32 %v8184_v3, %v2943_v4  ;;  %v2867_v63 = vadd.f32 %v5563_v54, %v2866_v41  ;;  %v5566_v12 = vadd.f32 %v5565_v56, %v5564_v45  ;;  %v8369_v46 = vsel %vm559_vm3, %v3213_v17, %v3214_v35 }
 0x30f   : > { %v3132_v16 = vor.u32 %v3131_v21, %v3127_v22  ;;  %v3136_v13 = vrot.slane %v3134_v19, 1  ;;  %v3005_v36 = vmax.f32 %v2975_v59, 0.0  ;;  %6092 = vmatprep.mubr.bf16.mxu1 %v8369_v46  ;;  %v8376_v41 = vpack.c.bf16 %v3017_v9, %v3017_v9 }
 0x310   : > { %v2874_v29 = vpop.f32.mrb[176].mxu1  ;;  %v3006_v47 = vmax.f32 %v2976_v49, 0.0  ;;  %v2907_v38 = vadd.f32 %v2867_v63, %v8161_v34  ;;  %v2870_v52 = vadd.f32 %v5566_v12, %v2869_v62  ;;  %v3047_v17 = vrot.slane %v3045_v42, 1 }
 0x311   : > { %v6062_v51 = vpop.f32.mrb[177].mxu1  ;;  %v8374_v61 = vsel %vm354_vm4, %v3132_v16, %v3136_v13  ;;  %v3050_v54 = vshll.u32 %v8376_v41, 16  ;;  %v3043_v63 = vshrl.u32 %v8197_v57, 16 }
 0x312   : > { %v2877_v37 = vpop.f32.mrb[178].mxu1  ;;  %v8378_v5 = vpack.c.bf16 %v3006_v47, %v3005_v36  ;;  %v2944_v23 = vadd.f32 %v8175_v25, %v2907_v38  ;;  %v2908_v1 = vadd.f32 %v2870_v52, %v8164_v2  ;;  %3553 = vmatprep.mubr.bf16.mxu0 %v8374_v61  ;;  %v5567_v34 = vpop.f32.mrb[176].mxu0 }
 0x313   : > { %v6063_v39 = vpop.f32.mrb[179].mxu1  ;;  %3554 = vmatmul.mubr.bf16.gmra.mrb[204].mxu0 %v8354_v8  ;;  %v5568_v62 = vpop.f32.mrb[177].mxu0  ;;  %v3052_v12 = vrot.slane %v3050_v54, 1 }
 0x314   : > { %v2977_v11 = vmul.f32 %v8206_v14, %v2944_v23  ;;  %v2945_v9 = vadd.f32 %v8175_v25, %v2908_v1  ;;  %v5569_v10 = vadd.f32 %v5568_v62, %v5567_v34  ;;  %v5570_v59 = vpop.f32.mrb[178].mxu0  ;;  %v3141_v2 = vshll.u32 %v8378_v5, 16 }
 0x315   : > { %v5571_v4 = vpop.f32.mrb[179].mxu0  ;;  %v3216_v36 = vrot.slane %v8378_v5, 1  ;;  %v3139_v38 = vshrl.u32 %v8378_v5, 16  ;;  %v3018_v23 = vstv %s3013_s10 }
 0x316   : > { %v3007_v45 = vmax.f32 %v2977_v11, 0.0  ;;  %v5572_v35 = vadd.f32 %v5571_v4, %v5570_v59  ;;  %v2875_v56 = vadd.f32 %v5569_v10, %v2874_v29  ;;  %v2978_v21 = vmul.f32 %v8178_v43, %v2945_v9  ;;  %v6502_v4 = vld [vmem:[#allocation7 + $0x88] sm:$0xff]  }
 0x317   : > { %v3143_v16 = vrot.slane %v3141_v2, 1  ;;  %v3048_v29 = vor.u32 %v3047_v17, %v3043_v63 }
 0x318   : > { %v3039_v22 = vpack.c.bf16 %v3007_v45, %v3007_v45  ;;  %v2909_v19 = vadd.f32 %v2875_v56, %v8167_v6  ;;  %v2878_v49 = vadd.f32 %v5572_v35, %v2877_v37  ;;  %v3008_v43 = vmax.f32 %v2978_v21, 0.0  ;;  %v8419_v21 = vld [vmem:[#allocation7 + $0x208] sm:$0xff]  }
 0x319   : > { %v3144_v1 = vor.u32 %v3143_v16, %v3139_v38  ;;  %v6505_v16 = vld [vmem:[#allocation7 + $0xa0] sm:$0xff]  }
 0x31a   : > { %v2946_v13 = vadd.f32 %v8175_v25, %v2909_v19  ;;  %v2910_v51 = vadd.f32 %v2878_v49, %v8170_v24  ;;  %v3217_v47 = vrot.slane %v3039_v22, 1  ;;  %v3146_v52 = vshll.u32 %v3039_v22, 16  ;;  %v6503_v22 = vld [vmem:[#allocation7 + $0x90] sm:$0xff]  }
 0x31b   : > { %v3053_v24 = vsel %vm354_vm4, %v3048_v29, %v3052_v12  ;;  %v8431_v12 = vld [vmem:[#allocation7 + $0x210] sm:$0xff]  }
 0x31c   : > { %v2979_v6 = vmul.f32 %v8184_v3, %v2946_v13  ;;  %v2947_v37 = vadd.f32 %v8175_v25, %v2910_v51  ;;  %v8400_v39 = vsel %vm559_vm3, %v3216_v36, %v3217_v47  ;;  %v3148_v34 = vrot.slane %v3146_v52, 1  ;;  %v8437_v13 = vld [vmem:[#allocation7 + $0x218] sm:$0xff]   ;;  %v6508_v51 = vld [vmem:[#allocation7 + $0xa8] sm:$0xff]  }
 0x31d   : > { %6093 = vmatmul.mubr.bf16.gmra.mrb[192].mxu1 %v8400_v39  ;;  %v3019_v3 = vmul.f32 %v3018_v23, %v3008_v43  ;;  %v6513_v36 = vld [vmem:[#allocation7 + $0x228] sm:$0xff]   ;;  %v6514_v47 = vld [vmem:[#allocation7 + $0xb8] sm:$0xff]  }
 0x31e   : > { %v3009_v62 = vmax.f32 %v2979_v6, 0.0  ;;  %v2980_v42 = vmul.f32 %v8206_v14, %v2947_v37  ;;  %3843 = vmatprep.mubr.bf16.mxu1 %v3053_v24  ;;  %v8406_v11 = vsel %vm354_vm4, %v3144_v1, %v3148_v34 }
 0x31f   : > { %3561 = vmatprep.mubr.bf16.mxu0 %v8406_v11 }
 0x320   : > { %v3020_v9 = vmul.f32 %v3018_v23, %v3009_v62  ;;  %v3010_v25 = vmax.f32 %v2980_v42, 0.0  ;;  %3562 = vmatmul.mubr.bf16.gmra.mrb[208].mxu0 %v8378_v5 }
 0x321   : > { %4230 = vmatprep.mubr.bf16.mxu0 %v8251_v31 }
 0x322   : > { %v8410_v10 = vpack.c.bf16 %v3020_v9, %v3019_v3  ;;  %v3021_v59 = vmul.f32 %v3018_v23, %v3010_v25 }
 0x324   : > { %v3041_v54 = vpack.c.bf16 %v3021_v59, %v3021_v59  ;;  %v3153_v14 = vshll.u32 %v8410_v10, 16  ;;  %v3151_v2 = vshrl.u32 %v8410_v10, 16  ;;  %v3219_v56 = vrot.slane %v8410_v10, 1 }
 0x325   : > { %3844 = vmatmul.mubr.bf16.vlgmr.msra.gmra.mrb[196].mxu1 %v8197_v57 }
 0x326   : > { %3851 = vmatprep.mubr.bf16.mxu1 %v8226_v48  ;;  %6097 = vmatpush3.bf16.msra.mxu1 %v8302_v50  ;;  %v3155_v45 = vrot.slane %v3153_v14, 1  ;;  %v3158_v35 = vshll.u32 %v3041_v54, 16  ;;  %v3220_v17 = vrot.slane %v3041_v54, 1  ;;  %v6504_v50 = vld [vmem:[#allocation7 + $0x98] sm:$0xff]  }
 0x327   : > { %6098 = vmatprep.subr.bf16.mxu1 %v6502_v4 }
 0x328   : > { %v3156_v19 = vor.u32 %v3155_v45, %v3151_v2  ;;  %v3160_v49 = vrot.slane %v3158_v35, 1  ;;  %v8422_v63 = vsel %vm559_vm3, %v3219_v56, %v3220_v17  ;;  %4231 = vmatmul.mubr.bf16.vlgmr.msra.gmra.mrb[212].mxu0 %v8228_v18 }
 0x329   : > { %4238 = vmatprep.mubr.bf16.mxu0 %v8272_v0  ;;  %6129 = vmatpush3.bf16.msra.mxu0 %v8283_v7 }
 0x32a   : > { %6099 = vmatpush3.bf16.msra.mxu1 %v6502_v4  ;;  %v8427_v48 = vsel %vm354_vm4, %v3156_v19, %v3160_v49  ;;  %6130 = vmatprep.subr.bf16.mxu0 %v8419_v21 }
 0x32b   : > { %6100 = vmatprep.subr.bf16.mxu1 %v6503_v22 }
 0x32d   : > { %3852 = vmatmul.mubr.bf16.gmra.mrb[200].mxu1 %v8209_v28  ;;  %6131 = vmatpush3.bf16.msra.mxu0 %v8419_v21  ;;  %v8443_v28 = vld [vmem:[#allocation7 + $0x220] sm:$0xff]  }
 0x32e   : > { %3859 = vmatprep.mubr.bf16.mxu1 %v8251_v31  ;;  %6101 = vmatpush3.bf16.msra.mxu1 %v6503_v22  ;;  %v6511_v31 = vld [vmem:[#allocation7 + $0xb0] sm:$0xff]  }
 0x32f   : > { %6102 = vmatprep.subr.bf16.mxu1 %v6504_v50  ;;  %6132 = vmatprep.subr.bf16.mxu0 %v8431_v12 }
 0x330   : > { %4239 = vmatmul.mubr.bf16.gmra.mrb[216].mxu0 %v8253_v15 }
 0x331   : > { %4246 = vmatprep.mubr.bf16.mxu0 %v8300_v20  ;;  %6133 = vmatpush3.bf16.msra.mxu0 %v8431_v12 }
 0x332   : > { %6103 = vmatpush3.bf16.msra.mxu1 %v6504_v50  ;;  %6134 = vmatprep.subr.bf16.mxu0 %v8437_v13 }
 0x333   : > { %6104 = vmatprep.subr.bf16.mxu1 %v6505_v16 }
 0x335   : > { %3860 = vmatmul.mubr.bf16.gmra.mrb[204].mxu1 %v8228_v18  ;;  %6135 = vmatpush3.bf16.msra.mxu0 %v8437_v13  ;;  %v6515_v18 = vld [vmem:[#allocation7 + $0x230] sm:$0xff]  }
 0x336   : > { %3867 = vmatprep.mubr.bf16.mxu1 %v8272_v0  ;;  %6105 = vmatpush3.bf16.msra.mxu1 %v6505_v16  ;;  %v6516_v0 = vld [vmem:[#allocation7 + $0x238] sm:$0xff]  }
 0x337   : > { %6106 = vmatprep.subr.bf16.mxu1 %v6508_v51  ;;  %6136 = vmatprep.subr.bf16.mxu0 %v8443_v28 }
 0x338   : > { %4247 = vmatmul.mubr.bf16.gmra.mrb[220].mxu0 %v8274_v58 }
 0x339   : > { %4254 = vmatprep.mubr.bf16.mxu0 %v8324_v53  ;;  %6137 = vmatpush3.bf16.msra.mxu0 %v8443_v28 }
 0x33a   : > { %6107 = vmatpush3.bf16.msra.mxu1 %v6508_v51  ;;  %6138 = vmatprep.subr.bf16.mxu0 %v6513_v36 }
 0x33b   : > { %6108 = vmatprep.subr.bf16.mxu1 %v6511_v31 }
 0x33d   : > { %3868 = vmatmul.mubr.bf16.gmra.mrb[208].mxu1 %v8253_v15  ;;  %6139 = vmatpush3.bf16.msra.mxu0 %v6513_v36  ;;  %v3193_v15 = vrot.slane %v8376_v41, 1 }
 0x33e   : > { %3875 = vmatprep.mubr.bf16.mxu1 %v8300_v20  ;;  %6109 = vmatpush3.bf16.msra.mxu1 %v6511_v31 }
 0x33f   : > { %6110 = vmatprep.subr.bf16.mxu1 %v6514_v47  ;;  %6140 = vmatprep.subr.bf16.mxu0 %v6515_v18 }
 0x340   : > { %4255 = vmatmul.mubr.bf16.gmra.mrb[224].mxu0 %v8304_v55 }
 0x341   : > { %4262 = vmatprep.mubr.bf16.mxu0 %v8352_v30  ;;  %6141 = vmatpush3.bf16.msra.mxu0 %v6515_v18 }
 0x342   : > { %6111 = vmatpush3.bf16.msra.mxu1 %v6514_v47  ;;  %6142 = vmatprep.subr.bf16.mxu0 %v6516_v0 }
 0x343   : > { %6160 = vmatprep.subr.bf16.mxu1 %v8283_v7 }
 0x345   : > { %3876 = vmatmul.mubr.bf16.gmra.mrb[212].mxu1 %v8274_v58  ;;  %6143 = vmatpush3.bf16.msra.mxu0 %v6516_v0  ;;  %v3192_v58 = vrot.slane %v8197_v57, 1 }
 0x346   : > { %3883 = vmatprep.mubr.bf16.mxu1 %v8324_v53 }
 0x347   : > { %v3194_v20 = vsel %vm559_vm3, %v3192_v58, %v3193_v15 }
 0x348   : > { %4263 = vmatmul.mubr.bf16.gmra.mrb[228].mxu0 %v8326_v33 }
 0x349   : > { %4270 = vmatprep.mubr.bf16.mxu0 %v8374_v61 }
 0x34d   : > { %3884 = vmatmul.mubr.bf16.gmra.mrb[216].mxu1 %v8304_v55 }
 0x34e   : > { %3891 = vmatprep.mubr.bf16.mxu1 %v8352_v30 }
 0x350   : > { %4271 = vmatmul.mubr.bf16.gmra.mrb[232].mxu0 %v8354_v8 }
 0x351   : > { %4278 = vmatprep.mubr.bf16.mxu0 %v8406_v11 }
 0x355   : > { %3892 = vmatmul.mubr.bf16.gmra.mrb[220].mxu1 %v8326_v33 }
 0x356   : > { %3899 = vmatprep.mubr.bf16.mxu1 %v8374_v61 }
 0x358   : > { %4279 = vmatmul.mubr.bf16.gmra.mrb[236].mxu0 %v8378_v5 }
 0x359   : > { %4286 = vmatprep.mubr.bf16.mxu0 %v8427_v48 }
 0x35d   : > { %3900 = vmatmul.mubr.bf16.gmra.mrb[224].mxu1 %v8354_v8 }
 0x35e   : > { %6112 = vmatprep.mubr.bf16.mxu1 %v3194_v20 }
 0x360   : > { %4287 = vmatmul.mubr.bf16.gmra.mrb[240].mxu0 %v8410_v10 }
 0x361   : > { %6144 = vmatprep.mubr.bf16.mxu0 %v8246_v27 }
 0x365   : > { %6113 = vmatmul.mubr.bf16.vlgmr.msra.gmra.mrb[180].mxu1 %v8221_v60 }
 0x366   : > { %6116 = vmatprep.mubr.bf16.mxu1 %v8246_v27  ;;  %6168 = vmatpush3.bf16.msra.mxu1 %v8283_v7 }
 0x367   : > { %6161 = vmatprep.subr.bf16.mxu1 %v8419_v21 }
 0x368   : > { %6145 = vmatmul.mubr.bf16.vlgmr.msra.gmra.mrb[244].mxu0 %v8267_v44 }
 0x369   : > { %6148 = vmatprep.mubr.bf16.mxu0 %v8295_v40 }
 0x36a   : > { %6169 = vmatpush3.bf16.msra.mxu1 %v8419_v21 }
 0x36b   : > { %6162 = vmatprep.subr.bf16.mxu1 %v8431_v12 }
 0x36d   : > { %6117 = vmatmul.mubr.bf16.gmra.mrb[184].mxu1 %v8267_v44 }
 0x36e   : > { %6120 = vmatprep.mubr.bf16.mxu1 %v8295_v40  ;;  %6170 = vmatpush3.bf16.msra.mxu1 %v8431_v12 }
 0x36f   : > { %6163 = vmatprep.subr.bf16.mxu1 %v8437_v13 }
 0x370   : > { %6149 = vmatmul.mubr.bf16.gmra.mrb[248].mxu0 %v8319_v32 }
 0x372   : > { %6171 = vmatpush3.bf16.msra.mxu1 %v8437_v13 }
 0x373   : > { %6164 = vmatprep.subr.bf16.mxu1 %v8443_v28 }
 0x375   : > { %6121 = vmatmul.mubr.bf16.gmra.mrb[188].mxu1 %v8319_v32 }
 0x376   : > { %6124 = vmatprep.mubr.bf16.mxu1 %v8347_v26  ;;  %6172 = vmatpush3.bf16.msra.mxu1 %v8443_v28 }
 0x377   : > { %6165 = vmatprep.subr.bf16.mxu1 %v6513_v36 }
 0x37a   : > { %6173 = vmatpush3.bf16.msra.mxu1 %v6513_v36 }
 0x37b   : > { %6166 = vmatprep.subr.bf16.mxu1 %v6515_v18 }
 0x37d   : > { %6125 = vmatmul.mubr.bf16.gmra.mrb[192].mxu1 %v8369_v46 }
 0x37e   : > { %6174 = vmatpush3.bf16.msra.mxu1 %v6515_v18  ;;  %6152 = vmatprep.mubr.bf16.mxu1 %v8347_v26 }
 0x37f   : > { %6167 = vmatprep.subr.bf16.mxu1 %v6516_v0 }
 0x382   : > { %6175 = vmatpush3.bf16.msra.mxu1 %v6516_v0 }
 0x385   : > { %6153 = vmatmul.mubr.bf16.vlgmr.msra.gmra.mrb[188].mxu1 %v8369_v46 }
 0x386   : > { %6156 = vmatprep.mubr.bf16.mxu1 %v8400_v39 }
 0x38d   : > { %6157 = vmatmul.mubr.bf16.gmra.mrb[192].mxu1 %v8422_v63 }
 0x39e   : > { %v5612_v57 = vpop.f32.mrb[180].mxu0 }
 0x39f   : > { %v5613_v60 = vpop.f32.mrb[181].mxu0 }
 0x3a0   : > { %v5614_v27 = vadd.f32 %v5613_v60, %v5612_v57  ;;  %v5615_v44 = vpop.f32.mrb[182].mxu0 }
 0x3a1   : > { %v5616_v7 = vpop.f32.mrb[183].mxu0 }
 0x3a2   : > { %v5617_v40 = vadd.f32 %v5616_v7, %v5615_v44 }
 0x3ac   : > { %v5618_v55 = vpop.f32.mrb[184].mxu0 }
 0x3ad   : > { %v5619_v32 = vpop.f32.mrb[185].mxu0 }
 0x3ae   : > { %v5620_v53 = vadd.f32 %v5619_v32, %v5618_v55  ;;  %v5621_v33 = vpop.f32.mrb[186].mxu0 }
 0x3af   : > { %v5622_v30 = vpop.f32.mrb[187].mxu0 }
 0x3b0   : > { %v5623_v26 = vadd.f32 %v5622_v30, %v5621_v33 }
 0x3b6   : > { %v5624_v8 = vpop.f32.mrb[188].mxu0 }
 0x3b7   : > { %v5625_v61 = vpop.f32.mrb[189].mxu0 }
 0x3b8   : > { %v8498_v41 = vadd.f32 %v5625_v61, %v5624_v8  ;;  %v5627_v46 = vpop.f32.mrb[190].mxu0 }
 0x3b9   : > { %v5628_v5 = vpop.f32.mrb[191].mxu0 }
 0x3ba   : > { %v8500_v29 = vadd.f32 %v5628_v5, %v5627_v46 }
 0x3c4   : > { %v5630_v38 = vpop.f32.mrb[192].mxu0 }
 0x3c5   : > { %v5631_v52 = vpop.f32.mrb[193].mxu0 }
 0x3c6   : > { %v8502_v43 = vadd.f32 %v5631_v52, %v5630_v38  ;;  %v5633_v6 = vpop.f32.mrb[194].mxu0 }
 0x3c7   : > { %v5634_v37 = vpop.f32.mrb[195].mxu0 }
 0x3c8   : > { %v8504_v39 = vadd.f32 %v5634_v37, %v5633_v6 }
 0x3ce   : > { %v5636_v23 = vpop.f32.mrb[196].mxu0 }
 0x3cf   : > { %v5637_v24 = vpop.f32.mrb[197].mxu0 }
 0x3d0   : > { %v8506_v1 = vadd.f32 %v5637_v24, %v5636_v23  ;;  %v5639_v34 = vpop.f32.mrb[198].mxu0 }
 0x3d1   : > { %v5640_v62 = vpop.f32.mrb[199].mxu0 }
 0x3d2   : > { %v8508_v42 = vadd.f32 %v5640_v62, %v5639_v34 }
 0x3dc   : > { %v5642_v11 = vpop.f32.mrb[200].mxu0 }
 0x3dd   : > { %v5643_v3 = vpop.f32.mrb[201].mxu0 }
 0x3de   : > { %v8510_v9 = vadd.f32 %v5643_v3, %v5642_v11  ;;  %v5645_v25 = vpop.f32.mrb[202].mxu0 }
 0x3df   : > { %v5646_v10 = vpop.f32.mrb[203].mxu0 }
 0x3e0   : > { %v8512_v59 = vadd.f32 %v5646_v10, %v5645_v25 }
 0x3e6   : > { %v5648_v4 = vpop.f32.mrb[204].mxu0 }
 0x3e7   : > { %v5649_v54 = vpop.f32.mrb[205].mxu0 }
 0x3e8   : > { %v8514_v14 = vadd.f32 %v5649_v54, %v5648_v4  ;;  %v5651_v2 = vpop.f32.mrb[206].mxu0 }
 0x3e9   : > { %v5652_v45 = vpop.f32.mrb[207].mxu0 }
 0x3ea   : > { %v8516_v35 = vadd.f32 %v5652_v45, %v5651_v2 }
 0x3f3   : > { %v5654_v56 = vpop.f32.mrb[208].mxu0 }
 0x3f4   : > { %v5655_v17 = vpop.f32.mrb[209].mxu0 }
 0x3f5   : > { %v8518_v22 = vadd.f32 %v5655_v17, %v5654_v56  ;;  %v5657_v21 = vpop.f32.mrb[210].mxu0 }
 0x3f6   : > { %v5658_v19 = vpop.f32.mrb[211].mxu0 }
 0x3f7   : > { %v8520_v49 = vadd.f32 %v5658_v19, %v5657_v21 }
 0x3f8   : > { %v5692_v63 = vpop.f32.mrb[196].mxu1 }
 0x3f9   : > { %v5693_v48 = vpop.f32.mrb[197].mxu1 }
 0x3fa   : > { %v5694_v50 = vadd.f32 %v5693_v48, %v5692_v63  ;;  %v5695_v12 = vpop.f32.mrb[198].mxu1 }
 0x3fb   : > { %v5696_v16 = vpop.f32.mrb[199].mxu1  ;;  %v5772_v51 = vpop.f32.mrb[212].mxu0 }
 0x3fc   : > { %v5697_v13 = vadd.f32 %v5696_v16, %v5695_v12  ;;  %v8522_v28 = vadd.f32 %v5694_v50, %v5614_v27  ;;  %v5773_v31 = vpop.f32.mrb[213].mxu0 }
 0x3fd   : > { %v8524_v36 = vadd.f32 %v5773_v31, %v5772_v51  ;;  %v5775_v47 = vpop.f32.mrb[214].mxu0 }
 0x3fe   : > { %v8526_v18 = vadd.f32 %v5697_v13, %v5617_v40  ;;  %v5776_v0 = vpop.f32.mrb[215].mxu0 }
 0x3ff   : > { %v8528_v15 = vadd.f32 %v5776_v0, %v5775_v47 }
 0x400   : > { %v5698_v58 = vpop.f32.mrb[200].mxu1 }
 0x401   : > { %v5699_v20 = vpop.f32.mrb[201].mxu1 }
 0x402   : > { %v5700_v57 = vadd.f32 %v5699_v20, %v5698_v58  ;;  %v5701_v60 = vpop.f32.mrb[202].mxu1 }
 0x403   : > { %v5702_v44 = vpop.f32.mrb[203].mxu1  ;;  %v5778_v55 = vpop.f32.mrb[216].mxu0 }
 0x404   : > { %v5703_v7 = vadd.f32 %v5702_v44, %v5701_v60  ;;  %v8530_v32 = vadd.f32 %v5700_v57, %v5620_v53  ;;  %v5779_v27 = vpop.f32.mrb[217].mxu0 }
 0x405   : > { %v8532_v33 = vadd.f32 %v5779_v27, %v5778_v55  ;;  %v5781_v30 = vpop.f32.mrb[218].mxu0 }
 0x406   : > { %v8534_v8 = vadd.f32 %v5703_v7, %v5623_v26  ;;  %v5782_v40 = vpop.f32.mrb[219].mxu0 }
 0x407   : > { %v8536_v61 = vadd.f32 %v5782_v40, %v5781_v30 }
 0x408   : > { %v5704_v46 = vpop.f32.mrb[204].mxu1 }
 0x409   : > { %v5705_v5 = vpop.f32.mrb[205].mxu1 }
 0x40a   : > { %v5706_v38 = vadd.f32 %v5705_v5, %v5704_v46  ;;  %v5707_v52 = vpop.f32.mrb[206].mxu1 }
 0x40b   : > { %v5708_v6 = vpop.f32.mrb[207].mxu1  ;;  %v5784_v23 = vpop.f32.mrb[220].mxu0 }
 0x40c   : > { %v5709_v37 = vadd.f32 %v5708_v6, %v5707_v52  ;;  %v8539_v24 = vadd.f32 %v5706_v38, %v8498_v41  ;;  %v5785_v53 = vpop.f32.mrb[221].mxu0 }
 0x40d   : > { %v8541_v34 = vadd.f32 %v5785_v53, %v5784_v23  ;;  %v5787_v62 = vpop.f32.mrb[222].mxu0 }
 0x40e   : > { %v8544_v26 = vadd.f32 %v5709_v37, %v8500_v29  ;;  %v5788_v11 = vpop.f32.mrb[223].mxu0 }
 0x40f   : > { %v8546_v3 = vadd.f32 %v5788_v11, %v5787_v62 }
 0x410   : > { %v5710_v25 = vpop.f32.mrb[208].mxu1 }
 0x411   : > { %v5711_v10 = vpop.f32.mrb[209].mxu1 }
 0x412   : > { %v5712_v4 = vadd.f32 %v5711_v10, %v5710_v25  ;;  %v5713_v54 = vpop.f32.mrb[210].mxu1 }
 0x413   : > { %v5714_v2 = vpop.f32.mrb[211].mxu1  ;;  %v5790_v56 = vpop.f32.mrb[224].mxu0 }
 0x414   : > { %v5715_v45 = vadd.f32 %v5714_v2, %v5713_v54  ;;  %v8549_v41 = vadd.f32 %v5712_v4, %v8502_v43  ;;  %v5791_v17 = vpop.f32.mrb[225].mxu0 }
 0x415   : > { %v8551_v21 = vadd.f32 %v5791_v17, %v5790_v56  ;;  %v5793_v19 = vpop.f32.mrb[226].mxu0 }
 0x416   : > { %v8554_v29 = vadd.f32 %v5715_v45, %v8504_v39  ;;  %v5794_v63 = vpop.f32.mrb[227].mxu0 }
 0x417   : > { %v8556_v48 = vadd.f32 %v5794_v63, %v5793_v19 }
 0x418   : > { %v5716_v50 = vpop.f32.mrb[212].mxu1 }
 0x419   : > { %v5717_v12 = vpop.f32.mrb[213].mxu1 }
 0x41a   : > { %v5718_v16 = vadd.f32 %v5717_v12, %v5716_v50  ;;  %v5719_v13 = vpop.f32.mrb[214].mxu1 }
 0x41b   : > { %v5720_v51 = vpop.f32.mrb[215].mxu1  ;;  %v5796_v43 = vpop.f32.mrb[228].mxu0 }
 0x41c   : > { %v6211_v31 = vadd.f32 %v5718_v16, %v8506_v1  ;;  %v5721_v47 = vadd.f32 %v5720_v51, %v5719_v13  ;;  %v5797_v0 = vpop.f32.mrb[229].mxu0 }
 0x41d   : > { %v5798_v20 = vadd.f32 %v5797_v0, %v5796_v43  ;;  %v5799_v57 = vpop.f32.mrb[230].mxu0 }
 0x41e   : > { %v6217_v58 = vadd.f32 %v5721_v47, %v8508_v42  ;;  %v5800_v60 = vpop.f32.mrb[231].mxu0 }
 0x41f   : > { %v5801_v39 = vadd.f32 %v5800_v60, %v5799_v57  ;;  %v8560_v7 = vadd.f32 %v6211_v31, %v5798_v20  ;;  %v6517_v20 = vld [vmem:[%s7066_s20 + $0x30] sm:$0xff]  ;;  %v6518_v60 = vld [vmem:[%s7066_s20 + $0x38] sm:$0xff] }
 0x420   : > { %v5722_v44 = vpop.f32.mrb[216].mxu1  ;;  %v4412_v57 = vrot.slane %v6517_v20, 4 }
 0x421   : > { %v5723_v55 = vpop.f32.mrb[217].mxu1  ;;  %v8562_v40 = vadd.f32 %v6217_v58, %v5801_v39  ;;  %v4413_v39 = vrot.slane %v6518_v60, 4 }
 0x422   : > { %v5724_v27 = vadd.f32 %v5723_v55, %v5722_v44  ;;  %v5725_v30 = vpop.f32.mrb[218].mxu1 }
 0x423   : > { %v5726_v46 = vpop.f32.mrb[219].mxu1  ;;  %v5802_v38 = vpop.f32.mrb[232].mxu0 }
 0x424   : > { %v6208_v1 = vadd.f32 %v5724_v27, %v8510_v9  ;;  %v5727_v5 = vadd.f32 %v5726_v46, %v5725_v30  ;;  %v5803_v52 = vpop.f32.mrb[233].mxu0 }
 0x425   : > { %v5804_v6 = vadd.f32 %v5803_v52, %v5802_v38  ;;  %v5805_v37 = vpop.f32.mrb[234].mxu0  ;;  %v6520_v38 = vld [vmem:[%s7066_s20 + $0x28] sm:$0xff] }
 0x426   : > { %v6214_v42 = vadd.f32 %v5727_v5, %v8512_v59  ;;  %v5806_v23 = vpop.f32.mrb[235].mxu0  ;;  %v4410_v52 = vrot.slane %v6520_v38, 4 }
 0x427   : > { %v5807_v53 = vadd.f32 %v5806_v23, %v5805_v37  ;;  %v8566_v11 = vadd.f32 %v6208_v1, %v5804_v6  ;;  %v6519_v1 = vld [vmem:[%s7066_s20 + $0x20] sm:$0xff] }
 0x428   : > { %v5728_v62 = vpop.f32.mrb[220].mxu1  ;;  %v4409_v5 = vrot.slane %v6519_v1, 4 }
 0x429   : > { %v5729_v25 = vpop.f32.mrb[221].mxu1  ;;  %v8568_v54 = vadd.f32 %v6214_v42, %v5807_v53 }
 0x42a   : > { %v5730_v10 = vadd.f32 %v5729_v25, %v5728_v62  ;;  %v5731_v4 = vpop.f32.mrb[222].mxu1 }
 0x42b   : > { %v5732_v2 = vpop.f32.mrb[223].mxu1  ;;  %v5808_v56 = vpop.f32.mrb[236].mxu0 }
 0x42c   : > { %v6223_v9 = vadd.f32 %v5730_v10, %v8514_v14  ;;  %v5733_v45 = vadd.f32 %v5732_v2, %v5731_v4  ;;  %v5809_v17 = vpop.f32.mrb[237].mxu0 }
 0x42d   : > { %v5810_v19 = vadd.f32 %v5809_v17, %v5808_v56  ;;  %v5811_v63 = vpop.f32.mrb[238].mxu0 }
 0x42e   : > { %v6229_v59 = vadd.f32 %v5733_v45, %v8516_v35  ;;  %v5812_v50 = vpop.f32.mrb[239].mxu0  ;;  %v4411_v45 = vsel %vm4408_vm6, %v4409_v5, %v4410_v52 }
 0x42f   : > { %v5813_v12 = vadd.f32 %v5812_v50, %v5811_v63  ;;  %v8572_v13 = vadd.f32 %v6223_v9, %v5810_v19  ;;  %v6522_v19 = vld [vmem:[%s7066_s20 + $0x58] sm:$0xff] }
 0x430   : > { %v5734_v16 = vpop.f32.mrb[224].mxu1  ;;  %v4419_v63 = vrot.slane %v6522_v19, 4 }
 0x431   : > { %v5735_v51 = vpop.f32.mrb[225].mxu1  ;;  %v8574_v43 = vadd.f32 %v6229_v59, %v5813_v12  ;;  %v6521_v59 = vld [vmem:[%s7066_s20 + $0x50] sm:$0xff] }
 0x432   : > { %v5736_v31 = vadd.f32 %v5735_v51, %v5734_v16  ;;  %v5737_v47 = vpop.f32.mrb[226].mxu1  ;;  %v6523_v16 = vld [vmem:[%s7066_s20 + $0x40] sm:$0xff] }
 0x433   : > { %v5738_v14 = vpop.f32.mrb[227].mxu1  ;;  %v5814_v35 = vpop.f32.mrb[240].mxu0  ;;  %v4415_v51 = vrot.slane %v6523_v16, 4 }
 0x434   : > { %v6220_v0 = vadd.f32 %v5736_v31, %v8518_v22  ;;  %v5739_v58 = vadd.f32 %v5738_v14, %v5737_v47  ;;  %v5815_v44 = vpop.f32.mrb[241].mxu0  ;;  %v4414_v22 = vsel %vm4408_vm6, %v4412_v57, %v4413_v39  ;;  %v6524_v31 = vld [vmem:[%s7066_s20 + $0x48] sm:$0xff]  ;;  %v4441_v14 = vunpack.c.l.bf16 %v4411_v45 }
 0x435   : > { %v5816_v27 = vadd.f32 %v5815_v44, %v5814_v35  ;;  %v5817_v30 = vpop.f32.mrb[242].mxu0  ;;  %v4443_v9 = vunpack.c.l.bf16 %v4414_v22  ;;  %v4444_v20 = vunpack.c.h.bf16 %v4414_v22  ;;  %v4442_v44 = vunpack.c.h.bf16 %v4411_v45 }
 0x436   : > { %v6226_v55 = vadd.f32 %v5739_v58, %v8520_v49  ;;  %v5818_v46 = vpop.f32.mrb[243].mxu0 }
 0x437   : > { %v5819_v42 = vadd.f32 %v5818_v46, %v5817_v30  ;;  %v8583_v37 = vadd.f32 %v6220_v0, %v5816_v27 }
 0x438   : > { %v6114_v6 = vpop.f32.mrb[180].mxu1 }
 0x439   : > { %v6177_v23 = vadd.f32 %v8530_v32, %v6114_v6  ;;  %v3942_v53 = vpop.f32.mrb[181].mxu1  ;;  %v8587_v25 = vadd.f32 %v6226_v55, %v5819_v42 }
 0x43a   : > { %v6181_v49 = vadd.f32 %v8522_v28, %v3942_v53  ;;  %v6115_v62 = vpop.f32.mrb[182].mxu1  ;;  %v8596_v28 = vld [vmem:[%s8727_s4] ss:$0 sm:$0xff] }
 0x43b   : > { %v6185_v10 = vadd.f32 %v8534_v8, %v6115_v62  ;;  %v3945_v4 = vpop.f32.mrb[183].mxu1  ;;  %v6178_v2 = vadd.f32 %v6177_v23, %v8532_v33  ;;  %v6146_v32 = vpop.f32.mrb[244].mxu0  ;;  %v4418_v8 = vrot.slane %v6521_v59, 4 }
 0x43c   : > { %v6189_v56 = vadd.f32 %v8526_v18, %v3945_v4  ;;  %v6182_v17 = vadd.f32 %v6181_v49, %v8524_v36  ;;  %v4329_v33 = vpop.f32.mrb[245].mxu0  ;;  %v4416_v18 = vrot.slane %v6524_v31, 4 }
 0x43d   : > { %v6179_v50 = vadd.f32 %v6178_v2, %v6146_v32  ;;  %v6186_v12 = vadd.f32 %v6185_v10, %v8536_v61  ;;  %v6147_v0 = vpop.f32.mrb[246].mxu0  ;;  %v4420_v61 = vsel %vm4408_vm6, %v4418_v8, %v4419_v63 }
 0x43e   : > { %v6183_v47 = vadd.f32 %v6182_v17, %v4329_v33  ;;  %v6190_v58 = vadd.f32 %v6189_v56, %v8528_v15  ;;  %v4332_v57 = vpop.f32.mrb[247].mxu0  ;;  %v4417_v15 = vsel %vm4408_vm6, %v4415_v51, %v4416_v18  ;;  %v4447_v49 = vunpack.c.l.bf16 %v4420_v61 }
 0x43f   : > { %v4466_v35 = vadd.f32 %v6179_v50, %v8596_v28  ;;  %v6187_v36 = vadd.f32 %v6186_v12, %v6147_v0  ;;  %v4445_v2 = vunpack.c.l.bf16 %v4417_v15  ;;  %v4446_v51 = vunpack.c.h.bf16 %v4417_v15 }
 0x440   : > { %v4464_v60 = vadd.f32 %v6183_v47, %v8596_v28  ;;  %v6191_v39 = vadd.f32 %v6190_v58, %v4332_v57  ;;  %v6118_v55 = vpop.f32.mrb[184].mxu1 }
 0x441   : > { %v4482_v27 = vadd.f32 %v4466_v35, %v4443_v9  ;;  %v4467_v30 = vadd.f32 %v6187_v36, %v8596_v28  ;;  %v6193_v46 = vadd.f32 %v8549_v41, %v6118_v55  ;;  %v3958_v1 = vpop.f32.mrb[185].mxu1 }
 0x442   : > { %v4480_v5 = vadd.f32 %v4464_v60, %v4441_v14  ;;  %v4465_v38 = vadd.f32 %v6191_v39, %v8596_v28  ;;  %v6197_v52 = vadd.f32 %v8539_v24, %v3958_v1  ;;  %v6119_v42 = vpop.f32.mrb[186].mxu1  ;;  %v6525_v60 = vld [vmem:[%s7066_s20 + $0x70] sm:$0xff] }
 0x443   : > { %v4483_v6 = vadd.f32 %v4467_v30, %v4444_v20  ;;  %v6201_v22 = vadd.f32 %v8554_v29, %v6119_v42  ;;  %v3961_v23 = vpop.f32.mrb[187].mxu1  ;;  %v6194_v53 = vadd.f32 %v6193_v46, %v8551_v21  ;;  %v6150_v41 = vpop.f32.mrb[248].mxu0  ;;  %v4498_v9 = vmax.f32 %v4482_v27, 0.0  ;;  %v6528_v30 = vld [vmem:[%s7066_s20 + $0x68] sm:$0xff] }
 0x444   : > { %v4481_v62 = vadd.f32 %v4465_v38, %v4442_v44  ;;  %v6205_v10 = vadd.f32 %v8544_v26, %v3961_v23  ;;  %v6198_v4 = vadd.f32 %v6197_v52, %v8541_v34  ;;  %v4345_v32 = vpop.f32.mrb[249].mxu0  ;;  %v4496_v17 = vmax.f32 %v4480_v5, 0.0  ;;  %v6526_v44 = vld [vmem:[%s7066_s20 + $0x78] sm:$0xff] }
 0x445   : > { %v4499_v45 = vmax.f32 %v4483_v6, 0.0  ;;  %v6195_v56 = vadd.f32 %v6194_v53, %v6150_v41  ;;  %v6202_v24 = vadd.f32 %v6201_v22, %v8556_v48  ;;  %v6151_v21 = vpop.f32.mrb[250].mxu0  ;;  %v4448_v34 = vunpack.c.h.bf16 %v4420_v61  ;;  %v6527_v61 = vld [vmem:[%s7066_s20 + $0x60] sm:$0xff] }
 0x446   : > { %v4497_v29 = vmax.f32 %v4481_v62, 0.0  ;;  %v6199_v59 = vadd.f32 %v6198_v4, %v4345_v32  ;;  %v6206_v8 = vadd.f32 %v6205_v10, %v8546_v3  ;;  %v4348_v50 = vpop.f32.mrb[251].mxu0  ;;  %v4424_v39 = vrot.slane %v6525_v60, 4  ;;  %v6530_v10 = vld [vmem:[%s7066_s20 + $0x98] sm:$0xff] }
 0x447   : > { %v5170_v19 = vpack.c.bf16 %v4499_v45, %v4498_v9  ;;  %v4470_v26 = vadd.f32 %v6195_v56, %v8596_v28  ;;  %v6203_v63 = vadd.f32 %v6202_v24, %v6151_v21  ;;  %v4425_v55 = vrot.slane %v6526_v44, 4  ;;  %v6531_v45 = vld [vmem:[%s7066_s20 + $0x80] sm:$0xff] }
 0x448   : > { %v5165_v33 = vpack.c.bf16 %v4497_v29, %v4496_v17  ;;  %v4468_v12 = vadd.f32 %v6199_v59, %v8596_v28  ;;  %v6207_v16 = vadd.f32 %v6206_v8, %v4348_v50  ;;  %v4421_v27 = vrot.slane %v6527_v61, 4 }
 0x449   : > { %5202 = vst [vmem:[%s7064_s2 + $0x8] sm:$0xff] %v5170_v19   ;;  %v4486_v48 = vadd.f32 %v4470_v26, %v4447_v49  ;;  %v4471_v31 = vadd.f32 %v6203_v63, %v8596_v28  ;;  %v4422_v46 = vrot.slane %v6528_v30, 4  ;;  %v4426_v1 = vsel %vm4408_vm6, %v4424_v39, %v4425_v55  ;;  %v6529_v49 = vld [vmem:[%s7066_s20 + $0x90] sm:$0xff] }
 0x44a   : > { %5166 = vst [vmem:[%s7064_s2] sm:$0xff] %v5165_v33   ;;  %v4484_v3 = vadd.f32 %v4468_v12, %v4445_v2  ;;  %v4469_v18 = vadd.f32 %v6207_v16, %v8596_v28  ;;  %v4451_v52 = vunpack.c.l.bf16 %v4426_v1  ;;  %v4452_v53 = vunpack.c.h.bf16 %v4426_v1 }
 0x44b   : > { %v4487_v47 = vadd.f32 %v4471_v31, %v4448_v34  ;;  %v4502_v0 = vmax.f32 %v4486_v48, 0.0  ;;  %v4423_v15 = vsel %vm4408_vm6, %v4421_v27, %v4422_v46  ;;  %v4430_v62 = vrot.slane %v6529_v49, 4 }
 0x44c   : > { %v4485_v14 = vadd.f32 %v4469_v18, %v4446_v51  ;;  %v4500_v35 = vmax.f32 %v4484_v3, 0.0  ;;  %v4449_v6 = vunpack.c.l.bf16 %v4423_v15  ;;  %v4431_v41 = vrot.slane %v6530_v10, 4 }
 0x44d   : > { %v4503_v58 = vmax.f32 %v4487_v47, 0.0  ;;  %v4427_v56 = vrot.slane %v6531_v45, 4 }
 0x44e   : > { %v4501_v36 = vmax.f32 %v4485_v14, 0.0  ;;  %v4432_v19 = vsel %vm4408_vm6, %v4430_v62, %v4431_v41 }
 0x44f   : > { %v5180_v20 = vpack.c.bf16 %v4503_v58, %v4502_v0  ;;  %v4455_v12 = vunpack.c.l.bf16 %v4432_v19  ;;  %v4456_v58 = vunpack.c.h.bf16 %v4432_v19 }
 0x450   : > { %v5175_v57 = vpack.c.bf16 %v4501_v36, %v4500_v35 }
 0x451   : > { %5204 = vst [vmem:[%s7064_s2 + $0x18] sm:$0xff] %v5180_v20  }
 0x452   : > { %5203 = vst [vmem:[%s7064_s2 + $0x10] sm:$0xff] %v5175_v57  }
 0x458   : > { %v6154_v5 = vpop.f32.mrb[188].mxu1 }
 0x459   : > { %v6210_v38 = vadd.f32 %v8566_v11, %v6154_v5  ;;  %v4361_v42 = vpop.f32.mrb[189].mxu1  ;;  %v6532_v11 = vld [vmem:[%s7066_s20 + $0x88] sm:$0xff]  ;;  %s6680_s20 = scalar_lea.vmem %s6679_s1, 2048 }
 0x45a   : > { %v6213_v22 = vadd.f32 %v8560_v7, %v4361_v42  ;;  %v6155_v23 = vpop.f32.mrb[190].mxu1  ;;  %v4428_v32 = vrot.slane %v6532_v11, 4  ;;  %v4450_v7 = vunpack.c.h.bf16 %v4423_v15  ;;  %p6682_p12 = scmp.lt.s32.totalorder %s6680_s20, %s6674_s12 }
 0x45b   : > { %v4474_v4 = vadd.f32 %v6210_v38, %v8596_v28  ;;  %v6216_v2 = vadd.f32 %v8568_v54, %v6155_v23  ;;  %v4364_v9 = vpop.f32.mrb[191].mxu1 }
 0x45c   : > { %v4472_v24 = vadd.f32 %v6213_v22, %v8596_v28  ;;  %v6219_v17 = vadd.f32 %v8562_v40, %v4364_v9  ;;  %v4429_v26 = vsel %vm4408_vm6, %v4427_v56, %v4428_v32  ;;  %p6683_p4 = por %p6682_p12, %p6681_p10 }
 0x45d   : > { %v4490_v29 = vadd.f32 %v4474_v4, %v4451_v52  ;;  %v4475_v59 = vadd.f32 %v6216_v2, %v8596_v28  ;;  %v4453_v3 = vunpack.c.l.bf16 %v4429_v26  ;;  %v4454_v57 = vunpack.c.h.bf16 %v4429_v26 }
 0x45e   : > { %v4488_v21 = vadd.f32 %v4472_v24, %v4449_v6  ;;  %v4473_v8 = vadd.f32 %v6219_v17, %v8596_v28  ;;  %p6684_p5 = pnand %p6683_p4, %p6677_p2 }
 0x45f   : > { %v4491_v54 = vadd.f32 %v4475_v59, %v4452_v53  ;;  %v4506_v50 = vmax.f32 %v4490_v29, 0.0 }
 0x460   : > { %v4489_v63 = vadd.f32 %v4473_v8, %v4450_v7  ;;  %v6158_v34 = vpop.f32.mrb[192].mxu1  ;;  %v4504_v51 = vmax.f32 %v4488_v21, 0.0 }
 0x461   : > { %v4507_v33 = vmax.f32 %v4491_v54, 0.0  ;;  %v6222_v40 = vadd.f32 %v8583_v37, %v6158_v34  ;;  %v4377_v16 = vpop.f32.mrb[193].mxu1 }
 0x462   : > { %v4505_v48 = vmax.f32 %v4489_v63, 0.0  ;;  %v6225_v31 = vadd.f32 %v8572_v13, %v4377_v16  ;;  %v6159_v18 = vpop.f32.mrb[194].mxu1 }
 0x463   : > { %v5190_v47 = vpack.c.bf16 %v4507_v33, %v4506_v50  ;;  %v4478_v14 = vadd.f32 %v6222_v40, %v8596_v28  ;;  %v6228_v0 = vadd.f32 %v8587_v25, %v6159_v18  ;;  %v4380_v37 = vpop.f32.mrb[195].mxu1 }
 0x464   : > { %v5185_v35 = vpack.c.bf16 %v4505_v48, %v4504_v51  ;;  %v4476_v36 = vadd.f32 %v6225_v31, %v8596_v28  ;;  %v6231_v20 = vadd.f32 %v8574_v43, %v4380_v37 }
 0x465   : > { %5206 = vst [vmem:[%s7064_s2 + $0x28] sm:$0xff] %v5190_v47   ;;  %v4494_v13 = vadd.f32 %v4478_v14, %v4455_v12  ;;  %v4479_v60 = vadd.f32 %v6228_v0, %v8596_v28 }
 0x466   : > { %5205 = vst [vmem:[%s7064_s2 + $0x20] sm:$0xff] %v5185_v35   ;;  %v4492_v39 = vadd.f32 %v4476_v36, %v4453_v3  ;;  %v4477_v25 = vadd.f32 %v6231_v20, %v8596_v28 }
 0x467   : > { %v4495_v44 = vadd.f32 %v4479_v60, %v4456_v58  ;;  %v4510_v61 = vmax.f32 %v4494_v13, 0.0 }
 0x468   : > { %v4493_v55 = vadd.f32 %v4477_v25, %v4454_v57  ;;  %v4508_v27 = vmax.f32 %v4492_v39, 0.0 }
 0x469   : > { %v4511_v43 = vmax.f32 %v4495_v44, 0.0 }
 0x46a   : > { %v4509_v30 = vmax.f32 %v4493_v55, 0.0 }
 0x46b   : > { %v5200_v46 = vpack.c.bf16 %v4511_v43, %v4510_v61 }
 0x46c   : > { %v5195_v28 = vpack.c.bf16 %v4509_v30, %v4508_v27 }
 0x46d   : > { %5208 = vst [vmem:[%s7064_s2 + $0x38] sm:$0xff] %v5200_v46  }
 0x46e   : > { %5207 = vst [vmem:[%s7064_s2 + $0x30] sm:$0xff] %v5195_v28  }
 0x46f   : > { %6687 = shalt.err (!%p6684_p5)
}
 0x470   : > { %s6688_s2 = scalar_lea.hbm %s8663_s8, 1024  ;;  %s6692_s17 = scalar_lea.hbm %s8729_s6, 4096 }
 0x471   : > { %p6689_p1 = scmp.ne.s32.totalorder %s8663_s8, %s6688_s2  ;;  %p6693_p11 = scmp.lt.u32.totalorder %s8663_s8, %s8729_s6 }
 0x472   : > { %p6694_p0 = scmp.lt.u32.totalorder %s6692_s17, %s6688_s2  ;;  %p6696_p9 = scmp.lt.u32.totalorder %s6688_s2, %s8663_s8 }
 0x473   : > { %p6690_p8 = pnand %p6689_p1, %p8864_p13 }
 0x474   : > { %p6695_p6 = por %p6694_p0, %p6693_p11 }
 0x475   : > { %p6691_p7 = pneg %p6690_p8 }
 0x476   : > { %p6697_p3 = por %p6696_p9, %p6695_p6 }
 0x478   : > { %p6698_p2 = pnand %p6697_p3, %p6691_p7 }
 0x47a   : > { %6701 = shalt.err (!%p6698_p2)
}
 0x47b   : > { %s6791_s19 = smov 64   ;;  %s6792_s7 = smov 4  }
 0x47c   : > { %6272 = dma.vmem_to_hbm [thread:$0]  (%p8864_p13), %s8665_s16, 1024, %s8663_s8, %s8671_s13, %s6791_s19, %s6791_s19, %s6792_s7  }
 0x47d PF: > { %s8865_s23 = sld [smem:[#allocation26_spill]]  ;;  %p6296_p10 = scmp.ge.s32.totalorder %s6778_s28, 2 }
 0x47e   : > { %s4624_s9 = sand.u32 1, %s6750_s21  }
 0x47f   : > { %s4625_s24 = scalar_lea.sflag [#allocation6], %s4624_s9 }
 0x483   : > { %p8866_p12 = scmp.ne.s32.totalorder %s8865_s23, 0 }
 0x485   : > { %p6285_p4 = pnand %p6296_p10, %p8866_p12 }
 0x487   : > { %6745 = dma.done.wait (!%p6285_p4), %s4625_s24, 1024  }
 0x488   : > { %6747 = vsyncadd (!%p6285_p4), %s4625_s24, 4294966272  ;;  %s21_s28 = sadd.s32 1, %s6778_s28   ;;  %s8867_s25 = sld [smem:[#allocation21_spill]] }
 0x489   : > { %p18_p5 = scmp.ge.s32.totalorder %s21_s28, 6   ;;  %s8868_s23 = sld [smem:[#allocation27_spill]] }
 0x48a   : > { %s8869_s24 = sld [smem:[#allocation22_spill]]  ;;  %s8870_s11 = sld [smem:[#allocation23_spill]] }
 0x48b   : > { %s8871_s26 = sld [smem:[#allocation24_spill]]  ;;  %s8872_s27 = sld [smem:[#allocation25_spill]] }
 0x48c   : > { %s8873_s21 = smov %s6754_s22  ;;  %20 = sbr.rel (!%p18_p5) target bundleno = 10 (0xa), region = 112 }
 0x48e   : > { %s8874_s22 = smov %s8867_s25 }
 0x490   : > { %s8875_s25 = smov %s8870_s11 }
 0x493   :  { %4630 = vsyncpa [#allocation5], 1 }
 0x494   :  { %4632 = vsyncpa [#allocation5 + $0x1], 1 }
 0x495   :  { %4633 = vsyncpa [#allocation8], 1 }
 0x496   :  { %4634 = vsyncpa [#allocation6], 1 }
 0x497   :  { %4636 = vsyncpa [#allocation6 + $0x1], 1 }
 0x498   :  { %4637 = vsyncmov [#allocation3] }
 0x49b   :  { %s4638_s16 = vpop.sfrf %4637 }
 0x49c   :  { %p5140_p13 = scmp.ne.s32.totalorder %s4638_s16, 0 }
 0x49e   :  { %4642 = shalt.err (%p5140_p13)  }
 0x49f   :  { %4644 = vsyncmov [#allocation3 + $0x1] }
 0x4a2   :  { %s4645_s30 = vpop.sfrf %4644 }
 0x4a3   :  { %p5141_p1 = scmp.ne.s32.totalorder %s4645_s30, 0 }
 0x4a5   :  { %4649 = shalt.err (%p5141_p1)  }

</bundles_post_ra>
